<compile_context>
chip_gen: v6e
topology: v6e:2x2x1
jax: 0.10.0
libtpu: 0.0.40
codegen_flags: <defaults>
</compile_context>

<pallas_src>
import functools

import jax
import jax.numpy as jnp
from jax.experimental import pallas as pl
from jax.experimental.pallas import tpu as pltpu

_TN_MAX = 1024                      # point-axis tile (review: 1024 is v7x-safe, sweepable)
_LANE = 128                         # lane width for dense output stores
_VMEM_LIMIT_BYTES = 48 * 1024 * 1024  # > 32MiB default, < v7x's 64MiB physical VMEM


def _round_up(x, m):
    return (x + m - 1) // m * m


# --------------------------- fused conv-chain + max ---------------------------

def _make_conv_max_kernel(n_layers, n_points, tn, ntps, has_trans, needs_mask):
    """Chain of (x @ w + b, ReLU) layers on a (tn, K0) point tile (bf16 matmuls,
    f32 accumulate/elementwise), followed by a running max over the point axis
    kept as an (8, C) VMEM accumulator (VPU only); the 8->1 cross-sublane XLU
    reduce happens once in the epilogue."""

    def kernel(*args):
        pos = 0
        x_ref = args[pos]; pos += 1
        trans_ref = None
        if has_trans:
            trans_ref = args[pos]; pos += 1
        wb = args[pos:pos + 2 * n_layers]; pos += 2 * n_layers
        o_ref = args[pos]; pos += 1
        acc_ref = args[pos]

        s_idx = pl.program_id(1)            # point-split (megacore) index
        n_idx = pl.program_id(2)            # tile index within the split

        x = x_ref[...]                      # (tn, K0) f32
        valid = None
        if needs_mask:
            # number of still-valid points in this (possibly clamped) tile
            rem = n_points - (s_idx * ntps + n_idx) * tn
            rows = jax.lax.broadcasted_iota(jnp.int32, (tn, 1), 0)
            valid = rows < rem
            x = jnp.where(valid, x, 0.0)    # keep padded rows finite (NaN guard)

        # first-layer weight; fold the per-batch 3x3 STN transform on the VPU (f32)
        w0 = wb[0][...].astype(jnp.float32)                 # (K0, C1)
        if has_trans:
            t = trans_ref[...]                              # (3, 3) f32
            w0 = sum(t[:, k:k + 1] * w0[k:k + 1, :] for k in range(t.shape[0]))

        h = x.astype(jnp.bfloat16)
        w = w0.astype(jnp.bfloat16)
        for i in range(n_layers):
            if i > 0:
                w = wb[2 * i][...]                          # bf16 (pre-cast at prep)
                h = h.astype(jnp.bfloat16)
            b = wb[2 * i + 1][...]                          # (1, C_i) f32
            h = jnp.dot(h, w, preferred_element_type=jnp.float32) + b
            h = jnp.maximum(h, 0.0)                         # f32 elementwise (v5e-safe)

        if needs_mask:
            h = jnp.where(valid, h, -jnp.inf)               # padded rows never win the max

        # VPU-only partial max down to 8 sublanes (layout-preserving reshape)
        part = jnp.max(h.reshape(tn // 8, 8, h.shape[-1]), axis=0)   # (8, c_out)

        @pl.when(n_idx == 0)
        def _():
            acc_ref[...] = jnp.full_like(acc_ref, -jnp.inf)

        acc_ref[...] = jnp.maximum(acc_ref[...], part)

        @pl.when(n_idx == pl.num_programs(2) - 1)
        def _():
            # single cross-sublane (XLU) reduce per (batch, split)
            o_ref[...] = jnp.max(acc_ref[...], axis=0, keepdims=True).astype(o_ref.dtype)

    return kernel


def fused_conv_max(x_bnk, ws, bs, trans=None):
    """Fused 1x1-conv chain (folded BN+bias, ReLU each layer) + max over points.

    x_bnk : (B, N, K0) f32 channel-last points.
    ws[0] : (K0, C1) f32 (optionally pre-multiplied in-kernel by `trans`).
    ws[i>0]: (C_i, C_{i+1}) bf16.    bs[i]: (C_{i+1},) f32.
    trans : optional (B, K0, K0) f32 per-batch input transform (STN).
    Returns (B, n_splits, C_last) f32 per-split partial maxes (combine with a max).
    """
    B, N, K0 = x_bnk.shape
    n_layers = len(ws)
    chans = [w.shape[-1] for w in ws]
    c_out = chans[-1]
    has_trans = trans is not None

    tn = min(_TN_MAX, _round_up(N, 8))
    n_tiles = pl.cdiv(N, tn)
    n_splits = 2 if n_tiles >= 2 else 1        # keep both v7x TensorCores busy at small B
    ntps = pl.cdiv(n_tiles, n_splits)          # tiles per split
    needs_mask = (n_splits * ntps * tn) != N   # ragged tail / over-covered splits

    # Clamp the tile index so a fully-out-of-range step re-reads the last valid
    # block (its contribution is masked to -inf in the kernel) instead of issuing
    # an out-of-bounds DMA.
    def x_map(b, s, n):
        return (b, jnp.minimum(s * ntps + n, n_tiles - 1), 0)

    in_specs = [pl.BlockSpec((None, tn, K0), x_map)]
    args = [x_bnk]
    if has_trans:
        in_specs.append(pl.BlockSpec((None, K0, K0), lambda b, s, n: (b, 0, 0)))
        args.append(trans)
    for i in range(n_layers):
        in_specs += [pl.BlockSpec(ws[i].shape, lambda b, s, n: (0, 0)),
                     pl.BlockSpec((1, chans[i]), lambda b, s, n: (0, 0))]
        args += [ws[i], bs[i].reshape(1, -1)]

    pts = n_splits * ntps * tn
    flops = 2 * B * pts * sum(a * c for a, c in zip([K0] + chans[:-1], chans))
    bytes_accessed = int(4 * x_bnk.size
                         + sum(int(w.size) * w.dtype.itemsize for w in ws)
                         + 4 * B * n_splits * c_out)

    out = pl.pallas_call(
        _make_conv_max_kernel(n_layers, N, tn, ntps, has_trans, needs_mask),
        out_shape=jax.ShapeDtypeStruct((B * n_splits, 1, c_out), jnp.float32),
        grid=(B, n_splits, ntps),
        in_specs=in_specs,
        out_specs=pl.BlockSpec((None, 1, c_out),
                               lambda b, s, n: (b * n_splits + s, 0, 0)),
        scratch_shapes=[pltpu.VMEM((8, c_out), jnp.float32)],
        compiler_params=pltpu.CompilerParams(
            dimension_semantics=("parallel", "parallel", "arbitrary"),
            vmem_limit_bytes=_VMEM_LIMIT_BYTES),
        cost_estimate=pl.CostEstimate(flops=int(flops), transcendentals=0,
                                      bytes_accessed=bytes_accessed),
    )(*args)
    return out.reshape(B, n_splits, c_out)


# ------------------------------- fused FC head --------------------------------

def _make_mlp_kernel(n_layers, reduce_s):
    def kernel(*args):
        o_ref = args[1 + 2 * n_layers]
        h = args[0][...]
        if reduce_s:
            h = jnp.max(h, axis=1)          # combine the per-core point-split maxes
        for i in range(n_layers):
            w = args[1 + 2 * i][...]        # bf16
            b = args[2 + 2 * i][...]        # (1, C) f32
            h = jnp.dot(h.astype(jnp.bfloat16), w,
                        preferred_element_type=jnp.float32) + b
            if i < n_layers - 1:
                h = jnp.maximum(h, 0.0)
        o_ref[...] = h.astype(o_ref.dtype)
    return kernel


def fused_mlp(x_bsc, ws, bs):
    """Fused small MLP head (ReLU after all but the last layer).  Input is
    (B, n_splits, C): the split partial maxes are combined in-kernel.  The last
    layer's output columns are pre-padded to a lane multiple for dense stores."""
    B, S, C0 = x_bsc.shape
    n_layers = len(ws)
    c_out = ws[-1].shape[1]

    if S == 1:
        x_in = x_bsc.reshape(B, C0)
        x_spec = pl.BlockSpec((B, C0), lambda i: (0, 0))
    else:
        x_in = x_bsc
        x_spec = pl.BlockSpec((B, S, C0), lambda i: (0, 0, 0))

    in_specs = [x_spec]
    args = [x_in]
    for i in range(n_layers):
        in_specs += [pl.BlockSpec(ws[i].shape, lambda i_: (0, 0)),
                     pl.BlockSpec((1, ws[i].shape[1]), lambda i_: (0, 0))]
        args += [ws[i], bs[i].reshape(1, -1)]

    chans = [w.shape[1] for w in ws]
    flops = 2 * B * sum(a * c for a, c in zip([C0] + chans[:-1], chans))
    bytes_accessed = int(4 * x_in.size
                         + sum(int(w.size) * w.dtype.itemsize for w in ws)
                         + 4 * B * c_out)

    return pl.pallas_call(
        _make_mlp_kernel(n_layers, reduce_s=(S > 1)),
        out_shape=jax.ShapeDtypeStruct((B, c_out), jnp.float32),
        grid=(1,),
        in_specs=in_specs,
        out_specs=pl.BlockSpec((B, c_out), lambda i: (0, 0)),
        compiler_params=pltpu.CompilerParams(dimension_semantics=("arbitrary",)),
        cost_estimate=pl.CostEstimate(flops=int(flops), transcendentals=0,
                                      bytes_accessed=bytes_accessed),
    )(*args)


# --------------------------- deterministic parameters --------------------------

def _init_linear(key, cin, cout):
    kw, kb = jax.random.split(key)
    w = jax.random.normal(kw, (cin, cout), jnp.float32) / jnp.sqrt(float(cin))
    b = 0.01 * jax.random.normal(kb, (cout,), jnp.float32)
    return {"w": w, "b": b}


def _init_bn(key, c, eps=1e-5):
    # Inference-mode BatchNorm1d folded into an affine (scale, shift).
    k1, k2, k3, k4 = jax.random.split(key, 4)
    gamma = 1.0 + 0.1 * jax.random.normal(k1, (c,), jnp.float32)
    beta = 0.1 * jax.random.normal(k2, (c,), jnp.float32)
    mean = 0.1 * jax.random.normal(k3, (c,), jnp.float32)
    var = jnp.abs(1.0 + 0.1 * jax.random.normal(k4, (c,), jnp.float32))
    scale = gamma / jnp.sqrt(var + eps)
    shift = beta - mean * scale
    return {"scale": scale, "shift": shift}


def init_pointnet_params(key, npf, num_class=40):
    keys = jax.random.split(key, 32)
    ki = iter(keys)
    p = {}
    # ---- STN3D (canonical: convs 3->64->128->1024, fcs 1024->512->256->9) ----
    stn = {}
    stn["convs"] = [(_init_linear(next(ki), a, b), _init_bn(next(ki), b))
                    for a, b in [(3, 64), (64, 128), (128, 1024)]]
    stn["fcs"] = [(_init_linear(next(ki), a, b), _init_bn(next(ki), b))
                  for a, b in [(1024, 512), (512, 256)]]
    stn["fc3"] = _init_linear(next(ki), 256, 9)
    p["stn"] = stn
    # ---- main trunk ----
    conv_dims = [(3, npf), (npf, npf), (npf, npf), (npf, 2 * npf),
                 (2 * npf, 16 * npf)]
    p["convs"] = [(_init_linear(next(ki), a, b), _init_bn(next(ki), b))
                  for a, b in conv_dims]
    p["fcs"] = [(_init_linear(next(ki), a, b), _init_bn(next(ki), b))
                for a, b in [(16 * npf, 8 * npf), (8 * npf, 4 * npf)]]
    p["fc3"] = _init_linear(next(ki), 4 * npf, num_class)
    return p


def prepare_params(params):
    """One-time prep: fold BN+bias into weights, cast to bf16 for the MXU
    (first conv weights stay f32 for the in-kernel STN fold), pad the tiny
    final lane dims to 128 for dense stores."""
    def fold(lin, bn, dtype):
        w = lin["w"] * bn["scale"][None, :]
        b = lin["b"] * bn["scale"] + bn["shift"]
        return w.astype(dtype), b.astype(jnp.float32)

    def pad_cols(w, b, mult=_LANE):
        c = w.shape[1]
        cp = _round_up(c, mult)
        if cp > c:
            w = jnp.pad(w, ((0, 0), (0, cp - c)))
            b = jnp.pad(b, (0, cp - c))
        return w, b

    prep = {}
    stn = params["stn"]

    sws, sbs = [], []
    for i, (lin, bn) in enumerate(stn["convs"]):
        w, b = fold(lin, bn, jnp.float32 if i == 0 else jnp.bfloat16)
        sws.append(w); sbs.append(b)
    prep["stn_conv_ws"], prep["stn_conv_bs"] = sws, sbs

    fws, fbs = zip(*[fold(l, bn, jnp.bfloat16) for l, bn in stn["fcs"]])
    w3, b3 = pad_cols(stn["fc3"]["w"], stn["fc3"]["b"])
    prep["stn_fc_ws"] = list(fws) + [w3.astype(jnp.bfloat16)]
    prep["stn_fc_bs"] = list(fbs) + [b3.astype(jnp.float32)]

    cws, cbs = [], []
    for i, (lin, bn) in enumerate(params["convs"]):
        w, b = fold(lin, bn, jnp.float32 if i == 0 else jnp.bfloat16)
        cws.append(w); cbs.append(b)
    prep["conv1_w"], prep["conv1_b"] = cws[0], cbs[0]   # trans folded in-kernel
    prep["conv_ws_rest"], prep["conv_bs_rest"] = cws[1:], cbs[1:]

    tws, tbs = zip(*[fold(l, bn, jnp.bfloat16) for l, bn in params["fcs"]])
    w3, b3 = pad_cols(params["fc3"]["w"], params["fc3"]["b"])
    prep["fc_ws"] = list(tws) + [w3.astype(jnp.bfloat16)]
    prep["fc_bs"] = list(tbs) + [b3.astype(jnp.float32)]
    return prep


# -------------------------------- forward pass ---------------------------------

def pointnet_forward(x_bcn, prep, *, num_class):
    # x_bcn: (B, 3, N) -- identical to the PyTorch NCW input layout.
    B = x_bcn.shape[0]
    # Single cheap layout change shared by the STN and trunk kernels; no K-pad /
    # N-pad passes over the point cloud anymore (handled in-kernel).
    x = jnp.transpose(x_bcn, (0, 2, 1)).astype(jnp.float32)          # (B, N, 3)

    # ---- STN3D: fused conv chain + max (per-split), then fused FC head ----
    g = fused_conv_max(x, prep["stn_conv_ws"], prep["stn_conv_bs"])  # (B, S, 1024)
    t = fused_mlp(g, prep["stn_fc_ws"], prep["stn_fc_bs"])[:, :9]    # (B, 9)
    trans = t.reshape(B, 3, 3) + jnp.eye(3, dtype=jnp.float32)[None]  # (B, 3, 3) tiny

    # ---- main trunk: conv1..conv5 + relu + max-over-points; the 3x3 transform
    #      is folded into conv1's weight inside the kernel ((x@T)@W == x@(T@W)).
    g = fused_conv_max(x, [prep["conv1_w"]] + prep["conv_ws_rest"],
                       [prep["conv1_b"]] + prep["conv_bs_rest"],
                       trans=trans)                                   # (B, S, 16*npf)

    # ---- FC head (fc1+bn6+relu, fc2+bn7+relu, fc3); split-combine done in-kernel.
    # TODO(synk): Dropout(0.3) is treated as inference-mode identity (no RNG mask).
    logits = fused_mlp(g, prep["fc_ws"], prep["fc_bs"])[:, :num_class]
    return logits


# ------------------------- pure-jnp reference (sanity) -------------------------

def _reference_forward(x_bcn, prep, *, num_class):
    """Mirror of the fused kernels (same bf16-input / f32-accumulate precision
    choices) used only for the in-script tolerance check."""
    def dot(h, w):
        return jnp.dot(h.astype(jnp.bfloat16), w.astype(jnp.bfloat16),
                       preferred_element_type=jnp.float32)

    def chain_max(x, ws, bs):
        h = x
        for w, b in zip(ws, bs):
            h = jnp.maximum(dot(h, w) + b, 0.0)
        return jnp.max(h, axis=1)

    def mlp(h, ws, bs):
        for i, (w, b) in enumerate(zip(ws, bs)):
            h = dot(h, w) + b
            if i < len(ws) - 1:
                h = jnp.maximum(h, 0.0)
        return h

    B = x_bcn.shape[0]
    x = jnp.transpose(x_bcn, (0, 2, 1)).astype(jnp.float32)
    g = chain_max(x, prep["stn_conv_ws"], prep["stn_conv_bs"])
    t = mlp(g, prep["stn_fc_ws"], prep["stn_fc_bs"])[:, :9]
    trans = t.reshape(B, 3, 3) + jnp.eye(3, dtype=jnp.float32)[None]
    w1_eff = jnp.einsum("bij,jk->bik", trans, prep["conv1_w"].astype(jnp.float32))
    h = jnp.einsum("bnk,bkc->bnc", x.astype(jnp.bfloat16),
                   w1_eff.astype(jnp.bfloat16),
                   preferred_element_type=jnp.float32) + prep["conv1_b"]
    h = jnp.maximum(h, 0.0)
    for w, b in zip(prep["conv_ws_rest"], prep["conv_bs_rest"]):
        h = jnp.maximum(dot(h, w) + b, 0.0)
    g = jnp.max(h, axis=1)
    return mlp(g, prep["fc_ws"], prep["fc_bs"])[:, :num_class]


if __name__ == "__main__":
    key = jax.random.PRNGKey(0)
    kx, kp, kx2 = jax.random.split(key, 3)
    npf, num_class = 8, 40
    params = init_pointnet_params(kp, npf, num_class)
    prep = prepare_params(params)
    fwd = jax.jit(functools.partial(pointnet_forward, num_class=num_class))

    # case 1: tiny shape (single tile, no masking, no point-split)
    B, N = 2, 16
    x = jax.random.normal(kx, (B, 3, N), jnp.float32)      # (B, C=3, N) like PyTorch
    out = jax.block_until_ready(fwd(x, prep))
    assert out.shape == (B, num_class)
    assert bool(jnp.all(jnp.isfinite(out)))
    ref = _reference_forward(x, prep, num_class=num_class)
    assert float(jnp.max(jnp.abs(out - ref))) < 5e-2

    # case 2: multi-tile point cloud exercising the dual-core point split,
    # the ragged-tail masking and the clamped tile indexing.
    B2, N2 = 2, 2304
    x2 = jax.random.normal(kx2, (B2, 3, N2), jnp.float32)
    out2 = jax.block_until_ready(fwd(x2, prep))
    assert out2.shape == (B2, num_class)
    assert bool(jnp.all(jnp.isfinite(out2)))
    ref2 = _reference_forward(x2, prep, num_class=num_class)
    assert float(jnp.max(jnp.abs(out2 - ref2))) < 5e-2

    print("KERNEL_OK")
</pallas_src>

<mosaic_0001>
module attributes {stable_mosaic.version = 11 : i64} {
  func.func @kernel(%arg0: i32, %arg1: memref<2x1024xf32, #tpu.memory_space<vmem>>, %arg2: memref<1024x512xbf16, #tpu.memory_space<vmem>>, %arg3: memref<1x512xf32, #tpu.memory_space<vmem>>, %arg4: memref<512x256xbf16, #tpu.memory_space<vmem>>, %arg5: memref<1x256xf32, #tpu.memory_space<vmem>>, %arg6: memref<256x128xbf16, #tpu.memory_space<vmem>>, %arg7: memref<1x128xf32, #tpu.memory_space<vmem>>, %arg8: memref<2x128xf32, #tpu.memory_space<vmem>>) attributes {dimension_semantics = [#tpu.dimension_semantics<arbitrary>], iteration_bounds = array<i64: 1>, scalar_prefetch = 0 : i64, scratch_operands = 0 : i64, tpu.core_type = #tpu.core_type<tc>, window_params = [{pipeline_mode = #tpu.pipeline_mode<synchronous>, transform_indices = @transform_0, window_bounds = array<i64: 2, 1024>}, {pipeline_mode = #tpu.pipeline_mode<synchronous>, transform_indices = @transform_1, window_bounds = array<i64: 1024, 512>}, {pipeline_mode = #tpu.pipeline_mode<synchronous>, transform_indices = @transform_2, window_bounds = array<i64: 1, 512>}, {pipeline_mode = #tpu.pipeline_mode<synchronous>, transform_indices = @transform_3, window_bounds = array<i64: 512, 256>}, {pipeline_mode = #tpu.pipeline_mode<synchronous>, transform_indices = @transform_4, window_bounds = array<i64: 1, 256>}, {pipeline_mode = #tpu.pipeline_mode<synchronous>, transform_indices = @transform_5, window_bounds = array<i64: 256, 128>}, {pipeline_mode = #tpu.pipeline_mode<synchronous>, transform_indices = @transform_6, window_bounds = array<i64: 1, 128>}, {pipeline_mode = #tpu.pipeline_mode<synchronous>, transform_indices = @transform_7, window_bounds = array<i64: 2, 128>}]} {
    %c0 = arith.constant 0 : index
    %c0_0 = arith.constant 0 : index
    %0 = vector.load %arg1[%c0, %c0_0] : memref<2x1024xf32, #tpu.memory_space<vmem>>, vector<2x1024xf32>
    %c0_1 = arith.constant 0 : index
    %c0_2 = arith.constant 0 : index
    %1 = vector.load %arg2[%c0_1, %c0_2] : memref<1024x512xbf16, #tpu.memory_space<vmem>>, vector<1024x512xbf16>
    %c0_3 = arith.constant 0 : index
    %c0_4 = arith.constant 0 : index
    %2 = vector.load %arg3[%c0_3, %c0_4] : memref<1x512xf32, #tpu.memory_space<vmem>>, vector<1x512xf32>
    %3 = arith.truncf %0 : vector<2x1024xf32> to vector<2x1024xbf16>
    %cst = arith.constant dense<0.000000e+00> : vector<2x512xf32>
    %4 = tpu.matmul %3, %1, %cst {dimension_numbers = #tpu.dot_dimension_numbers<[1], [0], [0], [1], [0, 0, 1, 1], [], []>} : vector<2x1024xbf16>, vector<1024x512xbf16>, vector<2x512xf32> -> vector<2x512xf32>
    %5 = vector.broadcast %2 : vector<1x512xf32> to vector<2x512xf32>
    %6 = arith.addf %4, %5 : vector<2x512xf32>
    %cst_5 = arith.constant 0.000000e+00 : f32
    %7 = vector.broadcast %cst_5 : f32 to vector<2x512xf32>
    %8 = arith.maximumf %6, %7 : vector<2x512xf32>
    %c0_6 = arith.constant 0 : index
    %c0_7 = arith.constant 0 : index
    %9 = vector.load %arg4[%c0_6, %c0_7] : memref<512x256xbf16, #tpu.memory_space<vmem>>, vector<512x256xbf16>
    %c0_8 = arith.constant 0 : index
    %c0_9 = arith.constant 0 : index
    %10 = vector.load %arg5[%c0_8, %c0_9] : memref<1x256xf32, #tpu.memory_space<vmem>>, vector<1x256xf32>
    %11 = arith.truncf %8 : vector<2x512xf32> to vector<2x512xbf16>
    %cst_10 = arith.constant dense<0.000000e+00> : vector<2x256xf32>
    %12 = tpu.matmul %11, %9, %cst_10 {dimension_numbers = #tpu.dot_dimension_numbers<[1], [0], [0], [1], [0, 0, 1, 1], [], []>} : vector<2x512xbf16>, vector<512x256xbf16>, vector<2x256xf32> -> vector<2x256xf32>
    %13 = vector.broadcast %10 : vector<1x256xf32> to vector<2x256xf32>
    %14 = arith.addf %12, %13 : vector<2x256xf32>
    %cst_11 = arith.constant 0.000000e+00 : f32
    %15 = vector.broadcast %cst_11 : f32 to vector<2x256xf32>
    %16 = arith.maximumf %14, %15 : vector<2x256xf32>
    %c0_12 = arith.constant 0 : index
    %c0_13 = arith.constant 0 : index
    %17 = vector.load %arg6[%c0_12, %c0_13] : memref<256x128xbf16, #tpu.memory_space<vmem>>, vector<256x128xbf16>
    %c0_14 = arith.constant 0 : index
    %c0_15 = arith.constant 0 : index
    %18 = vector.load %arg7[%c0_14, %c0_15] : memref<1x128xf32, #tpu.memory_space<vmem>>, vector<1x128xf32>
    %19 = arith.truncf %16 : vector<2x256xf32> to vector<2x256xbf16>
    %cst_16 = arith.constant dense<0.000000e+00> : vector<2x128xf32>
    %20 = tpu.matmul %19, %17, %cst_16 {dimension_numbers = #tpu.dot_dimension_numbers<[1], [0], [0], [1], [0, 0, 1, 1], [], []>} : vector<2x256xbf16>, vector<256x128xbf16>, vector<2x128xf32> -> vector<2x128xf32>
    %21 = vector.broadcast %18 : vector<1x128xf32> to vector<2x128xf32>
    %22 = arith.addf %20, %21 : vector<2x128xf32>
    %c0_17 = arith.constant 0 : index
    %c0_18 = arith.constant 0 : index
    %23 = vector.load %arg8[%c0_17, %c0_18] : memref<2x128xf32, #tpu.memory_space<vmem>>, vector<2x128xf32>
    tpu.vector_store %arg8[%c0_17, %c0_18], %22 {strides = array<i32>} : memref<2x128xf32, #tpu.memory_space<vmem>>, vector<2x128xf32>,
    return
  }
  func.func @transform_0(%arg0: i32) -> (i32, i32) {
    %c0_i32 = arith.constant 0 : i32
    %c0_i32_0 = arith.constant 0 : i32
    %c0_i32_1 = arith.constant 0 : i32
    return %c0_i32, %c0_i32_0 : i32, i32
  }
  func.func @transform_1(%arg0: i32) -> (i32, i32) {
    %c0_i32 = arith.constant 0 : i32
    %c0_i32_0 = arith.constant 0 : i32
    %c0_i32_1 = arith.constant 0 : i32
    return %c0_i32, %c0_i32_0 : i32, i32
  }
  func.func @transform_2(%arg0: i32) -> (i32, i32) {
    %c0_i32 = arith.constant 0 : i32
    %c0_i32_0 = arith.constant 0 : i32
    %c0_i32_1 = arith.constant 0 : i32
    return %c0_i32, %c0_i32_0 : i32, i32
  }
  func.func @transform_3(%arg0: i32) -> (i32, i32) {
    %c0_i32 = arith.constant 0 : i32
    %c0_i32_0 = arith.constant 0 : i32
    %c0_i32_1 = arith.constant 0 : i32
    return %c0_i32, %c0_i32_0 : i32, i32
  }
  func.func @transform_4(%arg0: i32) -> (i32, i32) {
    %c0_i32 = arith.constant 0 : i32
    %c0_i32_0 = arith.constant 0 : i32
    %c0_i32_1 = arith.constant 0 : i32
    return %c0_i32, %c0_i32_0 : i32, i32
  }
  func.func @transform_5(%arg0: i32) -> (i32, i32) {
    %c0_i32 = arith.constant 0 : i32
    %c0_i32_0 = arith.constant 0 : i32
    %c0_i32_1 = arith.constant 0 : i32
    return %c0_i32, %c0_i32_0 : i32, i32
  }
  func.func @transform_6(%arg0: i32) -> (i32, i32) {
    %c0_i32 = arith.constant 0 : i32
    %c0_i32_0 = arith.constant 0 : i32
    %c0_i32_1 = arith.constant 0 : i32
    return %c0_i32, %c0_i32_0 : i32, i32
  }
  func.func @transform_7(%arg0: i32) -> (i32, i32) {
    %c0_i32 = arith.constant 0 : i32
    %c0_i32_0 = arith.constant 0 : i32
    %c0_i32_1 = arith.constant 0 : i32
    return %c0_i32, %c0_i32_0 : i32, i32
  }
}

module attributes {stable_mosaic.version = 11 : i64} {
  func.func @kernel(%arg0: i32, %arg1: i32, %arg2: i32, %arg3: memref<1x16x3xf32, #tpu.memory_space<vmem>>, %arg4: memref<3x64xf32, #tpu.memory_space<vmem>>, %arg5: memref<1x64xf32, #tpu.memory_space<vmem>>, %arg6: memref<64x128xbf16, #tpu.memory_space<vmem>>, %arg7: memref<1x128xf32, #tpu.memory_space<vmem>>, %arg8: memref<128x1024xbf16, #tpu.memory_space<vmem>>, %arg9: memref<1x1024xf32, #tpu.memory_space<vmem>>, %arg10: memref<1x1x1024xf32, #tpu.memory_space<vmem>>, %arg11: memref<8x1024xf32, #tpu.memory_space<vmem>>) attributes {dimension_semantics = [#tpu.dimension_semantics<parallel>, #tpu.dimension_semantics<parallel>, #tpu.dimension_semantics<arbitrary>], iteration_bounds = array<i64: 2, 1, 1>, scalar_prefetch = 0 : i64, scratch_operands = 1 : i64, tpu.core_type = #tpu.core_type<tc>, window_params = [{transform_indices = @transform_0, window_bounds = array<i64: 1, 16, 3>}, {pipeline_mode = #tpu.pipeline_mode<synchronous>, transform_indices = @transform_1, window_bounds = array<i64: 3, 64>}, {pipeline_mode = #tpu.pipeline_mode<synchronous>, transform_indices = @transform_2, window_bounds = array<i64: 1, 64>}, {pipeline_mode = #tpu.pipeline_mode<synchronous>, transform_indices = @transform_3, window_bounds = array<i64: 64, 128>}, {pipeline_mode = #tpu.pipeline_mode<synchronous>, transform_indices = @transform_4, window_bounds = array<i64: 1, 128>}, {pipeline_mode = #tpu.pipeline_mode<synchronous>, transform_indices = @transform_5, window_bounds = array<i64: 128, 1024>}, {pipeline_mode = #tpu.pipeline_mode<synchronous>, transform_indices = @transform_6, window_bounds = array<i64: 1, 1024>}, {transform_indices = @transform_7, window_bounds = array<i64: 1, 1, 1024>}]} {
    %c0 = arith.constant 0 : index
    %c0_0 = arith.constant 0 : index
    %c0_1 = arith.constant 0 : index
    %0 = vector.load %arg3[%c0, %c0_0, %c0_1] : memref<1x16x3xf32, #tpu.memory_space<vmem>>, vector<1x16x3xf32>
    %1 = vector.shape_cast %0 : vector<1x16x3xf32> to vector<16x3xf32>
    %c0_2 = arith.constant 0 : index
    %c0_3 = arith.constant 0 : index
    %2 = vector.load %arg4[%c0_2, %c0_3] : memref<3x64xf32, #tpu.memory_space<vmem>>, vector<3x64xf32>
    %3 = arith.truncf %1 : vector<16x3xf32> to vector<16x3xbf16>
    %4 = arith.truncf %2 : vector<3x64xf32> to vector<3x64xbf16>
    %c0_4 = arith.constant 0 : index
    %c0_5 = arith.constant 0 : index
    %5 = vector.load %arg5[%c0_4, %c0_5] : memref<1x64xf32, #tpu.memory_space<vmem>>, vector<1x64xf32>
    %cst = arith.constant dense<0.000000e+00> : vector<16x64xf32>
    %6 = tpu.matmul %3, %4, %cst {dimension_numbers = #tpu.dot_dimension_numbers<[1], [0], [0], [1], [0, 0, 1, 1], [], []>} : vector<16x3xbf16>, vector<3x64xbf16>, vector<16x64xf32> -> vector<16x64xf32>
    %7 = vector.broadcast %5 : vector<1x64xf32> to vector<16x64xf32>
    %8 = arith.addf %6, %7 : vector<16x64xf32>
    %cst_6 = arith.constant 0.000000e+00 : f32
    %9 = vector.broadcast %cst_6 : f32 to vector<16x64xf32>
    %10 = arith.maximumf %8, %9 : vector<16x64xf32>
    %c0_7 = arith.constant 0 : index
    %c0_8 = arith.constant 0 : index
    %11 = vector.load %arg6[%c0_7, %c0_8] : memref<64x128xbf16, #tpu.memory_space<vmem>>, vector<64x128xbf16>
    %12 = arith.truncf %10 : vector<16x64xf32> to vector<16x64xbf16>
    %c0_9 = arith.constant 0 : index
    %c0_10 = arith.constant 0 : index
    %13 = vector.load %arg7[%c0_9, %c0_10] : memref<1x128xf32, #tpu.memory_space<vmem>>, vector<1x128xf32>
    %cst_11 = arith.constant dense<0.000000e+00> : vector<16x128xf32>
    %14 = tpu.matmul %12, %11, %cst_11 {dimension_numbers = #tpu.dot_dimension_numbers<[1], [0], [0], [1], [0, 0, 1, 1], [], []>} : vector<16x64xbf16>, vector<64x128xbf16>, vector<16x128xf32> -> vector<16x128xf32>
    %15 = vector.broadcast %13 : vector<1x128xf32> to vector<16x128xf32>
    %16 = arith.addf %14, %15 : vector<16x128xf32>
    %cst_12 = arith.constant 0.000000e+00 : f32
    %17 = vector.broadcast %cst_12 : f32 to vector<16x128xf32>
    %18 = arith.maximumf %16, %17 : vector<16x128xf32>
    %c0_13 = arith.constant 0 : index
    %c0_14 = arith.constant 0 : index
    %19 = vector.load %arg8[%c0_13, %c0_14] : memref<128x1024xbf16, #tpu.memory_space<vmem>>, vector<128x1024xbf16>
    %20 = arith.truncf %18 : vector<16x128xf32> to vector<16x128xbf16>
    %c0_15 = arith.constant 0 : index
    %c0_16 = arith.constant 0 : index
    %21 = vector.load %arg9[%c0_15, %c0_16] : memref<1x1024xf32, #tpu.memory_space<vmem>>, vector<1x1024xf32>
    %cst_17 = arith.constant dense<0.000000e+00> : vector<16x1024xf32>
    %22 = tpu.matmul %20, %19, %cst_17 {dimension_numbers = #tpu.dot_dimension_numbers<[1], [0], [0], [1], [0, 0, 1, 1], [], []>} : vector<16x128xbf16>, vector<128x1024xbf16>, vector<16x1024xf32> -> vector<16x1024xf32>
    %23 = vector.broadcast %21 : vector<1x1024xf32> to vector<16x1024xf32>
    %24 = arith.addf %22, %23 : vector<16x1024xf32>
    %cst_18 = arith.constant 0.000000e+00 : f32
    %25 = vector.broadcast %cst_18 : f32 to vector<16x1024xf32>
    %26 = arith.maximumf %24, %25 : vector<16x1024xf32>
    %27 = vector.shape_cast %26 : vector<16x1024xf32> to vector<2x8x1024xf32>
    %cst_19 = arith.constant dense<0xFF800000> : vector<8x1024xf32>
    %28 = vector.multi_reduction <maximumf>, %27, %cst_19 [0] : vector<2x8x1024xf32> to vector<8x1024xf32>
    %c0_i32 = arith.constant 0 : i32
    %29 = arith.cmpi eq, %arg2, %c0_i32 : i32
    %30 = arith.extui %29 : i1 to i32
    %c0_i32_20 = arith.constant 0 : i32
    %31 = arith.cmpi ne, %30, %c0_i32_20 : i32
    scf.if %31 {
      %cst_27 = arith.constant 0xFF800000 : f32
      %38 = vector.broadcast %cst_27 : f32 to vector<8x1024xf32>
      %c0_28 = arith.constant 0 : index
      %c0_29 = arith.constant 0 : index
      %39 = vector.load %arg11[%c0_28, %c0_29] : memref<8x1024xf32, #tpu.memory_space<vmem>>, vector<8x1024xf32>
      tpu.vector_store %arg11[%c0_28, %c0_29], %38 {strides = array<i32>} : memref<8x1024xf32, #tpu.memory_space<vmem>>, vector<8x1024xf32>,
    } else {
    }
    %c0_21 = arith.constant 0 : index
    %c0_22 = arith.constant 0 : index
    %32 = vector.load %arg11[%c0_21, %c0_22] : memref<8x1024xf32, #tpu.memory_space<vmem>>, vector<8x1024xf32>
    %33 = arith.maximumf %32, %28 : vector<8x1024xf32>
    %c0_23 = arith.constant 0 : index
    %c0_24 = arith.constant 0 : index
    %34 = vector.load %arg11[%c0_23, %c0_24] : memref<8x1024xf32, #tpu.memory_space<vmem>>, vector<8x1024xf32>
    tpu.vector_store %arg11[%c0_23, %c0_24], %33 {strides = array<i32>} : memref<8x1024xf32, #tpu.memory_space<vmem>>, vector<8x1024xf32>,
    %c0_i32_25 = arith.constant 0 : i32
    %35 = arith.cmpi eq, %arg2, %c0_i32_25 : i32
    %36 = arith.extui %35 : i1 to i32
    %c0_i32_26 = arith.constant 0 : i32
    %37 = arith.cmpi ne, %36, %c0_i32_26 : i32
    scf.if %37 {
      %c0_27 = arith.constant 0 : index
      %c0_28 = arith.constant 0 : index
      %38 = vector.load %arg11[%c0_27, %c0_28] : memref<8x1024xf32, #tpu.memory_space<vmem>>, vector<8x1024xf32>
      %cst_29 = arith.constant dense<0xFF800000> : vector<1024xf32>
      %39 = vector.multi_reduction <maximumf>, %38, %cst_29 [0] : vector<8x1024xf32> to vector<1024xf32>
      %40 = vector.shape_cast %39 : vector<1024xf32> to vector<1x1024xf32>
      %c0_30 = arith.constant 0 : index
      %c0_31 = arith.constant 0 : index
      %c0_32 = arith.constant 0 : index
      %41 = vector.load %arg10[%c0_30, %c0_31, %c0_32] : memref<1x1x1024xf32, #tpu.memory_space<vmem>>, vector<1x1x1024xf32>
      %42 = vector.shape_cast %41 : vector<1x1x1024xf32> to vector<1x1024xf32>
      %43 = vector.shape_cast %40 : vector<1x1024xf32> to vector<1x1x1024xf32>
      tpu.vector_store %arg10[%c0_30, %c0_31, %c0_32], %43 {strides = array<i32>} : memref<1x1x1024xf32, #tpu.memory_space<vmem>>, vector<1x1x1024xf32>,
    } else {
    }
    return
  }
  func.func @transform_0(%arg0: i32, %arg1: i32, %arg2: i32) -> (i32, i32, i32) {
    %c1_i32 = arith.constant 1 : i32
    %0 = arith.muli %arg1, %c1_i32 : i32
    %1 = arith.addi %0, %arg2 : i32
    %c0_i32 = arith.constant 0 : i32
    %2 = arith.minsi %1, %c0_i32 : i32
    %c0_i32_0 = arith.constant 0 : i32
    %c0_i32_1 = arith.constant 0 : i32
    return %arg0, %2, %c0_i32_0 : i32, i32, i32
  }
  func.func @transform_1(%arg0: i32, %arg1: i32, %arg2: i32) -> (i32, i32) {
    %c0_i32 = arith.constant 0 : i32
    %c0_i32_0 = arith.constant 0 : i32
    %c0_i32_1 = arith.constant 0 : i32
    return %c0_i32, %c0_i32_0 : i32, i32
  }
  func.func @transform_2(%arg0: i32, %arg1: i32, %arg2: i32) -> (i32, i32) {
    %c0_i32 = arith.constant 0 : i32
    %c0_i32_0 = arith.constant 0 : i32
    %c0_i32_1 = arith.constant 0 : i32
    return %c0_i32, %c0_i32_0 : i32, i32
  }
  func.func @transform_3(%arg0: i32, %arg1: i32, %arg2: i32) -> (i32, i32) {
    %c0_i32 = arith.constant 0 : i32
    %c0_i32_0 = arith.constant 0 : i32
    %c0_i32_1 = arith.constant 0 : i32
    return %c0_i32, %c0_i32_0 : i32, i32
  }
  func.func @transform_4(%arg0: i32, %arg1: i32, %arg2: i32) -> (i32, i32) {
    %c0_i32 = arith.constant 0 : i32
    %c0_i32_0 = arith.constant 0 : i32
    %c0_i32_1 = arith.constant 0 : i32
    return %c0_i32, %c0_i32_0 : i32, i32
  }
  func.func @transform_5(%arg0: i32, %arg1: i32, %arg2: i32) -> (i32, i32) {
    %c0_i32 = arith.constant 0 : i32
    %c0_i32_0 = arith.constant 0 : i32
    %c0_i32_1 = arith.constant 0 : i32
    return %c0_i32, %c0_i32_0 : i32, i32
  }
  func.func @transform_6(%arg0: i32, %arg1: i32, %arg2: i32) -> (i32, i32) {
    %c0_i32 = arith.constant 0 : i32
    %c0_i32_0 = arith.constant 0 : i32
    %c0_i32_1 = arith.constant 0 : i32
    return %c0_i32, %c0_i32_0 : i32, i32
  }
  func.func @transform_7(%arg0: i32, %arg1: i32, %arg2: i32) -> (i32, i32, i32) {
    %c1_i32 = arith.constant 1 : i32
    %0 = arith.muli %arg0, %c1_i32 : i32
    %1 = arith.addi %0, %arg1 : i32
    %c0_i32 = arith.constant 0 : i32
    %c0_i32_0 = arith.constant 0 : i32
    %c0_i32_1 = arith.constant 0 : i32
    return %1, %c0_i32, %c0_i32_0 : i32, i32, i32
  }
}

module attributes {stable_mosaic.version = 11 : i64} {
  func.func @kernel(%arg0: i32, %arg1: memref<2x128xf32, #tpu.memory_space<vmem>>, %arg2: memref<128x64xbf16, #tpu.memory_space<vmem>>, %arg3: memref<1x64xf32, #tpu.memory_space<vmem>>, %arg4: memref<64x32xbf16, #tpu.memory_space<vmem>>, %arg5: memref<1x32xf32, #tpu.memory_space<vmem>>, %arg6: memref<32x128xbf16, #tpu.memory_space<vmem>>, %arg7: memref<1x128xf32, #tpu.memory_space<vmem>>, %arg8: memref<2x128xf32, #tpu.memory_space<vmem>>) attributes {dimension_semantics = [#tpu.dimension_semantics<arbitrary>], iteration_bounds = array<i64: 1>, scalar_prefetch = 0 : i64, scratch_operands = 0 : i64, tpu.core_type = #tpu.core_type<tc>, window_params = [{pipeline_mode = #tpu.pipeline_mode<synchronous>, transform_indices = @transform_0, window_bounds = array<i64: 2, 128>}, {pipeline_mode = #tpu.pipeline_mode<synchronous>, transform_indices = @transform_1, window_bounds = array<i64: 128, 64>}, {pipeline_mode = #tpu.pipeline_mode<synchronous>, transform_indices = @transform_2, window_bounds = array<i64: 1, 64>}, {pipeline_mode = #tpu.pipeline_mode<synchronous>, transform_indices = @transform_3, window_bounds = array<i64: 64, 32>}, {pipeline_mode = #tpu.pipeline_mode<synchronous>, transform_indices = @transform_4, window_bounds = array<i64: 1, 32>}, {pipeline_mode = #tpu.pipeline_mode<synchronous>, transform_indices = @transform_5, window_bounds = array<i64: 32, 128>}, {pipeline_mode = #tpu.pipeline_mode<synchronous>, transform_indices = @transform_6, window_bounds = array<i64: 1, 128>}, {pipeline_mode = #tpu.pipeline_mode<synchronous>, transform_indices = @transform_7, window_bounds = array<i64: 2, 128>}]} {
    %c0 = arith.constant 0 : index
    %c0_0 = arith.constant 0 : index
    %0 = vector.load %arg1[%c0, %c0_0] : memref<2x128xf32, #tpu.memory_space<vmem>>, vector<2x128xf32>
    %c0_1 = arith.constant 0 : index
    %c0_2 = arith.constant 0 : index
    %1 = vector.load %arg2[%c0_1, %c0_2] : memref<128x64xbf16, #tpu.memory_space<vmem>>, vector<128x64xbf16>
    %c0_3 = arith.constant 0 : index
    %c0_4 = arith.constant 0 : index
    %2 = vector.load %arg3[%c0_3, %c0_4] : memref<1x64xf32, #tpu.memory_space<vmem>>, vector<1x64xf32>
    %3 = arith.truncf %0 : vector<2x128xf32> to vector<2x128xbf16>
    %cst = arith.constant dense<0.000000e+00> : vector<2x64xf32>
    %4 = tpu.matmul %3, %1, %cst {dimension_numbers = #tpu.dot_dimension_numbers<[1], [0], [0], [1], [0, 0, 1, 1], [], []>} : vector<2x128xbf16>, vector<128x64xbf16>, vector<2x64xf32> -> vector<2x64xf32>
    %5 = vector.broadcast %2 : vector<1x64xf32> to vector<2x64xf32>
    %6 = arith.addf %4, %5 : vector<2x64xf32>
    %cst_5 = arith.constant 0.000000e+00 : f32
    %7 = vector.broadcast %cst_5 : f32 to vector<2x64xf32>
    %8 = arith.maximumf %6, %7 : vector<2x64xf32>
    %c0_6 = arith.constant 0 : index
    %c0_7 = arith.constant 0 : index
    %9 = vector.load %arg4[%c0_6, %c0_7] : memref<64x32xbf16, #tpu.memory_space<vmem>>, vector<64x32xbf16>
    %c0_8 = arith.constant 0 : index
    %c0_9 = arith.constant 0 : index
    %10 = vector.load %arg5[%c0_8, %c0_9] : memref<1x32xf32, #tpu.memory_space<vmem>>, vector<1x32xf32>
    %11 = arith.truncf %8 : vector<2x64xf32> to vector<2x64xbf16>
    %cst_10 = arith.constant dense<0.000000e+00> : vector<2x32xf32>
    %12 = tpu.matmul %11, %9, %cst_10 {dimension_numbers = #tpu.dot_dimension_numbers<[1], [0], [0], [1], [0, 0, 1, 1], [], []>} : vector<2x64xbf16>, vector<64x32xbf16>, vector<2x32xf32> -> vector<2x32xf32>
    %13 = vector.broadcast %10 : vector<1x32xf32> to vector<2x32xf32>
    %14 = arith.addf %12, %13 : vector<2x32xf32>
    %cst_11 = arith.constant 0.000000e+00 : f32
    %15 = vector.broadcast %cst_11 : f32 to vector<2x32xf32>
    %16 = arith.maximumf %14, %15 : vector<2x32xf32>
    %c0_12 = arith.constant 0 : index
    %c0_13 = arith.constant 0 : index
    %17 = vector.load %arg6[%c0_12, %c0_13] : memref<32x128xbf16, #tpu.memory_space<vmem>>, vector<32x128xbf16>
    %c0_14 = arith.constant 0 : index
    %c0_15 = arith.constant 0 : index
    %18 = vector.load %arg7[%c0_14, %c0_15] : memref<1x128xf32, #tpu.memory_space<vmem>>, vector<1x128xf32>
    %19 = arith.truncf %16 : vector<2x32xf32> to vector<2x32xbf16>
    %cst_16 = arith.constant dense<0.000000e+00> : vector<2x128xf32>
    %20 = tpu.matmul %19, %17, %cst_16 {dimension_numbers = #tpu.dot_dimension_numbers<[1], [0], [0], [1], [0, 0, 1, 1], [], []>} : vector<2x32xbf16>, vector<32x128xbf16>, vector<2x128xf32> -> vector<2x128xf32>
    %21 = vector.broadcast %18 : vector<1x128xf32> to vector<2x128xf32>
    %22 = arith.addf %20, %21 : vector<2x128xf32>
    %c0_17 = arith.constant 0 : index
    %c0_18 = arith.constant 0 : index
    %23 = vector.load %arg8[%c0_17, %c0_18] : memref<2x128xf32, #tpu.memory_space<vmem>>, vector<2x128xf32>
    tpu.vector_store %arg8[%c0_17, %c0_18], %22 {strides = array<i32>} : memref<2x128xf32, #tpu.memory_space<vmem>>, vector<2x128xf32>,
    return
  }
  func.func @transform_0(%arg0: i32) -> (i32, i32) {
    %c0_i32 = arith.constant 0 : i32
    %c0_i32_0 = arith.constant 0 : i32
    %c0_i32_1 = arith.constant 0 : i32
    return %c0_i32, %c0_i32_0 : i32, i32
  }
  func.func @transform_1(%arg0: i32) -> (i32, i32) {
    %c0_i32 = arith.constant 0 : i32
    %c0_i32_0 = arith.constant 0 : i32
    %c0_i32_1 = arith.constant 0 : i32
    return %c0_i32, %c0_i32_0 : i32, i32
  }
  func.func @transform_2(%arg0: i32) -> (i32, i32) {
    %c0_i32 = arith.constant 0 : i32
    %c0_i32_0 = arith.constant 0 : i32
    %c0_i32_1 = arith.constant 0 : i32
    return %c0_i32, %c0_i32_0 : i32, i32
  }
  func.func @transform_3(%arg0: i32) -> (i32, i32) {
    %c0_i32 = arith.constant 0 : i32
    %c0_i32_0 = arith.constant 0 : i32
    %c0_i32_1 = arith.constant 0 : i32
    return %c0_i32, %c0_i32_0 : i32, i32
  }
  func.func @transform_4(%arg0: i32) -> (i32, i32) {
    %c0_i32 = arith.constant 0 : i32
    %c0_i32_0 = arith.constant 0 : i32
    %c0_i32_1 = arith.constant 0 : i32
    return %c0_i32, %c0_i32_0 : i32, i32
  }
  func.func @transform_5(%arg0: i32) -> (i32, i32) {
    %c0_i32 = arith.constant 0 : i32
    %c0_i32_0 = arith.constant 0 : i32
    %c0_i32_1 = arith.constant 0 : i32
    return %c0_i32, %c0_i32_0 : i32, i32
  }
  func.func @transform_6(%arg0: i32) -> (i32, i32) {
    %c0_i32 = arith.constant 0 : i32
    %c0_i32_0 = arith.constant 0 : i32
    %c0_i32_1 = arith.constant 0 : i32
    return %c0_i32, %c0_i32_0 : i32, i32
  }
  func.func @transform_7(%arg0: i32) -> (i32, i32) {
    %c0_i32 = arith.constant 0 : i32
    %c0_i32_0 = arith.constant 0 : i32
    %c0_i32_1 = arith.constant 0 : i32
    return %c0_i32, %c0_i32_0 : i32, i32
  }
}

module attributes {stable_mosaic.version = 11 : i64} {
  func.func @kernel(%arg0: i32, %arg1: i32, %arg2: i32, %arg3: memref<1x16x3xf32, #tpu.memory_space<vmem>>, %arg4: memref<1x3x3xf32, #tpu.memory_space<vmem>>, %arg5: memref<3x8xf32, #tpu.memory_space<vmem>>, %arg6: memref<1x8xf32, #tpu.memory_space<vmem>>, %arg7: memref<8x8xbf16, #tpu.memory_space<vmem>>, %arg8: memref<1x8xf32, #tpu.memory_space<vmem>>, %arg9: memref<8x8xbf16, #tpu.memory_space<vmem>>, %arg10: memref<1x8xf32, #tpu.memory_space<vmem>>, %arg11: memref<8x16xbf16, #tpu.memory_space<vmem>>, %arg12: memref<1x16xf32, #tpu.memory_space<vmem>>, %arg13: memref<16x128xbf16, #tpu.memory_space<vmem>>, %arg14: memref<1x128xf32, #tpu.memory_space<vmem>>, %arg15: memref<1x1x128xf32, #tpu.memory_space<vmem>>, %arg16: memref<8x128xf32, #tpu.memory_space<vmem>>) attributes {dimension_semantics = [#tpu.dimension_semantics<parallel>, #tpu.dimension_semantics<parallel>, #tpu.dimension_semantics<arbitrary>], iteration_bounds = array<i64: 2, 1, 1>, scalar_prefetch = 0 : i64, scratch_operands = 1 : i64, tpu.core_type = #tpu.core_type<tc>, window_params = [{transform_indices = @transform_0, window_bounds = array<i64: 1, 16, 3>}, {transform_indices = @transform_1, window_bounds = array<i64: 1, 3, 3>}, {pipeline_mode = #tpu.pipeline_mode<synchronous>, transform_indices = @transform_2, window_bounds = array<i64: 3, 8>}, {pipeline_mode = #tpu.pipeline_mode<synchronous>, transform_indices = @transform_3, window_bounds = array<i64: 1, 8>}, {pipeline_mode = #tpu.pipeline_mode<synchronous>, transform_indices = @transform_4, window_bounds = array<i64: 8, 8>}, {pipeline_mode = #tpu.pipeline_mode<synchronous>, transform_indices = @transform_5, window_bounds = array<i64: 1, 8>}, {pipeline_mode = #tpu.pipeline_mode<synchronous>, transform_indices = @transform_6, window_bounds = array<i64: 8, 8>}, {pipeline_mode = #tpu.pipeline_mode<synchronous>, transform_indices = @transform_7, window_bounds = array<i64: 1, 8>}, {pipeline_mode = #tpu.pipeline_mode<synchronous>, transform_indices = @transform_8, window_bounds = array<i64: 8, 16>}, {pipeline_mode = #tpu.pipeline_mode<synchronous>, transform_indices = @transform_9, window_bounds = array<i64: 1, 16>}, {pipeline_mode = #tpu.pipeline_mode<synchronous>, transform_indices = @transform_10, window_bounds = array<i64: 16, 128>}, {pipeline_mode = #tpu.pipeline_mode<synchronous>, transform_indices = @transform_11, window_bounds = array<i64: 1, 128>}, {transform_indices = @transform_12, window_bounds = array<i64: 1, 1, 128>}]} {
    %c0 = arith.constant 0 : index
    %c0_0 = arith.constant 0 : index
    %c0_1 = arith.constant 0 : index
    %0 = vector.load %arg3[%c0, %c0_0, %c0_1] : memref<1x16x3xf32, #tpu.memory_space<vmem>>, vector<1x16x3xf32>
    %1 = vector.shape_cast %0 : vector<1x16x3xf32> to vector<16x3xf32>
    %c0_2 = arith.constant 0 : index
    %c0_3 = arith.constant 0 : index
    %2 = vector.load %arg5[%c0_2, %c0_3] : memref<3x8xf32, #tpu.memory_space<vmem>>, vector<3x8xf32>
    %c0_4 = arith.constant 0 : index
    %c0_5 = arith.constant 0 : index
    %c0_6 = arith.constant 0 : index
    %3 = vector.load %arg4[%c0_4, %c0_5, %c0_6] : memref<1x3x3xf32, #tpu.memory_space<vmem>>, vector<1x3x3xf32>
    %4 = vector.shape_cast %3 : vector<1x3x3xf32> to vector<3x3xf32>
    %5 = vector.extract_strided_slice %4 {offsets = [0, 0], sizes = [3, 1], strides = [1, 1]} : vector<3x3xf32> to vector<3x1xf32>
    %6 = vector.extract_strided_slice %2 {offsets = [0, 0], sizes = [1, 8], strides = [1, 1]} : vector<3x8xf32> to vector<1x8xf32>
    %7 = vector.broadcast %5 : vector<3x1xf32> to vector<3x8xf32>
    %8 = vector.broadcast %6 : vector<1x8xf32> to vector<3x8xf32>
    %9 = arith.mulf %7, %8 : vector<3x8xf32>
    %cst = arith.constant 0.000000e+00 : f32
    %10 = vector.broadcast %cst : f32 to vector<3x8xf32>
    %11 = arith.addf %10, %9 : vector<3x8xf32>
    %12 = vector.extract_strided_slice %4 {offsets = [0, 1], sizes = [3, 1], strides = [1, 1]} : vector<3x3xf32> to vector<3x1xf32>
    %13 = vector.extract_strided_slice %2 {offsets = [1, 0], sizes = [1, 8], strides = [1, 1]} : vector<3x8xf32> to vector<1x8xf32>
    %14 = vector.broadcast %12 : vector<3x1xf32> to vector<3x8xf32>
    %15 = vector.broadcast %13 : vector<1x8xf32> to vector<3x8xf32>
    %16 = arith.mulf %14, %15 : vector<3x8xf32>
    %17 = arith.addf %11, %16 : vector<3x8xf32>
    %18 = vector.extract_strided_slice %4 {offsets = [0, 2], sizes = [3, 1], strides = [1, 1]} : vector<3x3xf32> to vector<3x1xf32>
    %19 = vector.extract_strided_slice %2 {offsets = [2, 0], sizes = [1, 8], strides = [1, 1]} : vector<3x8xf32> to vector<1x8xf32>
    %20 = vector.broadcast %18 : vector<3x1xf32> to vector<3x8xf32>
    %21 = vector.broadcast %19 : vector<1x8xf32> to vector<3x8xf32>
    %22 = arith.mulf %20, %21 : vector<3x8xf32>
    %23 = arith.addf %17, %22 : vector<3x8xf32>
    %24 = arith.truncf %1 : vector<16x3xf32> to vector<16x3xbf16>
    %25 = arith.truncf %23 : vector<3x8xf32> to vector<3x8xbf16>
    %c0_7 = arith.constant 0 : index
    %c0_8 = arith.constant 0 : index
    %26 = vector.load %arg6[%c0_7, %c0_8] : memref<1x8xf32, #tpu.memory_space<vmem>>, vector<1x8xf32>
    %cst_9 = arith.constant dense<0.000000e+00> : vector<16x8xf32>
    %27 = tpu.matmul %24, %25, %cst_9 {dimension_numbers = #tpu.dot_dimension_numbers<[1], [0], [0], [1], [0, 0, 1, 1], [], []>} : vector<16x3xbf16>, vector<3x8xbf16>, vector<16x8xf32> -> vector<16x8xf32>
    %28 = vector.broadcast %26 : vector<1x8xf32> to vector<16x8xf32>
    %29 = arith.addf %27, %28 : vector<16x8xf32>
    %cst_10 = arith.constant 0.000000e+00 : f32
    %30 = vector.broadcast %cst_10 : f32 to vector<16x8xf32>
    %31 = arith.maximumf %29, %30 : vector<16x8xf32>
    %c0_11 = arith.constant 0 : index
    %c0_12 = arith.constant 0 : index
    %32 = vector.load %arg7[%c0_11, %c0_12] : memref<8x8xbf16, #tpu.memory_space<vmem>>, vector<8x8xbf16>
    %33 = arith.truncf %31 : vector<16x8xf32> to vector<16x8xbf16>
    %c0_13 = arith.constant 0 : index
    %c0_14 = arith.constant 0 : index
    %34 = vector.load %arg8[%c0_13, %c0_14] : memref<1x8xf32, #tpu.memory_space<vmem>>, vector<1x8xf32>
    %cst_15 = arith.constant dense<0.000000e+00> : vector<16x8xf32>
    %35 = tpu.matmul %33, %32, %cst_15 {dimension_numbers = #tpu.dot_dimension_numbers<[1], [0], [0], [1], [0, 0, 1, 1], [], []>} : vector<16x8xbf16>, vector<8x8xbf16>, vector<16x8xf32> -> vector<16x8xf32>
    %36 = vector.broadcast %34 : vector<1x8xf32> to vector<16x8xf32>
    %37 = arith.addf %35, %36 : vector<16x8xf32>
    %cst_16 = arith.constant 0.000000e+00 : f32
    %38 = vector.broadcast %cst_16 : f32 to vector<16x8xf32>
    %39 = arith.maximumf %37, %38 : vector<16x8xf32>
    %c0_17 = arith.constant 0 : index
    %c0_18 = arith.constant 0 : index
    %40 = vector.load %arg9[%c0_17, %c0_18] : memref<8x8xbf16, #tpu.memory_space<vmem>>, vector<8x8xbf16>
    %41 = arith.truncf %39 : vector<16x8xf32> to vector<16x8xbf16>
    %c0_19 = arith.constant 0 : index
    %c0_20 = arith.constant 0 : index
    %42 = vector.load %arg10[%c0_19, %c0_20] : memref<1x8xf32, #tpu.memory_space<vmem>>, vector<1x8xf32>
    %cst_21 = arith.constant dense<0.000000e+00> : vector<16x8xf32>
    %43 = tpu.matmul %41, %40, %cst_21 {dimension_numbers = #tpu.dot_dimension_numbers<[1], [0], [0], [1], [0, 0, 1, 1], [], []>} : vector<16x8xbf16>, vector<8x8xbf16>, vector<16x8xf32> -> vector<16x8xf32>
    %44 = vector.broadcast %42 : vector<1x8xf32> to vector<16x8xf32>
    %45 = arith.addf %43, %44 : vector<16x8xf32>
    %cst_22 = arith.constant 0.000000e+00 : f32
    %46 = vector.broadcast %cst_22 : f32 to vector<16x8xf32>
    %47 = arith.maximumf %45, %46 : vector<16x8xf32>
    %c0_23 = arith.constant 0 : index
    %c0_24 = arith.constant 0 : index
    %48 = vector.load %arg11[%c0_23, %c0_24] : memref<8x16xbf16, #tpu.memory_space<vmem>>, vector<8x16xbf16>
    %49 = arith.truncf %47 : vector<16x8xf32> to vector<16x8xbf16>
    %c0_25 = arith.constant 0 : index
    %c0_26 = arith.constant 0 : index
    %50 = vector.load %arg12[%c0_25, %c0_26] : memref<1x16xf32, #tpu.memory_space<vmem>>, vector<1x16xf32>
    %cst_27 = arith.constant dense<0.000000e+00> : vector<16x16xf32>
    %51 = tpu.matmul %49, %48, %cst_27 {dimension_numbers = #tpu.dot_dimension_numbers<[1], [0], [0], [1], [0, 0, 1, 1], [], []>} : vector<16x8xbf16>, vector<8x16xbf16>, vector<16x16xf32> -> vector<16x16xf32>
    %52 = vector.broadcast %50 : vector<1x16xf32> to vector<16x16xf32>
    %53 = arith.addf %51, %52 : vector<16x16xf32>
    %cst_28 = arith.constant 0.000000e+00 : f32
    %54 = vector.broadcast %cst_28 : f32 to vector<16x16xf32>
    %55 = arith.maximumf %53, %54 : vector<16x16xf32>
    %c0_29 = arith.constant 0 : index
    %c0_30 = arith.constant 0 : index
    %56 = vector.load %arg13[%c0_29, %c0_30] : memref<16x128xbf16, #tpu.memory_space<vmem>>, vector<16x128xbf16>
    %57 = arith.truncf %55 : vector<16x16xf32> to vector<16x16xbf16>
    %c0_31 = arith.constant 0 : index
    %c0_32 = arith.constant 0 : index
    %58 = vector.load %arg14[%c0_31, %c0_32] : memref<1x128xf32, #tpu.memory_space<vmem>>, vector<1x128xf32>
    %cst_33 = arith.constant dense<0.000000e+00> : vector<16x128xf32>
    %59 = tpu.matmul %57, %56, %cst_33 {dimension_numbers = #tpu.dot_dimension_numbers<[1], [0], [0], [1], [0, 0, 1, 1], [], []>} : vector<16x16xbf16>, vector<16x128xbf16>, vector<16x128xf32> -> vector<16x128xf32>
    %60 = vector.broadcast %58 : vector<1x128xf32> to vector<16x128xf32>
    %61 = arith.addf %59, %60 : vector<16x128xf32>
    %cst_34 = arith.constant 0.000000e+00 : f32
    %62 = vector.broadcast %cst_34 : f32 to vector<16x128xf32>
    %63 = arith.maximumf %61, %62 : vector<16x128xf32>
    %64 = vector.shape_cast %63 : vector<16x128xf32> to vector<2x8x128xf32>
    %cst_35 = arith.constant dense<0xFF800000> : vector<8x128xf32>
    %65 = vector.multi_reduction <maximumf>, %64, %cst_35 [0] : vector<2x8x128xf32> to vector<8x128xf32>
    %c0_i32 = arith.constant 0 : i32
    %66 = arith.cmpi eq, %arg2, %c0_i32 : i32
    %67 = arith.extui %66 : i1 to i32
    %c0_i32_36 = arith.constant 0 : i32
    %68 = arith.cmpi ne, %67, %c0_i32_36 : i32
    scf.if %68 {
      %cst_43 = arith.constant 0xFF800000 : f32
      %75 = vector.broadcast %cst_43 : f32 to vector<8x128xf32>
      %c0_44 = arith.constant 0 : index
      %c0_45 = arith.constant 0 : index
      %76 = vector.load %arg16[%c0_44, %c0_45] : memref<8x128xf32, #tpu.memory_space<vmem>>, vector<8x128xf32>
      tpu.vector_store %arg16[%c0_44, %c0_45], %75 {strides = array<i32>} : memref<8x128xf32, #tpu.memory_space<vmem>>, vector<8x128xf32>,
    } else {
    }
    %c0_37 = arith.constant 0 : index
    %c0_38 = arith.constant 0 : index
    %69 = vector.load %arg16[%c0_37, %c0_38] : memref<8x128xf32, #tpu.memory_space<vmem>>, vector<8x128xf32>
    %70 = arith.maximumf %69, %65 : vector<8x128xf32>
    %c0_39 = arith.constant 0 : index
    %c0_40 = arith.constant 0 : index
    %71 = vector.load %arg16[%c0_39, %c0_40] : memref<8x128xf32, #tpu.memory_space<vmem>>, vector<8x128xf32>
    tpu.vector_store %arg16[%c0_39, %c0_40], %70 {strides = array<i32>} : memref<8x128xf32, #tpu.memory_space<vmem>>, vector<8x128xf32>,
    %c0_i32_41 = arith.constant 0 : i32
    %72 = arith.cmpi eq, %arg2, %c0_i32_41 : i32
    %73 = arith.extui %72 : i1 to i32
    %c0_i32_42 = arith.constant 0 : i32
    %74 = arith.cmpi ne, %73, %c0_i32_42 : i32
    scf.if %74 {
      %c0_43 = arith.constant 0 : index
      %c0_44 = arith.constant 0 : index
      %75 = vector.load %arg16[%c0_43, %c0_44] : memref<8x128xf32, #tpu.memory_space<vmem>>, vector<8x128xf32>
      %cst_45 = arith.constant dense<0xFF800000> : vector<128xf32>
      %76 = vector.multi_reduction <maximumf>, %75, %cst_45 [0] : vector<8x128xf32> to vector<128xf32>
      %77 = vector.shape_cast %76 : vector<128xf32> to vector<1x128xf32>
      %c0_46 = arith.constant 0 : index
      %c0_47 = arith.constant 0 : index
      %c0_48 = arith.constant 0 : index
      %78 = vector.load %arg15[%c0_46, %c0_47, %c0_48] : memref<1x1x128xf32, #tpu.memory_space<vmem>>, vector<1x1x128xf32>
      %79 = vector.shape_cast %78 : vector<1x1x128xf32> to vector<1x128xf32>
      %80 = vector.shape_cast %77 : vector<1x128xf32> to vector<1x1x128xf32>
      tpu.vector_store %arg15[%c0_46, %c0_47, %c0_48], %80 {strides = array<i32>} : memref<1x1x128xf32, #tpu.memory_space<vmem>>, vector<1x1x128xf32>,
    } else {
    }
    return
  }
  func.func @transform_0(%arg0: i32, %arg1: i32, %arg2: i32) -> (i32, i32, i32) {
    %c1_i32 = arith.constant 1 : i32
    %0 = arith.muli %arg1, %c1_i32 : i32
    %1 = arith.addi %0, %arg2 : i32
    %c0_i32 = arith.constant 0 : i32
    %2 = arith.minsi %1, %c0_i32 : i32
    %c0_i32_0 = arith.constant 0 : i32
    %c0_i32_1 = arith.constant 0 : i32
    return %arg0, %2, %c0_i32_0 : i32, i32, i32
  }
  func.func @transform_1(%arg0: i32, %arg1: i32, %arg2: i32) -> (i32, i32, i32) {
    %c0_i32 = arith.constant 0 : i32
    %c0_i32_0 = arith.constant 0 : i32
    %c0_i32_1 = arith.constant 0 : i32
    return %arg0, %c0_i32, %c0_i32_0 : i32, i32, i32
  }
  func.func @transform_2(%arg0: i32, %arg1: i32, %arg2: i32) -> (i32, i32) {
    %c0_i32 = arith.constant 0 : i32
    %c0_i32_0 = arith.constant 0 : i32
    %c0_i32_1 = arith.constant 0 : i32
    return %c0_i32, %c0_i32_0 : i32, i32
  }
  func.func @transform_3(%arg0: i32, %arg1: i32, %arg2: i32) -> (i32, i32) {
    %c0_i32 = arith.constant 0 : i32
    %c0_i32_0 = arith.constant 0 : i32
    %c0_i32_1 = arith.constant 0 : i32
    return %c0_i32, %c0_i32_0 : i32, i32
  }
  func.func @transform_4(%arg0: i32, %arg1: i32, %arg2: i32) -> (i32, i32) {
    %c0_i32 = arith.constant 0 : i32
    %c0_i32_0 = arith.constant 0 : i32
    %c0_i32_1 = arith.constant 0 : i32
    return %c0_i32, %c0_i32_0 : i32, i32
  }
  func.func @transform_5(%arg0: i32, %arg1: i32, %arg2: i32) -> (i32, i32) {
    %c0_i32 = arith.constant 0 : i32
    %c0_i32_0 = arith.constant 0 : i32
    %c0_i32_1 = arith.constant 0 : i32
    return %c0_i32, %c0_i32_0 : i32, i32
  }
  func.func @transform_6(%arg0: i32, %arg1: i32, %arg2: i32) -> (i32, i32) {
    %c0_i32 = arith.constant 0 : i32
    %c0_i32_0 = arith.constant 0 : i32
    %c0_i32_1 = arith.constant 0 : i32
    return %c0_i32, %c0_i32_0 : i32, i32
  }
  func.func @transform_7(%arg0: i32, %arg1: i32, %arg2: i32) -> (i32, i32) {
    %c0_i32 = arith.constant 0 : i32
    %c0_i32_0 = arith.constant 0 : i32
    %c0_i32_1 = arith.constant 0 : i32
    return %c0_i32, %c0_i32_0 : i32, i32
  }
  func.func @transform_8(%arg0: i32, %arg1: i32, %arg2: i32) -> (i32, i32) {
    %c0_i32 = arith.constant 0 : i32
    %c0_i32_0 = arith.constant 0 : i32
    %c0_i32_1 = arith.constant 0 : i32
    return %c0_i32, %c0_i32_0 : i32, i32
  }
  func.func @transform_9(%arg0: i32, %arg1: i32, %arg2: i32) -> (i32, i32) {
    %c0_i32 = arith.constant 0 : i32
    %c0_i32_0 = arith.constant 0 : i32
    %c0_i32_1 = arith.constant 0 : i32
    return %c0_i32, %c0_i32_0 : i32, i32
  }
  func.func @transform_10(%arg0: i32, %arg1: i32, %arg2: i32) -> (i32, i32) {
    %c0_i32 = arith.constant 0 : i32
    %c0_i32_0 = arith.constant 0 : i32
    %c0_i32_1 = arith.constant 0 : i32
    return %c0_i32, %c0_i32_0 : i32, i32
  }
  func.func @transform_11(%arg0: i32, %arg1: i32, %arg2: i32) -> (i32, i32) {
    %c0_i32 = arith.constant 0 : i32
    %c0_i32_0 = arith.constant 0 : i32
    %c0_i32_1 = arith.constant 0 : i32
    return %c0_i32, %c0_i32_0 : i32, i32
  }
  func.func @transform_12(%arg0: i32, %arg1: i32, %arg2: i32) -> (i32, i32, i32) {
    %c1_i32 = arith.constant 1 : i32
    %0 = arith.muli %arg0, %c1_i32 : i32
    %1 = arith.addi %0, %arg1 : i32
    %c0_i32 = arith.constant 0 : i32
    %c0_i32_0 = arith.constant 0 : i32
    %c0_i32_1 = arith.constant 0 : i32
    return %1, %c0_i32, %c0_i32_0 : i32, i32, i32
  }
}

</mosaic_0001>

<bundles_post_ra>
// kernel: pointnet_forward.7
= control target key start
LH: loop header
LB: loop body
LE: loop exit
PB: predicated region body
PF: predicated region fallthrough
CT: control target
= control target key end

     0   :  { %v425_v1 = vmov 0.0   ;;  %vm426_vm0 = vmmov 0   ;;  %s528_s0 = inlined_call_operand.vmem [shape: f32[2,128], index: 0, kind: input, shape index: {}]   ;;  %s529_s1 = inlined_call_operand.vmem [shape: bf16[128,64], index: 1, kind: input, shape index: {}]   ;;  %s530_s2 = inlined_call_operand.vmem [shape: f32[1,64], index: 2, kind: input, shape index: {}]   ;;  %s531_s3 = inlined_call_operand.vmem [shape: bf16[64,32], index: 3, kind: input, shape index: {}]   ;;  %s532_s4 = inlined_call_operand.vmem [shape: f32[1,32], index: 4, kind: input, shape index: {}]   ;;  %s533_s5 = inlined_call_operand.vmem [shape: bf16[32,128], index: 5, kind: input, shape index: {}]   ;;  %s534_s6 = inlined_call_operand.vmem [shape: f32[1,128], index: 6, kind: input, shape index: {}]   ;;  %s535_s7 = inlined_call_operand.hbm [shape: f32[2,128], index: 7, kind: output, shape index: {}]  }
   0x1   :  { %v389_v0 = vld [vmem:[%s529_s1 + $0x38] sm:$0xff]   ;;  %346 = vmatprep.subr.bf16.mxu0 %v425_v1  ;;  %366 = vmatprep.subr.bf16.mxu1 %v425_v1  ;;  %v390_v2 = vld [vmem:[%s529_s1 + $0x30] sm:$0xff]   ;;  %v391_v3 = vld [vmem:[%s529_s1 + $0x28] sm:$0xff]  }
   0x2   :  { %347 = vmatpush3.bf16.msra.mxu0 %v389_v0  ;;  %362 = vmatprep.mubr.msk.bf16.mxu0 %vm426_vm0, %v425_v1  ;;  %v397_v4 = vld [vmem:[%s531_s3 + $0x18] sm:$0xff]   ;;  %v392_v5 = vld [vmem:[%s529_s1 + $0x20] sm:$0xff]   ;;  %v398_v6 = vld [vmem:[%s531_s3 + $0x10] sm:$0xff]  }
   0x3   :  { %348 = vmatprep.subr.bf16.mxu0 %v425_v1  ;;  %374 = vmatprep.mubr.msk.bf16.mxu1 %vm426_vm0, %v425_v1 }
   0x4   :  { %367 = vmatpush3.bf16.msra.mxu1 %v397_v4 }
   0x5   :  { %368 = vmatprep.subr.bf16.mxu1 %v425_v1 }
   0x6   :  { %349 = vmatpush3.bf16.msra.mxu0 %v390_v2 }
   0x7   :  { %350 = vmatprep.subr.bf16.mxu0 %v425_v1 }
   0xa   :  { %351 = vmatpush3.bf16.msra.mxu0 %v391_v3 }
   0xb   :  { %352 = vmatprep.subr.bf16.mxu0 %v425_v1 }
   0xc   :  { %12 = vsyncpa [#allocation3], 0  ;;  %v393_v7 = vld [vmem:[%s529_s1 + $0x18] sm:$0xff]   ;;  %369 = vmatpush3.bf16.msra.mxu1 %v398_v6  ;;  %v394_v8 = vld [vmem:[%s529_s1 + $0x10] sm:$0xff]   ;;  %vm182_vm1 = vcmask 523264   ;;  %vm251_vm2 = vcmask 261120  }
   0xd   :  { %370 = vmatprep.subr.bf16.mxu1 %v425_v1  ;;  %v395_v9 = vld [vmem:[%s529_s1 + $0x8] sm:$0xff]   ;;  %v396_v10 = vld [vmem:[%s529_s1] sm:$0xff]   ;;  %s427_s10 = smov [#allocation2]  }
   0xe   :  { %353 = vmatpush3.bf16.msra.mxu0 %v392_v5  ;;  %v28_v11 = vld [vmem:[%s528_s0] sm:$0x3]  ;;  %v399_v13 = vld [vmem:[%s531_s3 + $0x8] sm:$0xff]  }
   0xf   :  { %354 = vmatprep.subr.bf16.mxu0 %v425_v1  ;;  %v46_v12 = vpack.c.bf16 %v28_v11, %v28_v11  ;;  %v400_v14 = vld [vmem:[%s531_s3] sm:$0xff]   ;;  %v401_v21 = vld [vmem:[%s533_s5 + $0x8] sm:$0xff]  }
  0x10   :  { %371 = vmatpush3.bf16.msra.mxu1 %v399_v13  ;;  %v310_v15 = vld [vmem:[%s530_s2] ss:$0 sm:$0xff] }
  0x11   :  { %372 = vmatprep.subr.bf16.mxu1 %v425_v1  ;;  %v402_v24 = vld [vmem:[%s533_s5] sm:$0xff]   ;;  %s302_s5 = sshll.u32 %s427_s10, 4  ;;  %s303_s5 = int_to_ptr.vmem [resolvable:$true] %s302_s5 }
  0x12   :  { %355 = vmatpush3.bf16.msra.mxu0 %v393_v7  ;;  %v319_v25 = vld [vmem:[%s532_s4] ss:$0 sm:$0xff]  ;;  %s403_s4 = scalar_lea.vmem %s303_s5, 32  ;;  %p408_p1 = scmp.lt.s32.totalorder %s303_s5, %s303_s5 }
  0x13   :  { %356 = vmatprep.subr.bf16.mxu0 %v425_v1  ;;  %v325_v33 = vld [vmem:[%s534_s6] ss:$0 sm:$0xff]  ;;  %p404_p0 = scmp.ne.s32.totalorder %s303_s5, %s403_s4  ;;  %p409_p2 = scmp.lt.s32.totalorder %s403_s4, %s403_s4 }
  0x14   :  { %373 = vmatpush3.bf16.msra.mxu1 %v400_v14 }
  0x15   :  { %378 = vmatprep.subr.bf16.mxu1 %v425_v1  ;;  %p410_p3 = por %p409_p2, %p408_p1 }
  0x16   :  { %357 = vmatpush3.bf16.msra.mxu0 %v394_v8 }
  0x17   :  { %358 = vmatprep.subr.bf16.mxu0 %v425_v1  ;;  %p411_p4 = pnand %p410_p3, %p404_p0 }
  0x1a   :  { %359 = vmatpush3.bf16.msra.mxu0 %v395_v9 }
  0x1b   :  { %360 = vmatprep.subr.bf16.mxu0 %v425_v1 }
  0x1e   :  { %361 = vmatpush3.bf16.msra.mxu0 %v396_v10 }
  0x21   :  { %363 = vmatmul.mubr.bf16.vlgmr.msra.gmra.mxu0 %v46_v12 }
  0xe1   :  { %v135_v16 = vpop.f32.mrf.mxu0 }
  0xe2   :  { %v136_v17 = vadd.f32 %v310_v15, %v135_v16 }
  0xe3   :  { %v364_v18 = vpop.f32.mrf.mxu0 }
  0xe4   :  { %v141_v19 = vmax.f32 %v136_v17, 0.0 }
  0xe5   :  { %v138_v20 = vpop.f32.mrf.mxu0 }
  0xe6   :  { %v151_v22 = vpack.c.bf16 %v141_v19, %v141_v19 }
  0xe7   :  { %v365_v23 = vpop.f32.mrf.mxu0 }
  0xe8   :  { %375 = vmatmul.mubr.msk.bf16.vlgmr.msra.gmra.mxu1 %vm182_vm1, %v151_v22 }
  0xe9   :  { %379 = vmatpush3.bf16.msra.mxu1 %v401_v21  ;;  %382 = vmatprep.mubr.msk.bf16.mxu1 %vm426_vm0, %v425_v1 }
  0xea   :  { %380 = vmatprep.subr.bf16.mxu1 %v425_v1 }
  0xed   :  { %381 = vmatpush3.bf16.msra.mxu1 %v402_v24 }
 0x1a8   :  { %v220_v26 = vpop.f32.mrf.mxu1 }
 0x1a9   :  { %v221_v27 = vadd.f32 %v319_v25, %v220_v26 }
 0x1aa   :  { %v376_v28 = vpop.f32.mrf.mxu1 }
 0x1ab   :  { %v226_v29 = vmax.f32 %v221_v27, 0.0 }
 0x1ac   :  { %v223_v30 = vpop.f32.mrf.mxu1 }
 0x1ad   :  { %v232_v31 = vpack.c.bf16 %v226_v29, %v226_v29 }
 0x1ae   :  { %v377_v32 = vpop.f32.mrf.mxu1 }
 0x1af   :  { %383 = vmatmul.mubr.msk.bf16.vlgmr.msra.gmra.mxu1 %vm251_vm2, %v232_v31 }
 0x26f   :  { %v289_v34 = vpop.f32.mrf.mxu1 }
 0x270   :  { %v290_v35 = vadd.f32 %v325_v33, %v289_v34 }
 0x271   :  { %v384_v36 = vpop.f32.mrf.mxu1 }
 0x272   :  { %295 = vst [vmem:[#allocation2] sm:$0x3] %v290_v35 }
 0x273   :  { %v292_v37 = vpop.f32.mrf.mxu1 }
 0x274   :  { %414 = shalt.err (!%p411_p4)
}
 0x275   :  { %305 = dma.vmem_to_hbm [thread:$0]  %s303_s5, 32, %s535_s7, [#allocation3]   ;;  %v385_v38 = vpop.f32.mrf.mxu1 }
 0x276   :  { %423 = dma.done.wait [#allocation3], 32  }
 0x277   :  { %424 = vsyncadd [#allocation3], 4294967264 }
 0x278   :  { %309 = vsyncpa [#allocation3], 1 }

// kernel: pointnet_forward.4
= control target key start
LH: loop header
LB: loop body
LE: loop exit
PB: predicated region body
PF: predicated region fallthrough
CT: control target
= control target key end

     0   :  { %12 = vsyncpa [#allocation4], 0  ;;  %s2099_s0 = inlined_call_operand.vmem [shape: f32[2,16,3], index: 0, kind: input, shape index: {}]   ;;  %s2100_s1 = inlined_call_operand.hbm [shape: f32[3,64], index: 1, kind: input, shape index: {}]   ;;  %s2101_s2 = inlined_call_operand.hbm [shape: f32[1,64], index: 2, kind: input, shape index: {}]   ;;  %s2102_s3 = inlined_call_operand.hbm [shape: bf16[64,128], index: 3, kind: input, shape index: {}]   ;;  %s2103_s4 = inlined_call_operand.hbm [shape: f32[1,128], index: 4, kind: input, shape index: {}]   ;;  %s2104_s5 = inlined_call_operand.hbm [shape: bf16[128,1024], index: 5, kind: input, shape index: {}]   ;;  %s2105_s6 = inlined_call_operand.hbm [shape: f32[1,1024], index: 6, kind: input, shape index: {}]   ;;  %s2106_s7 = inlined_call_operand.vmem [shape: f32[2,1,1024], index: 7, kind: output, shape index: {}]  }
   0x1   :  { %13 = vsyncpa [#allocation6], 0 }
   0x2   :  { %14 = vsyncpa [#allocation9], 0 }
   0x3   :  { %15 = vsyncpa [#allocation12], 0  ;;  %s1952_s24 = smov 0   ;;  %s1954_s25 = smov 0  }
   0x4   :  { %s1956_s26 = smov 0  }
   0x5 LB: > { %s1897_s27 = smov [#allocation5]   ;;  %s1483_s29 = sadd.s32 4294967295, %s1895_s26   ;;  %s1895_s26 = sphi %s1956_s26, %s21_s26   ;;  %s1891_s25 = sphi %s1954_s25, %s2119_s25   ;;  %s1887_s24 = sphi %s1952_s24, %s2118_s24  }
   0x6   : > { %s257_s28 = sshll.u32 %s1897_s27, 4  ;;  %p1485_p0 = scmp.ge.s32.totalorder %s1895_s26, 1  ;;  %s258_s28 = int_to_ptr.vmem [resolvable:$true] %s257_s28 }
   0x7   : > { %p233_p1 = scmp.lt.s32.totalorder %s1895_s26, 3  ;;  %p1970_p2 = scmp.eq.s32.totalorder %s1483_s29, 0 }
   0x8   : > { %s1898_s9 = smov [#allocation8]   ;;  %s40_s12 = sadd.s32 1, %s1891_s25 }
   0x9   : > { %s2110_s30 = scalar_select %p1970_p2, 1, 0 }
   0xa   : > { %p1974_p3 = pnand %p1485_p0, %p233_p1  ;;  %s281_s10 = sshll.u32 %s1898_s9, 4  ;;  %s282_s10 = int_to_ptr.vmem [resolvable:$true] %s281_s10 }
   0xb   : > { %p1987_p6 = scmp.ge.s32.totalorder %s40_s12, 2  ;;  %s1712_s15 = scalar_lea.vmem %s258_s28, 16 }
   0xc   : > { %s2111_s8 = scalar_select %p1974_p3, 1, 0 }
   0xd   : > { %p1627_p4 = pneg %p1974_p3  ;;  %p1713_p8 = scmp.ne.s32.totalorder %s258_s28, %s1712_s15 }
   0xe   : > { %s2113_s13 = scalar_select %p1987_p6, 1, 0 }
   0xf   : > { %p1982_p5 = pnand %p1970_p2, %p1627_p4  ;;  %s1719_s16 = scalar_lea.vmem %s258_s28, 32 }
  0x10   : > { %p1720_p11 = scmp.lt.s32.totalorder %s258_s28, %s258_s28  ;;  %p1721_p12 = scmp.lt.s32.totalorder %s1719_s16, %s1712_s15 }
  0x11   : > { %p1993_p7 = pneg %p1982_p5 }
  0x12   : > { %p1722_p13 = por %p1721_p12, %p1720_p11 }
  0x13   : > { %p1715_p9 = pnand %p1713_p8, %p1993_p7 }
  0x15   : > { %p1716_p10 = pneg %p1715_p9 }
  0x17   : > { %p1723_p0 = pnand %p1722_p13, %p1716_p10 }
  0x19   : > { %1726 = shalt.err (!%p1723_p0)
}
  0x1a   : > { %1633 = dma.hbm_to_vmem [thread:$0]  (!%p1982_p5), %s2101_s2, 16, %s258_s28, [#allocation6]  }
  0x1b   : > { %s1738_s19 = scalar_lea.vmem %s282_s10, 16  ;;  %s1745_s20 = scalar_lea.vmem %s282_s10, 32 }
  0x1c   : > { %p1739_p1 = scmp.ne.s32.totalorder %s282_s10, %s1738_s19  ;;  %p1746_p8 = scmp.lt.s32.totalorder %s282_s10, %s282_s10 }
  0x1d   : > { %p1747_p9 = scmp.lt.s32.totalorder %s1745_s20, %s1738_s19 }
  0x1e   : > { %p1741_p4 = pnand %p1739_p1, %p1993_p7 }
  0x1f   : > { %p1748_p3 = por %p1747_p9, %p1746_p8 }
  0x20   : > { %p1742_p2 = pneg %p1741_p4 }
  0x22   : > { %p1749_p6 = pnand %p1748_p3, %p1742_p2 }
  0x24   : > { %1752 = shalt.err (!%p1749_p6)
}
  0x25   : > { %1639 = dma.hbm_to_vmem [thread:$0]  (!%p1982_p5), %s2103_s4, 16, %s282_s10, [#allocation9]  }
  0x26   : > { %p2115_p10 = scmp.ne.s32.totalorder %s2113_s13, 0  ;;  %s1899_s23 = smov [#allocation3]  }
  0x27   : > { %s246_s27 = sshll.u32 %s1899_s23, 4  ;;  %s1900_s28 = smov [#allocation7]   ;;  %s247_s27 = int_to_ptr.vmem [resolvable:$true] %s246_s27 }
  0x28   : > { %s2121_s12 = smov (%p2115_p10, %s40_s12), 0  ;;  %s267_s29 = sshll.u32 %s1900_s28, 4  ;;  %s268_s29 = int_to_ptr.vmem [resolvable:$true] %s267_s29 }
  0x29   : > { %s1764_s9 = scalar_lea.vmem %s247_s27, 64  ;;  %p1772_p6 = scmp.lt.s32.totalorder %s247_s27, %s247_s27 }
  0x2a   : > { %p1765_p11 = scmp.ne.s32.totalorder %s247_s27, %s1764_s9  ;;  %p1773_p12 = scmp.lt.s32.totalorder %s1764_s9, %s1764_s9 }
  0x2c   : > { %p1767_p2 = pnand %p1765_p11, %p1993_p7  ;;  %p1774_p13 = por %p1773_p12, %p1772_p6 }
  0x2e   : > { %p1768_p3 = pneg %p1767_p2 }
  0x30   : > { %p1775_p0 = pnand %p1774_p13, %p1768_p3 }
  0x32   : > { %1778 = shalt.err (!%p1775_p0)
}
  0x33   : > { %1630 = dma.hbm_to_vmem [thread:$0]  (!%p1982_p5), %s2100_s1, 64, %s247_s27, [#allocation4]  }
  0x34   : > { %s1790_s15 = scalar_lea.vmem %s268_s29, 512  ;;  %p1798_p9 = scmp.lt.s32.totalorder %s268_s29, %s268_s29 }
  0x35   : > { %p1791_p1 = scmp.ne.s32.totalorder %s268_s29, %s1790_s15  ;;  %p1799_p10 = scmp.lt.s32.totalorder %s1790_s15, %s1790_s15 }
  0x37   : > { %p1793_p4 = pnand %p1791_p1, %p1993_p7  ;;  %p1800_p11 = por %p1799_p10, %p1798_p9 }
  0x39   : > { %p1794_p8 = pneg %p1793_p4 }
  0x3b   : > { %p1801_p2 = pnand %p1800_p11, %p1794_p8 }
  0x3d   : > { %1804 = shalt.err (!%p1801_p2)
}
  0x3e   : > { %s1901_s16 = smov 64   ;;  %s1902_s17 = smov 4  }
  0x3f   : > { %1636 = dma.hbm_to_vmem [thread:$0]  (!%p1982_p5), %s2102_s3, 512, %s268_s29, [#allocation6], %s1901_s16, %s1901_s16, %s1902_s17  }
  0x40   : > { %s1903_s20 = smov [#allocation10]  }
  0x41   : > { %s291_s21 = sshll.u32 %s1903_s20, 4  ;;  %s292_s21 = int_to_ptr.vmem [resolvable:$true] %s291_s21 }
  0x42   : > { %s1816_s22 = scalar_lea.vmem %s292_s21, 8192  ;;  %p1824_p13 = scmp.lt.s32.totalorder %s292_s21, %s292_s21 }
  0x43   : > { %p1817_p3 = scmp.ne.s32.totalorder %s292_s21, %s1816_s22  ;;  %p1825_p0 = scmp.lt.s32.totalorder %s1816_s22, %s1816_s22 }
  0x45   : > { %p1819_p6 = pnand %p1817_p3, %p1993_p7  ;;  %p1826_p1 = por %p1825_p0, %p1824_p13 }
  0x47   : > { %p1820_p12 = pneg %p1819_p6 }
  0x49   : > { %p1827_p4 = pnand %p1826_p1, %p1820_p12 }
  0x4b   : > { %1830 = shalt.err (!%p1827_p4)
}
  0x4c   : > { %s1904_s23 = smov 512   ;;  %s1905_s27 = smov 32  }
  0x4d   : > { %1642 = dma.hbm_to_vmem [thread:$0]  (!%p1982_p5), %s2104_s5, 8192, %s292_s21, [#allocation9], %s1904_s23, %s1904_s23, %s1905_s27  }
  0x4e   : > { %s1906_s9 = smov [#allocation11]  }
  0x4f   : > { %s305_s10 = sshll.u32 %s1906_s9, 4  ;;  %s306_s10 = int_to_ptr.vmem [resolvable:$true] %s305_s10 }
  0x50   : > { %s1842_s13 = scalar_lea.vmem %s306_s10, 128  ;;  %p1850_p11 = scmp.lt.s32.totalorder %s306_s10, %s306_s10 }
  0x51   : > { %p1843_p8 = scmp.ne.s32.totalorder %s306_s10, %s1842_s13  ;;  %p1851_p2 = scmp.lt.s32.totalorder %s1842_s13, %s1842_s13 }
  0x53   : > { %p1845_p9 = pnand %p1843_p8, %p1993_p7  ;;  %p1852_p3 = por %p1851_p2, %p1850_p11 }
  0x55   : > { %p1846_p10 = pneg %p1845_p9 }
  0x57   : > { %p1853_p6 = pnand %p1852_p3, %p1846_p10 }
  0x59   : > { %1856 = shalt.err (!%p1853_p6)
}
  0x5a   : > { %1645 = dma.hbm_to_vmem [thread:$0]  (!%p1982_p5), %s2105_s6, 128, %s306_s10, [#allocation12]  }
  0x5b   : > { %p2116_p12 = scmp.ne.s32.totalorder %s2111_s8, 0 }
  0x5c   : > { %p2117_p13 = scmp.ne.s32.totalorder (!%p2116_p12), %s2110_s30, 0 }
  0x5d   : > { %337 = sbr.rel (%p2116_p12) target bundleno = 780 (0x30c), region = 48 }
  0x62   : > { %1870 = dma.done.wait (%p2117_p13), [#allocation4], 64  }
  0x63   : > { %1872 = vsyncadd (%p2117_p13), [#allocation4], 4294967232 }
  0x64   : > { %1874 = dma.done.wait (%p2117_p13), [#allocation6], 528  }
  0x65   : > { %1876 = vsyncadd (%p2117_p13), [#allocation6], 4294966768 }
  0x66   : > { %1878 = dma.done.wait (%p2117_p13), [#allocation9], 8208  }
  0x67   : > { %1880 = vsyncadd (%p2117_p13), [#allocation9], 4294959088 }
  0x68   : > { %1882 = dma.done.wait (%p2117_p13), [#allocation12], 128  }
  0x69   : > { %1884 = vsyncadd (%p2117_p13), [#allocation12], 4294967168  ;;  %v1907_v0 = vmov 0.0   ;;  %vm435_vm0 = vcmask 1040384   ;;  %p400_p5 = scmp.lt.s32.totalorder %s1887_s24, 1  ;;  %vm1908_vm1 = vmmov 0  }
  0x6a   : > { %1585 = vmatprep.subr.bf16.mxu0 %v1907_v0  ;;  %1591 = vmatprep.subr.bf16.mxu1 %v1907_v0  ;;  %vm436_vm2 = vcmask 1041408   ;;  %v1909_v1 = vmov 65535   ;;  %v421_v3 = vld [vmem:[#allocation3] sm:$0x7]  ;;  %vm431_vm3 = vcmask 23552   ;;  %v1698_v11 = vld [vmem:[#allocation7 + $0x10] sm:$0xff]  }
  0x6b   : > { %1587 = vmatprep.mubr.msk.bf16.mxu0 %vm1908_vm1, %v1907_v0  ;;  %1599 = vmatprep.mubr.msk.bf16.mxu1 %vm1908_vm1, %v1907_v0  ;;  %s2123_s24 = smov (!%p400_p5, %s1887_s24), 1  ;;  %v437_v2 = vsel %vm435_vm0, 4294967295, %v1909_v1  ;;  %v423_v7 = vpack.c.bf16 %v421_v3, %v421_v3  ;;  %v1697_v8 = vld [vmem:[#allocation7 + $0x18] sm:$0xff]   ;;  %v1699_v12 = vld [vmem:[#allocation7 + $0x8] sm:$0xff]   ;;  %v1700_v13 = vld [vmem:[#allocation7] sm:$0xff]   ;;  %vm525_vm4 = vcmask 523264  }
  0x6c   : > { %s1577_s8 = sshll.u32 %s2123_s24, 4  ;;  %v438_v4 = vsel %vm436_vm2, %v437_v2, 0  ;;  %1592 = vmatpush3.bf16.msra.mxu1 %v1697_v8  ;;  %v628_v14 = vld [vmem:[#allocation10 + $0x1c0] sm:$0xff]  ;;  %v629_v16 = vld [vmem:[#allocation10 + $0x1c8] sm:$0xff]  ;;  %v1503_v42 = vld [vmem:[#allocation5] ss:$0 sm:$0xff] }
  0x6d   : > { %s407_s14 = scalar_lea.vmem %s2099_s0, %s1577_s8  ;;  %v440_v9 = vand.u32 %v438_v4, %v423_v7  ;;  %1593 = vmatprep.subr.bf16.mxu1 %v1907_v0  ;;  %v632_v15 = vld [vmem:[#allocation10 + $0x1e0] sm:$0xff]  ;;  %v633_v19 = vld [vmem:[#allocation10 + $0x1e8] sm:$0xff]  ;;  %s1502_s17 = sshll.u32 %s2123_s24, 3 }
  0x6e   : > { %v419_v5 = vld [vmem:[%s407_s14] sm:$0xff]  ;;  %v420_v6 = vld [vmem:[%s407_s14 + $0x8] sm:$0xff]  ;;  %v1567_v17 = vcombine.low %v628_v14, %v632_v15  ;;  %v1568_v18 = vcombine.high %v628_v14, %v632_v15  ;;  %v1569_v22 = vcombine.low %v629_v16, %v633_v19  ;;  %v1570_v23 = vcombine.high %v629_v16, %v633_v19  ;;  %v621_v49 = vld [vmem:[#allocation10 + $0x188] sm:$0xff]  ;;  %s416_s20 = scalar_lea.vmem %s2106_s7, %s1502_s17 }
  0x6f   : > { %v422_v10 = vpack.c.bf16 %v420_v6, %v419_v5  ;;  %1586 = vmatpush3.bf16.msra.mxu0 %v440_v9  ;;  %v620_v20 = vld [vmem:[#allocation10 + $0x180] sm:$0xff]  ;;  %v625_v50 = vld [vmem:[#allocation10 + $0x1a8] sm:$0xff] }
  0x70   : > { %1594 = vmatpush3.bf16.msra.mxu1 %v1698_v11  ;;  %v624_v21 = vld [vmem:[#allocation10 + $0x1a0] sm:$0xff]  ;;  %999 = vmatprep.subr.bf16.mxu0 %v1568_v18  ;;  %v1562_v54 = vcombine.high %v621_v49, %v625_v50  ;;  %v613_v55 = vld [vmem:[#allocation10 + $0x148] sm:$0xff]  ;;  %v1561_v57 = vcombine.low %v621_v49, %v625_v50  ;;  %v614_v49 = vld [vmem:[#allocation10 + $0x150] sm:$0xff] }
  0x71   : > { %1595 = vmatprep.subr.bf16.mxu1 %v1907_v0  ;;  %v1560_v24 = vcombine.high %v620_v20, %v624_v21  ;;  %v1559_v25 = vcombine.low %v620_v20, %v624_v21  ;;  %v612_v26 = vld [vmem:[#allocation10 + $0x140] sm:$0xff]  ;;  %v617_v56 = vld [vmem:[#allocation10 + $0x168] sm:$0xff]  ;;  %v618_v50 = vld [vmem:[#allocation10 + $0x170] sm:$0xff] }
  0x72   : > { %1588 = vmatmul.mubr.msk.bf16.vlgmr.msra.gmra.mxu0 %vm431_vm3, %v422_v10  ;;  %v616_v27 = vld [vmem:[#allocation10 + $0x160] sm:$0xff]  ;;  %v1554_v58 = vcombine.high %v613_v55, %v617_v56  ;;  %v605_v59 = vld [vmem:[#allocation10 + $0x108] sm:$0xff]  ;;  %v1553_v61 = vcombine.low %v613_v55, %v617_v56  ;;  %v1556_v55 = vcombine.high %v614_v49, %v618_v50 }
  0x73   : > { %1000 = vmatpush1.bf16.msra.mxu0 %v1567_v17  ;;  %v1552_v28 = vcombine.high %v612_v26, %v616_v27  ;;  %v1551_v29 = vcombine.low %v612_v26, %v616_v27  ;;  %v604_v30 = vld [vmem:[#allocation10 + $0x100] sm:$0xff]  ;;  %v609_v60 = vld [vmem:[#allocation10 + $0x128] sm:$0xff]  ;;  %v631_v26 = vld [vmem:[#allocation10 + $0x1d8] sm:$0xff] }
  0x74   : > { %1596 = vmatpush3.bf16.msra.mxu1 %v1699_v12  ;;  %1001 = vmatprep.subr.bf16.mxu0 %v1560_v24  ;;  %v608_v31 = vld [vmem:[#allocation10 + $0x120] sm:$0xff]  ;;  %v1546_v62 = vcombine.high %v605_v59, %v609_v60  ;;  %v597_v63 = vld [vmem:[#allocation10 + $0xc8] sm:$0xff]  ;;  %v1545_v1 = vcombine.low %v605_v59, %v609_v60  ;;  %v630_v24 = vld [vmem:[#allocation10 + $0x1d0] sm:$0xff] }
  0x75   : > { %1597 = vmatprep.subr.bf16.mxu1 %v1907_v0  ;;  %v1544_v32 = vcombine.high %v604_v30, %v608_v31  ;;  %v1543_v33 = vcombine.low %v604_v30, %v608_v31  ;;  %v596_v34 = vld [vmem:[#allocation10 + $0xc0] sm:$0xff]  ;;  %v601_v0 = vld [vmem:[#allocation10 + $0xe8] sm:$0xff]  ;;  %v607_v59 = vld [vmem:[#allocation10 + $0x118] sm:$0xff] }
  0x76   : > { %v600_v35 = vld [vmem:[#allocation10 + $0xe0] sm:$0xff]  ;;  %v1538_v2 = vcombine.high %v597_v63, %v601_v0  ;;  %v589_v3 = vld [vmem:[#allocation10 + $0x88] sm:$0xff]  ;;  %v1537_v5 = vcombine.low %v597_v63, %v601_v0  ;;  %v611_v60 = vld [vmem:[#allocation10 + $0x138] sm:$0xff] }
  0x77   : > { %1002 = vmatpush1.bf16.msra.mxu0 %v1559_v25  ;;  %v1536_v36 = vcombine.high %v596_v34, %v600_v35  ;;  %v1535_v37 = vcombine.low %v596_v34, %v600_v35  ;;  %v588_v38 = vld [vmem:[#allocation10 + $0x80] sm:$0xff]  ;;  %v593_v4 = vld [vmem:[#allocation10 + $0xa8] sm:$0xff]  ;;  %v634_v25 = vld [vmem:[#allocation10 + $0x1f0] sm:$0xff]  ;;  %v1550_v0 = vcombine.high %v607_v59, %v611_v60 }
  0x78   : > { %1598 = vmatpush3.bf16.msra.mxu1 %v1700_v13  ;;  %1003 = vmatprep.subr.bf16.mxu0 %v1552_v28  ;;  %v592_v39 = vld [vmem:[#allocation10 + $0xa0] sm:$0xff]  ;;  %v1530_v6 = vcombine.high %v589_v3, %v593_v4  ;;  %v1529_v7 = vcombine.low %v589_v3, %v593_v4  ;;  %v581_v10 = vld [vmem:[#allocation10 + $0x48] sm:$0xff]  ;;  %v1572_v27 = vcombine.high %v630_v24, %v634_v25  ;;  %v635_v28 = vld [vmem:[#allocation10 + $0x1f8] sm:$0xff] }
  0x79   : > { %1042 = vmatprep.subr.bf16.mxu1 %v1570_v23  ;;  %v1528_v40 = vcombine.high %v588_v38, %v592_v39  ;;  %v1527_v41 = vcombine.low %v588_v38, %v592_v39  ;;  %v580_v8 = vld [vmem:[#allocation10 + $0x40] sm:$0xff]  ;;  %v585_v12 = vld [vmem:[#allocation10 + $0x68] sm:$0xff]  ;;  %v1573_v30 = vcombine.low %v631_v26, %v635_v28  ;;  %v1574_v31 = vcombine.high %v631_v26, %v635_v28  ;;  %v622_v39 = vld [vmem:[#allocation10 + $0x190] sm:$0xff] }
  0x7a   : > { %v584_v9 = vld [vmem:[#allocation10 + $0x60] sm:$0xff]  ;;  %v1521_v14 = vcombine.low %v581_v10, %v585_v12  ;;  %v1522_v15 = vcombine.high %v581_v10, %v585_v12  ;;  %v573_v18 = vld [vmem:[#allocation10 + $0x8] sm:$0xff]  ;;  %v599_v3 = vld [vmem:[#allocation10 + $0xd8] sm:$0xff] }
  0x7b   : > { %1004 = vmatpush1.bf16.msra.mxu0 %v1551_v29  ;;  %v1520_v11 = vcombine.high %v580_v8, %v584_v9  ;;  %v1519_v13 = vcombine.low %v580_v8, %v584_v9  ;;  %v572_v16 = vld [vmem:[#allocation10] sm:$0xff]  ;;  %v577_v20 = vld [vmem:[#allocation10 + $0x28] sm:$0xff]  ;;  %v1571_v29 = vcombine.low %v630_v24, %v634_v25  ;;  %v603_v4 = vld [vmem:[#allocation10 + $0xf8] sm:$0xff] }
  0x7c   : > { %1005 = vmatprep.subr.bf16.mxu0 %v1544_v32  ;;  %v576_v17 = vld [vmem:[#allocation10 + $0x20] sm:$0xff]  ;;  %v1514_v23 = vcombine.high %v573_v18, %v577_v20  ;;  %v1910_v32 = vmov 0   ;;  %v1542_v8 = vcombine.high %v599_v3, %v603_v4  ;;  %v590_v9 = vld [vmem:[#allocation10 + $0x90] sm:$0xff]  ;;  %v595_v12 = vld [vmem:[#allocation10 + $0xb8] sm:$0xff] }
  0x7d   : > { %v1512_v19 = vcombine.high %v572_v16, %v576_v17  ;;  %v1511_v21 = vcombine.low %v572_v16, %v576_v17  ;;  %1031 = vmatprep.mubr.bf16.mxu0 %v1910_v32  ;;  %v594_v10 = vld [vmem:[#allocation10 + $0xb0] sm:$0xff]  ;;  %v579_v28 = vld [vmem:[#allocation10 + $0x38] sm:$0xff] }
  0x7e   : > { %v582_v17 = vld [vmem:[#allocation10 + $0x50] sm:$0xff] }
  0x7f   : > { %1006 = vmatpush1.bf16.msra.mxu0 %v1543_v33  ;;  %v1505_v33 = vld [vmem:[#allocation8] ss:$0 sm:$0xff]  ;;  %v574_v25 = vld [vmem:[#allocation10 + $0x10] sm:$0xff] }
  0x80   : > { %1007 = vmatprep.subr.bf16.mxu0 %v1536_v36  ;;  %v578_v26 = vld [vmem:[#allocation10 + $0x30] sm:$0xff] }
  0x83   : > { %1008 = vmatpush1.bf16.msra.mxu0 %v1535_v37 }
  0x84   : > { %1009 = vmatprep.subr.bf16.mxu0 %v1528_v40 }
  0x87   : > { %1010 = vmatpush1.bf16.msra.mxu0 %v1527_v41  ;;  %v626_v41 = vld [vmem:[#allocation10 + $0x1b0] sm:$0xff] }
  0x88   : > { %1011 = vmatprep.subr.bf16.mxu0 %v1520_v11  ;;  %v591_v11 = vld [vmem:[#allocation10 + $0x98] sm:$0xff] }
  0x89   : > { %v1534_v16 = vcombine.high %v591_v11, %v595_v12 }
  0x8b   : > { %1012 = vmatpush1.bf16.msra.mxu0 %v1519_v13 }
  0x8c   : > { %1013 = vmatprep.subr.bf16.mxu0 %v1512_v19  ;;  %v583_v19 = vld [vmem:[#allocation10 + $0x58] sm:$0xff] }
  0x8f   : > { %1014 = vmatpush1.bf16.msra.mxu0 %v1511_v21  ;;  %v1531_v21 = vcombine.low %v590_v9, %v594_v10 }
  0x90   : > { %1085 = vmatprep.subr.bf16.mxu0 %v1572_v27  ;;  %v575_v27 = vld [vmem:[#allocation10 + $0x18] sm:$0xff] }
 0x132   : > { %v476_v43 = vpop.f32.mrf.mxu0 }
 0x133   : > { %v477_v45 = vadd.f32 %v1503_v42, %v476_v43  ;;  %v627_v43 = vld [vmem:[#allocation10 + $0x1b8] sm:$0xff] }
 0x134   : > { %v1589_v44 = vpop.f32.mrf.mxu0 }
 0x135   : > { %v483_v51 = vmax.f32 %v477_v45, 0.0 }
 0x136   : > { %v479_v46 = vpop.f32.mrf.mxu0 }
 0x137   : > { %v480_v47 = vadd.f32 %v1503_v42, %v479_v46  ;;  %v623_v42 = vld [vmem:[#allocation10 + $0x198] sm:$0xff] }
 0x138   : > { %v1590_v48 = vpop.f32.mrf.mxu0 }
 0x139   : > { %v484_v52 = vmax.f32 %v480_v47, 0.0  ;;  %v1564_v47 = vcombine.high %v622_v39, %v626_v41  ;;  %v1566_v48 = vcombine.high %v623_v42, %v627_v43 }
 0x13b   : > { %v493_v53 = vpack.c.bf16 %v484_v52, %v483_v51  ;;  %v615_v51 = vld [vmem:[#allocation10 + $0x158] sm:$0xff] }
 0x13c   : > { %v619_v52 = vld [vmem:[#allocation10 + $0x178] sm:$0xff] }
 0x13d   : > { %1600 = vmatmul.mubr.msk.bf16.vlgmr.msra.gmra.mxu1 %vm525_vm4, %v493_v53  ;;  %v1563_v53 = vcombine.low %v622_v39, %v626_v41  ;;  %v1558_v56 = vcombine.high %v615_v51, %v619_v52 }
 0x13e   : > { %1043 = vmatpush1.bf16.msra.mxu1 %v1569_v22  ;;  %v1513_v22 = vcombine.low %v573_v18, %v577_v20  ;;  %1074 = vmatprep.mubr.bf16.mxu1 %v1910_v32  ;;  %v586_v18 = vld [vmem:[#allocation10 + $0x70] sm:$0xff]  ;;  %v587_v20 = vld [vmem:[#allocation10 + $0x78] sm:$0xff] }
 0x13f   : > { %1044 = vmatprep.subr.bf16.mxu1 %v1562_v54  ;;  %v1565_v54 = vcombine.low %v623_v42, %v627_v43  ;;  %v1526_v24 = vcombine.high %v583_v19, %v587_v20 }
 0x142   : > { %1045 = vmatpush1.bf16.msra.mxu1 %v1561_v57  ;;  %v606_v57 = vld [vmem:[#allocation10 + $0x110] sm:$0xff] }
 0x143   : > { %1046 = vmatprep.subr.bf16.mxu1 %v1554_v58  ;;  %v610_v58 = vld [vmem:[#allocation10 + $0x130] sm:$0xff] }
 0x144   : > { %v1548_v63 = vcombine.high %v606_v57, %v610_v58 }
 0x146   : > { %1047 = vmatpush1.bf16.msra.mxu1 %v1553_v61  ;;  %v1555_v61 = vcombine.low %v614_v49, %v618_v50 }
 0x147   : > { %1048 = vmatprep.subr.bf16.mxu1 %v1546_v62  ;;  %v1557_v62 = vcombine.low %v615_v51, %v619_v52 }
 0x14a   : > { %1049 = vmatpush1.bf16.msra.mxu1 %v1545_v1  ;;  %v598_v1 = vld [vmem:[#allocation10 + $0xd0] sm:$0xff] }
 0x14b   : > { %1050 = vmatprep.subr.bf16.mxu1 %v1538_v2  ;;  %v602_v2 = vld [vmem:[#allocation10 + $0xf0] sm:$0xff] }
 0x14c   : > { %v1539_v13 = vcombine.low %v598_v1, %v602_v2 }
 0x14e   : > { %1051 = vmatpush1.bf16.msra.mxu1 %v1537_v5  ;;  %v1547_v5 = vcombine.low %v606_v57, %v610_v58 }
 0x14f   : > { %1052 = vmatprep.subr.bf16.mxu1 %v1530_v6  ;;  %v1549_v6 = vcombine.low %v607_v59, %v611_v60 }
 0x152   : > { %1053 = vmatpush1.bf16.msra.mxu1 %v1529_v7  ;;  %v1540_v7 = vcombine.high %v598_v1, %v602_v2 }
 0x153   : > { %1054 = vmatprep.subr.bf16.mxu1 %v1522_v15  ;;  %v1532_v15 = vcombine.high %v590_v9, %v594_v10 }
 0x156   : > { %1055 = vmatpush1.bf16.msra.mxu1 %v1521_v14  ;;  %v1541_v14 = vcombine.low %v599_v3, %v603_v4 }
 0x157   : > { %1056 = vmatprep.subr.bf16.mxu1 %v1514_v23  ;;  %v1524_v23 = vcombine.high %v582_v17, %v586_v18 }
 0x15a   : > { %1057 = vmatpush1.bf16.msra.mxu1 %v1513_v22  ;;  %v1533_v22 = vcombine.low %v591_v11, %v595_v12 }
 0x15b   : > { %1128 = vmatprep.subr.bf16.mxu1 %v1574_v31  ;;  %v1516_v31 = vcombine.high %v574_v25, %v578_v26 }
 0x1fd   : > { %v563_v34 = vpop.f32.mrf.mxu1 }
 0x1fe   : > { %v564_v36 = vadd.f32 %v1505_v33, %v563_v34  ;;  %v1517_v34 = vcombine.low %v575_v27, %v579_v28 }
 0x1ff   : > { %v1601_v35 = vpop.f32.mrf.mxu1 }
 0x200   : > { %v570_v44 = vmax.f32 %v564_v36, 0.0 }
 0x201   : > { %v566_v37 = vpop.f32.mrf.mxu1 }
 0x202   : > { %v567_v38 = vadd.f32 %v1505_v33, %v566_v37  ;;  %v1515_v33 = vcombine.low %v574_v25, %v578_v26  ;;  %v639_v37 = vlaneseq }
 0x203   : > { %v1602_v40 = vpop.f32.mrf.mxu1 }
 0x204   : > { %v571_v45 = vmax.f32 %v567_v38, 0.0  ;;  %v2075_v40 = vshrl.u32 %v639_v37, 7 }
 0x206   : > { %v2069_v46 = vpack.c.bf16 %v571_v45, %v570_v44  ;;  %v645_v43 = vsub.s32 1, %v2075_v40  ;;  %v653_v44 = vsub.s32 3, %v2075_v40  ;;  %v641_v45 = vsub.s32 0, %v2075_v40 }
 0x207   : > { %v657_v12 = vsub.s32 4, %v2075_v40 }
 0x208   : > { %1032 = vmatmul.mubr.bf16.vlgmr.msra.gmra.mxu0 %v2069_v46  ;;  %1075 = vmatmul.mubr.bf16.vlgmr.msra.gmra.mxu1 %v2069_v46 }
 0x209   : > { %1086 = vmatpush1.bf16.msra.mxu0 %v1571_v29  ;;  %1129 = vmatpush1.bf16.msra.mxu1 %v1573_v30  ;;  %v1523_v29 = vcombine.low %v582_v17, %v586_v18  ;;  %v1525_v30 = vcombine.low %v583_v19, %v587_v20  ;;  %v669_v17 = vsub.s32 7, %v2075_v40 }
 0x20a   : > { %1087 = vmatprep.subr.bf16.mxu0 %v1564_v47  ;;  %1130 = vmatprep.subr.bf16.mxu1 %v1566_v48  ;;  %v649_v47 = vsub.s32 2, %v2075_v40  ;;  %v637_v48 = vld [vmem:[#allocation11] sm:$0xff] }
 0x20b   : > { %1117 = vmatprep.mubr.bf16.mxu0 %v1910_v32  ;;  %1160 = vmatprep.mubr.bf16.mxu1 %v1910_v32  ;;  %v1518_v32 = vcombine.high %v575_v27, %v579_v28  ;;  %v646_v50 = vrot.slane %v637_v48, %v645_v43  ;;  %v654_v51 = vrot.slane %v637_v48, %v653_v44 }
 0x20c   : > { %v642_v52 = vrot.slane %v637_v48, %v641_v45  ;;  %v658_v20 = vrot.slane %v637_v48, %v657_v12  ;;  %v670_v27 = vrot.slane %v637_v48, %v669_v17 }
 0x20d   : > { %1088 = vmatpush1.bf16.msra.mxu0 %v1563_v53  ;;  %1131 = vmatpush1.bf16.msra.mxu1 %v1565_v54  ;;  %v650_v53 = vrot.slane %v637_v48, %v649_v47 }
 0x20e   : > { %1089 = vmatprep.subr.bf16.mxu0 %v1556_v55  ;;  %1132 = vmatprep.subr.bf16.mxu1 %v1558_v56 }
 0x211   : > { %1090 = vmatpush1.bf16.msra.mxu0 %v1555_v61  ;;  %1133 = vmatpush1.bf16.msra.mxu1 %v1557_v62 }
 0x212   : > { %1091 = vmatprep.subr.bf16.mxu0 %v1548_v63  ;;  %1134 = vmatprep.subr.bf16.mxu1 %v1550_v0 }
 0x215   : > { %1092 = vmatpush1.bf16.msra.mxu0 %v1547_v5  ;;  %1135 = vmatpush1.bf16.msra.mxu1 %v1549_v6 }
 0x216   : > { %1093 = vmatprep.subr.bf16.mxu0 %v1540_v7  ;;  %1136 = vmatprep.subr.bf16.mxu1 %v1542_v8 }
 0x219   : > { %1094 = vmatpush1.bf16.msra.mxu0 %v1539_v13  ;;  %1137 = vmatpush1.bf16.msra.mxu1 %v1541_v14  ;;  %v665_v13 = vsub.s32 6, %v2075_v40 }
 0x21a   : > { %1095 = vmatprep.subr.bf16.mxu0 %v1532_v15  ;;  %1138 = vmatprep.subr.bf16.mxu1 %v1534_v16  ;;  %v661_v16 = vsub.s32 5, %v2075_v40 }
 0x21c   : > { %v662_v26 = vrot.slane %v637_v48, %v661_v16 }
 0x21d   : > { %1096 = vmatpush1.bf16.msra.mxu0 %v1531_v21  ;;  %1139 = vmatpush1.bf16.msra.mxu1 %v1533_v22  ;;  %v666_v21 = vrot.slane %v637_v48, %v665_v13 }
 0x21e   : > { %1097 = vmatprep.subr.bf16.mxu0 %v1524_v23  ;;  %1140 = vmatprep.subr.bf16.mxu1 %v1526_v24 }
 0x221   : > { %1098 = vmatpush1.bf16.msra.mxu0 %v1523_v29  ;;  %1141 = vmatpush1.bf16.msra.mxu1 %v1525_v30 }
 0x222   : > { %1099 = vmatprep.subr.bf16.mxu0 %v1516_v31  ;;  %1142 = vmatprep.subr.bf16.mxu1 %v1518_v32 }
 0x225   : > { %1100 = vmatpush1.bf16.msra.mxu0 %v1515_v33  ;;  %1143 = vmatpush1.bf16.msra.mxu1 %v1517_v34 }
 0x228   : > { %1118 = vmatmul.mubr.bf16.vlgmr.msra.gmra.mxu0 %v2069_v46  ;;  %1161 = vmatmul.mubr.bf16.vlgmr.msra.gmra.mxu1 %v2069_v46 }
 0x2c8   : > { %v1033_v35 = vpop.f32.mrf.mxu0  ;;  %v1076_v36 = vpop.f32.mrf.mxu1 }
 0x2c9   : > { %v1034_v60 = vadd.f32 %v1033_v35, %v642_v52  ;;  %v1077_v61 = vadd.f32 %v1076_v36, %v650_v53 }
 0x2ca   : > { %v1035_v38 = vpop.f32.mrf.mxu0  ;;  %v1078_v39 = vpop.f32.mrf.mxu1 }
 0x2cb   : > { %v1036_v56 = vadd.f32 %v1035_v38, %v646_v50  ;;  %v1079_v57 = vadd.f32 %v1078_v39, %v654_v51  ;;  %v1171_v4 = vmax.f32 %v1034_v60, 0.0  ;;  %v1173_v5 = vmax.f32 %v1077_v61, 0.0 }
 0x2cc   : > { %v1037_v41 = vpop.f32.mrf.mxu0  ;;  %v1080_v42 = vpop.f32.mrf.mxu1 }
 0x2cd   : > { %v1038_v58 = vadd.f32 %v1037_v41, %v642_v52  ;;  %v1081_v59 = vadd.f32 %v1080_v42, %v650_v53  ;;  %v1172_v0 = vmax.f32 %v1036_v56, 0.0  ;;  %v1174_v1 = vmax.f32 %v1079_v57, 0.0 }
 0x2ce   : > { %v1039_v49 = vpop.f32.mrf.mxu0  ;;  %v1082_v46 = vpop.f32.mrf.mxu1 }
 0x2cf   : > { %v1040_v54 = vadd.f32 %v1039_v49, %v646_v50  ;;  %v1083_v55 = vadd.f32 %v1082_v46, %v654_v51  ;;  %v1179_v2 = vmax.f32 %v1038_v58, 0.0  ;;  %v1181_v3 = vmax.f32 %v1081_v59, 0.0 }
 0x2d1   : > { %v1180_v62 = vmax.f32 %v1040_v54, 0.0  ;;  %v1182_v63 = vmax.f32 %v1083_v55, 0.0  ;;  %v1187_v8 = vmax.f32 %v1171_v4, %v1179_v2  ;;  %v1189_v9 = vmax.f32 %v1173_v5, %v1181_v3 }
 0x2d3   : > { %v1188_v6 = vmax.f32 %v1172_v0, %v1180_v62  ;;  %v1190_v7 = vmax.f32 %v1174_v1, %v1182_v63  ;;  %v1242_v14 = vrot.slane %v1187_v8, 4  ;;  %v1254_v15 = vrot.slane %v1189_v9, 4 }
 0x2d4   : > { %v1911_v62 = vmov 1966171168  }
 0x2d5   : > { %v1248_v10 = vrot.slane %v1188_v6, 4  ;;  %v1260_v11 = vrot.slane %v1190_v7, 4  ;;  %v1243_v22 = vmax.f32 %v1187_v8, %v1242_v14  ;;  %v1255_v23 = vmax.f32 %v1189_v9, %v1254_v15 }
 0x2d6   : > { %v1303_v63 = vunpack.c.l.s4 %v1911_v62 }
 0x2d7   : > { %v1249_v18 = vmax.f32 %v1188_v6, %v1248_v10  ;;  %v1261_v19 = vmax.f32 %v1190_v7, %v1260_v11  ;;  %v1244_v34 = vrot.slane %v1243_v22, 2  ;;  %v1256_v35 = vrot.slane %v1255_v23, 2 }
 0x2d8   : > { %v1304_v12 = vunpack.c.0.s8 %v1303_v63 }
 0x2d9   : > { %v1250_v28 = vrot.slane %v1249_v18, 2  ;;  %v1262_v29 = vrot.slane %v1261_v19, 2  ;;  %v1245_v53 = vmax.f32 %v1243_v22, %v1244_v34  ;;  %v1257_v54 = vmax.f32 %v1255_v23, %v1256_v35 }
 0x2db   : > { %v1251_v43 = vmax.f32 %v1249_v18, %v1250_v28  ;;  %v1263_v44 = vmax.f32 %v1261_v19, %v1262_v29  ;;  %v1246_v5 = vrot.slane %v1245_v53, 1  ;;  %v1258_v6 = vrot.slane %v1257_v54, 1 }
 0x2dd   : > { %v1252_v61 = vrot.slane %v1251_v43, 1  ;;  %v1264_v0 = vrot.slane %v1263_v44, 1  ;;  %v1247_v18 = vmax.f32 %v1245_v53, %v1246_v5  ;;  %v1259_v19 = vmax.f32 %v1257_v54, %v1258_v6 }
 0x2df   : > { %v1253_v11 = vmax.f32 %v1251_v43, %v1252_v61  ;;  %v1265_v13 = vmax.f32 %v1263_v44, %v1264_v0 }
 0x2e8   : > { %v1119_v24 = vpop.f32.mrf.mxu0  ;;  %v1162_v25 = vpop.f32.mrf.mxu1 }
 0x2e9   : > { %v1120_v30 = vadd.f32 %v1119_v24, %v658_v20  ;;  %v1163_v31 = vadd.f32 %v1162_v25, %v666_v21  ;;  %v1298_v24 = vcombine.low %v1247_v18, %v1253_v11  ;;  %v1307_v25 = vsub.s32 %v1304_v12, %v2075_v40 }
 0x2ea   : > { %v1121_v32 = vpop.f32.mrf.mxu0  ;;  %v1164_v33 = vpop.f32.mrf.mxu1 }
 0x2eb   : > { %v1122_v36 = vadd.f32 %v1121_v32, %v662_v26  ;;  %v1165_v37 = vadd.f32 %v1164_v33, %v670_v27  ;;  %v1175_v45 = vmax.f32 %v1120_v30, 0.0  ;;  %v1177_v47 = vmax.f32 %v1163_v31, 0.0 }
 0x2ec   : > { %v1123_v38 = vpop.f32.mrf.mxu0  ;;  %v1166_v39 = vpop.f32.mrf.mxu1  ;;  %v1308_v33 = vrot.slane %v1298_v24, %v1307_v25 }
 0x2ed   : > { %v1124_v41 = vadd.f32 %v1123_v38, %v658_v20  ;;  %v1167_v42 = vadd.f32 %v1166_v39, %v666_v21  ;;  %v1176_v55 = vmax.f32 %v1122_v36, 0.0  ;;  %v1178_v56 = vmax.f32 %v1165_v37, 0.0 }
 0x2ee   : > { %v1125_v49 = vpop.f32.mrf.mxu0  ;;  %v1168_v48 = vpop.f32.mrf.mxu1 }
 0x2ef   : > { %v1183_v46 = vmax.f32 %v1124_v41, 0.0  ;;  %v1185_v50 = vmax.f32 %v1167_v42, 0.0  ;;  %v1126_v51 = vadd.f32 %v1125_v49, %v662_v26  ;;  %v1169_v52 = vadd.f32 %v1168_v48, %v670_v27 }
 0x2f0   : > { %v1299_v26 = vcombine.low %v1259_v19, %v1265_v13 }
 0x2f1   : > { %v1191_v57 = vmax.f32 %v1175_v45, %v1183_v46  ;;  %v1193_v58 = vmax.f32 %v1177_v47, %v1185_v50  ;;  %v1184_v59 = vmax.f32 %v1126_v51, 0.0  ;;  %v1186_v60 = vmax.f32 %v1169_v52, 0.0 }
 0x2f2   : > { %v1315_v34 = vrot.slane %v1299_v26, %v1307_v25 }
 0x2f3   : > { %v1266_v1 = vrot.slane %v1191_v57, 4  ;;  %v1278_v2 = vrot.slane %v1193_v58, 4  ;;  %v1192_v3 = vmax.f32 %v1176_v55, %v1184_v59  ;;  %v1194_v4 = vmax.f32 %v1178_v56, %v1186_v60 }
 0x2f4   : > { %v1330_v42 = vcombine.low %v1308_v33, %v1315_v34 }
 0x2f5   : > { %v1267_v7 = vmax.f32 %v1191_v57, %v1266_v1  ;;  %v1279_v8 = vmax.f32 %v1193_v58, %v1278_v2  ;;  %v1272_v9 = vrot.slane %v1192_v3, 4  ;;  %v1284_v10 = vrot.slane %v1194_v4, 4 }
 0x2f6   : > { %v1338_v45 = vrot.slane %v1330_v42, %v1307_v25 }
 0x2f7   : > { %v1268_v14 = vrot.slane %v1267_v7, 2  ;;  %v1280_v15 = vrot.slane %v1279_v8, 2  ;;  %v1273_v16 = vmax.f32 %v1192_v3, %v1272_v9  ;;  %v1285_v17 = vmax.f32 %v1194_v4, %v1284_v10 }
 0x2f9   : > { %v1269_v20 = vmax.f32 %v1267_v7, %v1268_v14  ;;  %v1281_v21 = vmax.f32 %v1279_v8, %v1280_v15  ;;  %v1274_v22 = vrot.slane %v1273_v16, 2  ;;  %v1286_v23 = vrot.slane %v1285_v17, 2 }
 0x2fb   : > { %v1270_v27 = vrot.slane %v1269_v20, 1  ;;  %v1282_v28 = vrot.slane %v1281_v21, 1  ;;  %v1275_v29 = vmax.f32 %v1273_v16, %v1274_v22  ;;  %v1287_v30 = vmax.f32 %v1285_v17, %v1286_v23 }
 0x2fd   : > { %v1276_v31 = vrot.slane %v1275_v29, 1  ;;  %v1288_v32 = vrot.slane %v1287_v30, 1  ;;  %v1271_v35 = vmax.f32 %v1269_v20, %v1270_v27  ;;  %v1283_v36 = vmax.f32 %v1281_v21, %v1282_v28 }
 0x2ff   : > { %v1277_v37 = vmax.f32 %v1275_v29, %v1276_v31  ;;  %v1289_v38 = vmax.f32 %v1287_v30, %v1288_v32 }
 0x301   : > { %v1300_v39 = vcombine.low %v1271_v35, %v1277_v37  ;;  %v1301_v41 = vcombine.low %v1283_v36, %v1289_v38 }
 0x303   : > { %v1322_v43 = vrot.slane %v1300_v39, %v1307_v25  ;;  %v1329_v44 = vrot.slane %v1301_v41, %v1307_v25 }
 0x305   : > { %v1331_v40 = vcombine.low %v1322_v43, %v1329_v44 }
 0x307   : > { %v1345_v47 = vrot.slane %v1331_v40, %v1307_v25 }
 0x309   : > { %v1346_v49 = vcombine.low %v1338_v45, %v1345_v47 }
 0x30b   : > { %1348 = vst [vmem:[%s416_s20] sm:$0xff] %v1346_v49 }
 0x30c PF: > { %s21_s26 = sadd.s32 1, %s1895_s26   ;;  %s2118_s24 = smov %s1891_s25 }
 0x30d   : > { %p18_p7 = scmp.ge.s32.totalorder %s21_s26, 4   ;;  %s2119_s25 = smov %s2121_s12 }
 0x30f   :  { %20 = sbr.rel (!%p18_p7) target bundleno = 5 (0x5), region = 111 }
 0x314   :  { %1371 = vsyncpa [#allocation4], 1 }
 0x315   :  { %1373 = vsyncpa [#allocation4 + $0x1], 1 }
 0x316   :  { %1374 = vsyncpa [#allocation6], 1 }
 0x317   :  { %1375 = vsyncpa [#allocation9], 1 }
 0x318   :  { %1376 = vsyncpa [#allocation12], 1 }

// kernel: pointnet_forward.6
= control target key start
LH: loop header
LB: loop body
LE: loop exit
PB: predicated region body
PF: predicated region fallthrough
CT: control target
= control target key end

     0   :  { %s1118_s21 = smov 0   ;;  %s1120_s22 = smov 0   ;;  %s1210_s0 = inlined_call_operand.vmem [shape: f32[2,16,3], index: 0, kind: input, shape index: {}]   ;;  %s1211_s1 = inlined_call_operand.vmem [shape: f32[2,3,3], index: 1, kind: input, shape index: {}]   ;;  %s1212_s2 = inlined_call_operand.vmem [shape: f32[3,8], index: 2, kind: input, shape index: {}]   ;;  %s1213_s3 = inlined_call_operand.vmem [shape: f32[1,8], index: 3, kind: input, shape index: {}]   ;;  %s1214_s4 = inlined_call_operand.vmem [shape: bf16[8,8], index: 4, kind: input, shape index: {}]   ;;  %s1215_s5 = inlined_call_operand.vmem [shape: f32[1,8], index: 5, kind: input, shape index: {}]   ;;  %s1216_s6 = inlined_call_operand.vmem [shape: bf16[8,8], index: 6, kind: input, shape index: {}]   ;;  %s1217_s7 = inlined_call_operand.vmem [shape: f32[1,8], index: 7, kind: input, shape index: {}]   ;;  %s1218_s8 = inlined_call_operand.vmem [shape: bf16[8,16], index: 8, kind: input, shape index: {}]   ;;  %s1219_s9 = inlined_call_operand.vmem [shape: f32[1,16], index: 9, kind: input, shape index: {}]   ;;  %s1220_s10 = inlined_call_operand.vmem [shape: bf16[16,128], index: 10, kind: input, shape index: {}]   ;;  %s1221_s11 = inlined_call_operand.vmem [shape: f32[1,128], index: 11, kind: input, shape index: {}]   ;;  %s1222_s12 = inlined_call_operand.vmem [shape: f32[2,1,128], index: 12, kind: output, shape index: {}]  }
   0x1   :  { %s1122_s23 = smov 0  }
   0x2 LB: > { %s41_s24 = sadd.s32 1, %s1041_s22  ;;  %p930_p0 = scmp.ge.s32.totalorder %s1045_s23, 1  ;;  %s1045_s23 = sphi %s1122_s23, %s22_s23   ;;  %s1041_s22 = sphi %s1120_s22, %s1224_s22   ;;  %s1037_s21 = sphi %s1118_s21, %s1223_s21  }
   0x3   : > { %p43_p1 = scmp.ge.s32.totalorder %s41_s24, 2  ;;  %p411_p2 = scmp.lt.s32.totalorder %s1045_s23, 3 }
   0x5   : > { %s1226_s24 = smov (%p43_p1, %s41_s24), 0  ;;  %p412_p3 = pnand %p930_p0, %p411_p2 }
   0x6   : > { %p467_p4 = scmp.lt.s32.totalorder (!%p412_p3), %s1037_s21, 1 }
   0x7   : > { %415 = sbr.rel (%p412_p3) target bundleno = 1186 (0x4a2), region = 68 }
   0xc   : > { %v1047_v0 = vmov 0   ;;  %v1048_v1 = vmov 2   ;;  %s1228_s21 = smov (!%p467_p4, %s1037_s21), 1  ;;  %v1049_v3 = vmov 1   ;;  %v1050_v4 = vmov 0.0  }
   0xd   : > { %1018 = vset.pattern.permute.xlu0 %v1047_v0  ;;  %1020 = vset.pattern.permute.xlu1 %v1048_v1  ;;  %s933_s25 = sshll.u32 %s1228_s21, 2  ;;  %vm1051_vm0 = vmmov 0   ;;  %v498_v5 = vlaneseq  ;;  %v491_v10 = vld [vmem:[%s1212_s2] sm:$0x7]  ;;  %vm537_vm1 = vcmask 1040384   ;;  %s947_s13 = sshll.u32 %s1228_s21, 4 }
   0xe   : > { %s482_s28 = scalar_lea.vmem %s1211_s1, %s933_s25  ;;  %958 = vmatprep.subr.bf16.mxu0 %v1050_v4  ;;  %964 = vmatprep.subr.bf16.mxu1 %v1050_v4  ;;  %vm538_vm2 = vcmask 1041408   ;;  %v1052_v21 = vmov 65535   ;;  %s474_s16 = scalar_lea.vmem %s1210_s0, %s947_s13  ;;  %vm533_vm3 = vcmask 23552   ;;  %v587_v30 = vld [vmem:[%s1214_s4] sm:$0xf]  ;;  %vm600_vm4 = vcmask 1043456  }
   0xf   : > { %v492_v2 = vld [vmem:[%s482_s28] sm:$0x7]  ;;  %960 = vmatprep.mubr.msk.bf16.mxu0 %vm1051_vm0, %v1050_v4  ;;  %966 = vmatprep.mubr.msk.bf16.mxu1 %vm1051_vm0, %v1050_v4  ;;  %v499_v6 = vshrl.u32 %v498_v5, 7  ;;  %v539_v22 = vsel %vm537_vm1, 4294967295, %v1052_v21  ;;  %v490_v27 = vld [vmem:[%s474_s16 + $0x8] sm:$0xff]  ;;  %v602_v31 = vsel %vm600_vm4, %v587_v30, 0  ;;  %s486_s27 = scalar_lea.vmem %s1222_s12, %s1228_s21 }
  0x10   : > { %495 = vperm.xlu0 %1018, %v492_v2   ;;  %515 = vperm.xlu1 %1020, %v492_v2   ;;  %v540_v24 = vsel %vm538_vm2, %v539_v22, 0  ;;  %v489_v26 = vld [vmem:[%s474_s16] sm:$0xff]  ;;  %vm596_vm5 = vcmask 64512   ;;  %vm779_vm6 = vcmask 130048  }
  0x11   : > { %v500_v7 = vsub.s32 0, %v499_v6  ;;  %v510_v8 = vsub.s32 1, %v499_v6  ;;  %v520_v9 = vsub.s32 2, %v499_v6  ;;  %v524_v29 = vpack.c.bf16 %v490_v27, %v489_v26  ;;  %965 = vmatpush3.bf16.msra.mxu1 %v602_v31  ;;  %v934_v32 = vld [vmem:[%s1213_s3] ss:$0 sm:$0xff] }
  0x12   : > { %976 = vmatprep.subr.bf16.mxu1 %v1050_v4  ;;  %v647_v42 = vld [vmem:[%s1216_s6] sm:$0xf] }
  0x13   : > { %v501_v12 = vrot.slane %v491_v10, %v500_v7  ;;  %v511_v13 = vrot.slane %v491_v10, %v510_v8  ;;  %v521_v14 = vrot.slane %v491_v10, %v520_v9  ;;  %v660_v43 = vsel %vm600_vm4, %v647_v42, 0  ;;  %v936_v44 = vld [vmem:[%s1215_s5] ss:$0 sm:$0xff] }
  0x14   : > { %1019 = vset.pattern.permute.xlu0 %v1049_v3  ;;  %v705_v54 = vld [vmem:[%s1218_s8] sm:$0xf] }
  0x15   : > { %505 = vperm.xlu0 %1019, %v492_v2   ;;  %v718_v55 = vsel %vm600_vm4, %v705_v54, 0  ;;  %v938_v56 = vld [vmem:[%s1217_s7] ss:$0 sm:$0xff] }
  0x16   : > { %v1022_v2 = vld [vmem:[%s1220_s10] sm:$0xff]  }
  0x17   : > { %v940_v3 = vld [vmem:[%s1219_s9] ss:$0 sm:$0xff] }
  0x19   : > { %1021 = vset.pattern.permute.xlu0 %v1048_v1 }
  0x8b   : > { %v496_v11 = vpop.permute.xlu0 %495  ;;  %v516_v15 = vpop.permute.xlu1 %515 }
  0x8c   : > { %v502_v17 = vmul.f32 %v501_v12, %v496_v11  ;;  %v522_v19 = vmul.f32 %v521_v14, %v516_v15 }
  0x90   : > { %v506_v16 = vpop.permute.xlu0 %505 }
  0x91   : > { %v512_v18 = vmul.f32 %v511_v13, %v506_v16  ;;  %v942_v13 = vld [vmem:[%s1221_s11] ss:$0 sm:$0xff] }
  0x93   : > { %v513_v20 = vadd.f32 %v512_v18, %v502_v17 }
  0x95   : > { %v523_v23 = vadd.f32 %v522_v19, %v513_v20 }
  0x97   : > { %v525_v25 = vpack.c.bf16 %v523_v23, %v523_v23 }
  0x99   : > { %v542_v28 = vand.u32 %v540_v24, %v525_v25 }
  0x9b   : > { %959 = vmatpush3.bf16.msra.mxu0 %v542_v28 }
  0x9c   : > { %970 = vmatprep.subr.bf16.mxu0 %v1050_v4 }
  0x9e   : > { %961 = vmatmul.mubr.msk.bf16.vlgmr.msra.gmra.mxu0 %vm533_vm3, %v524_v29 }
  0x9f   : > { %972 = vmatprep.mubr.msk.bf16.mxu0 %vm1051_vm0, %v1050_v4  ;;  %971 = vmatpush3.bf16.msra.mxu0 %v660_v43 }
  0xa0   : > { %982 = vmatprep.subr.bf16.mxu0 %v1050_v4 }
 0x15e   : > { %v578_v33 = vpop.f32.mrf.mxu0 }
 0x15f   : > { %v579_v35 = vadd.f32 %v934_v32, %v578_v33 }
 0x160   : > { %v962_v34 = vpop.f32.mrf.mxu0 }
 0x161   : > { %v585_v39 = vmax.f32 %v579_v35, 0.0 }
 0x162   : > { %v581_v36 = vpop.f32.mrf.mxu0 }
 0x163   : > { %v582_v37 = vadd.f32 %v934_v32, %v581_v36 }
 0x164   : > { %v963_v38 = vpop.f32.mrf.mxu0 }
 0x165   : > { %v586_v40 = vmax.f32 %v582_v37, 0.0 }
 0x167   : > { %v588_v41 = vpack.c.bf16 %v586_v40, %v585_v39 }
 0x169   : > { %967 = vmatmul.mubr.msk.bf16.vlgmr.msra.gmra.mxu1 %vm596_vm5, %v588_v41 }
 0x16a   : > { %978 = vmatprep.mubr.msk.bf16.mxu1 %vm1051_vm0, %v1050_v4  ;;  %977 = vmatpush3.bf16.msra.mxu1 %v718_v55 }
 0x229   : > { %v638_v45 = vpop.f32.mrf.mxu1 }
 0x22a   : > { %v639_v47 = vadd.f32 %v936_v44, %v638_v45 }
 0x22b   : > { %v968_v46 = vpop.f32.mrf.mxu1 }
 0x22c   : > { %v645_v51 = vmax.f32 %v639_v47, 0.0 }
 0x22d   : > { %v641_v48 = vpop.f32.mrf.mxu1 }
 0x22e   : > { %v642_v49 = vadd.f32 %v936_v44, %v641_v48 }
 0x22f   : > { %v969_v50 = vpop.f32.mrf.mxu1 }
 0x230   : > { %v646_v52 = vmax.f32 %v642_v49, 0.0 }
 0x232   : > { %v648_v53 = vpack.c.bf16 %v646_v52, %v645_v51 }
 0x234   : > { %973 = vmatmul.mubr.msk.bf16.vlgmr.msra.gmra.mxu0 %vm596_vm5, %v648_v53 }
 0x235   : > { %984 = vmatprep.mubr.msk.bf16.mxu0 %vm1051_vm0, %v1050_v4  ;;  %983 = vmatpush3.bf16.msra.mxu0 %v1022_v2 }
 0x2f4   : > { %v696_v57 = vpop.f32.mrf.mxu0 }
 0x2f5   : > { %v697_v59 = vadd.f32 %v938_v56, %v696_v57 }
 0x2f6   : > { %v974_v58 = vpop.f32.mrf.mxu0 }
 0x2f7   : > { %v703_v63 = vmax.f32 %v697_v59, 0.0 }
 0x2f8   : > { %v699_v60 = vpop.f32.mrf.mxu0 }
 0x2f9   : > { %v700_v61 = vadd.f32 %v938_v56, %v699_v60 }
 0x2fa   : > { %v975_v62 = vpop.f32.mrf.mxu0 }
 0x2fb   : > { %v704_v0 = vmax.f32 %v700_v61, 0.0 }
 0x2fd   : > { %v706_v1 = vpack.c.bf16 %v704_v0, %v703_v63 }
 0x2ff   : > { %979 = vmatmul.mubr.msk.bf16.vlgmr.msra.gmra.mxu1 %vm596_vm5, %v706_v1 }
 0x3bf   : > { %v754_v4 = vpop.f32.mrf.mxu1 }
 0x3c0   : > { %v755_v6 = vadd.f32 %v940_v3, %v754_v4 }
 0x3c1   : > { %v980_v5 = vpop.f32.mrf.mxu1 }
 0x3c2   : > { %v761_v10 = vmax.f32 %v755_v6, 0.0 }
 0x3c3   : > { %v757_v7 = vpop.f32.mrf.mxu1 }
 0x3c4   : > { %v758_v8 = vadd.f32 %v940_v3, %v757_v7 }
 0x3c5   : > { %v981_v9 = vpop.f32.mrf.mxu1 }
 0x3c6   : > { %v762_v11 = vmax.f32 %v758_v8, 0.0 }
 0x3c8   : > { %v765_v12 = vpack.c.bf16 %v762_v11, %v761_v10 }
 0x3ca   : > { %985 = vmatmul.mubr.msk.bf16.vlgmr.msra.gmra.mxu0 %vm779_vm6, %v765_v12 }
 0x48a   : > { %v817_v14 = vpop.f32.mrf.mxu0 }
 0x48b   : > { %v818_v16 = vadd.f32 %v942_v13, %v817_v14 }
 0x48c   : > { %v986_v15 = vpop.f32.mrf.mxu0 }
 0x48d   : > { %v824_v20 = vmax.f32 %v818_v16, 0.0 }
 0x48e   : > { %v820_v17 = vpop.f32.mrf.mxu0 }
 0x48f   : > { %v821_v18 = vadd.f32 %v942_v13, %v820_v17 }
 0x490   : > { %v987_v19 = vpop.f32.mrf.mxu0 }
 0x491   : > { %v825_v21 = vmax.f32 %v821_v18, 0.0 }
 0x493   : > { %v826_v22 = vmax.f32 %v824_v20, %v825_v21 }
 0x495   : > { %v839_v23 = vrot.slane %v826_v22, 4 }
 0x497   : > { %v840_v24 = vmax.f32 %v826_v22, %v839_v23 }
 0x499   : > { %v841_v25 = vrot.slane %v840_v24, 2 }
 0x49b   : > { %v842_v26 = vmax.f32 %v840_v24, %v841_v25 }
 0x49d   : > { %v843_v27 = vrot.slane %v842_v26, 1 }
 0x49f   : > { %v844_v28 = vmax.f32 %v842_v26, %v843_v27 }
 0x4a1   : > { %845 = vst [vmem:[%s486_s27] sm:$0x1] %v844_v28 }
 0x4a2 PF: > { %s22_s23 = sadd.s32 1, %s1045_s23   ;;  %s1223_s21 = smov %s1041_s22 }
 0x4a3   : > { %p19_p5 = scmp.ge.s32.totalorder %s22_s23, 4   ;;  %s1224_s22 = smov %s1226_s24 }
 0x4a5   :  { %21 = sbr.rel (!%p19_p5) target bundleno = 2 (0x2), region = 109 }

// kernel: pointnet_forward.5
= control target key start
LH: loop header
LB: loop body
LE: loop exit
PB: predicated region body
PF: predicated region fallthrough
CT: control target
= control target key end

     0   :  { %12 = vsyncpa [#allocation3], 0  ;;  %s3535_s24 = smov [#allocation2]   ;;  %s3923_s0 = inlined_call_operand.vmem [shape: f32[2,1024], index: 0, kind: input, shape index: {}]   ;;  %s3924_s1 = inlined_call_operand.hbm [shape: bf16[1024,512], index: 1, kind: input, shape index: {}]   ;;  %s3925_s2 = inlined_call_operand.vmem [shape: f32[1,512], index: 2, kind: input, shape index: {}]   ;;  %s3926_s3 = inlined_call_operand.vmem [shape: bf16[512,256], index: 3, kind: input, shape index: {}]   ;;  %s3927_s4 = inlined_call_operand.vmem [shape: f32[1,256], index: 4, kind: input, shape index: {}]   ;;  %s3928_s5 = inlined_call_operand.vmem [shape: bf16[256,128], index: 5, kind: input, shape index: {}]   ;;  %s3929_s6 = inlined_call_operand.vmem [shape: f32[1,128], index: 6, kind: input, shape index: {}]   ;;  %s3930_s7 = inlined_call_operand.vmem [shape: f32[2,128], index: 7, kind: output, shape index: {}]  }
   0x1   :  { %s20_s25 = sshll.u32 %s3535_s24, 4  ;;  %s21_s25 = int_to_ptr.vmem [resolvable:$true] %s20_s25 }
   0x2   :  { %s3521_s26 = scalar_lea.vmem %s21_s25, 32768  ;;  %p3526_p1 = scmp.lt.s32.totalorder %s21_s25, %s21_s25 }
   0x3   :  { %p3522_p0 = scmp.ne.s32.totalorder %s21_s25, %s3521_s26  ;;  %p3527_p2 = scmp.lt.s32.totalorder %s3521_s26, %s3521_s26 }
   0x5   :  { %p3528_p3 = por %p3527_p2, %p3526_p1 }
   0x7   :  { %p3529_p4 = pnand %p3528_p3, %p3522_p0 }
   0x9   :  { %3532 = shalt.err (!%p3529_p4)
}
   0xa   :  { %s3536_s27 = smov 256   ;;  %s3537_s28 = smov 16  }
   0xb   :  { %26 = dma.hbm_to_vmem [thread:$0]  %s3924_s1, 32768, %s21_s25, [#allocation3], %s3536_s27, %s3536_s27, %s3537_s28  }
   0xc   :  { %3533 = dma.done.wait [#allocation3], 32768  }
   0xd   :  { %3534 = vsyncadd [#allocation3], 4294934528  ;;  %v3015_v0 = vld [vmem:[#allocation2 + $0xe4] ss:$16 sps:$4 sm:$0xff]   ;;  %v3019_v2 = vld [vmem:[#allocation2 + $0xe0] ss:$16 sps:$4 sm:$0xff]   ;;  %v306_v38 = vlaneseq }
   0xe   :  { %v3017_v1 = vld [vmem:[#allocation2 + $0x2e4] ss:$16 sps:$4 sm:$0xff]   ;;  %1653 = vmatprep.subr.bf16.mxu0 %v3015_v0  ;;  %v3020_v3 = vld [vmem:[#allocation2 + $0x2e0] ss:$16 sps:$4 sm:$0xff]   ;;  %v3538_v36 = vmov 1983009808  }
   0xf   :  { %1694 = vmatprep.subr.bf16.mxu1 %v3017_v1  ;;  %v3021_v4 = vld [vmem:[#allocation2 + $0xc4] ss:$16 sps:$4 sm:$0xff]   ;;  %1654 = vmatpush1.bf16.msra.mxu0 %v3019_v2  ;;  %v3025_v6 = vld [vmem:[#allocation2 + $0xc0] ss:$16 sps:$4 sm:$0xff]   ;;  %v304_v37 = vunpack.c.l.s4 %v3538_v36  ;;  %v3582_v43 = vshrl.u32 %v306_v38, 7 }
  0x10   :  { %1695 = vmatpush1.bf16.msra.mxu1 %v3020_v3  ;;  %v3023_v5 = vld [vmem:[#allocation2 + $0x2c4] ss:$16 sps:$4 sm:$0xff]   ;;  %1655 = vmatprep.subr.bf16.mxu0 %v3021_v4  ;;  %v3026_v7 = vld [vmem:[#allocation2 + $0x2c0] ss:$16 sps:$4 sm:$0xff]  }
  0x11   :  { %1696 = vmatprep.subr.bf16.mxu1 %v3023_v5  ;;  %v3027_v8 = vld [vmem:[#allocation2 + $0xa4] ss:$16 sps:$4 sm:$0xff]   ;;  %v3031_v10 = vld [vmem:[#allocation2 + $0xa0] ss:$16 sps:$4 sm:$0xff]   ;;  %v305_v42 = vunpack.c.0.s8 %v304_v37 }
  0x12   :  { %v3029_v9 = vld [vmem:[#allocation2 + $0x2a4] ss:$16 sps:$4 sm:$0xff]   ;;  %v3032_v11 = vld [vmem:[#allocation2 + $0x2a0] ss:$16 sps:$4 sm:$0xff]  }
  0x13   :  { %1656 = vmatpush1.bf16.msra.mxu0 %v3025_v6  ;;  %v3033_v12 = vld [vmem:[#allocation2 + $0x84] ss:$16 sps:$4 sm:$0xff]   ;;  %v3037_v14 = vld [vmem:[#allocation2 + $0x80] ss:$16 sps:$4 sm:$0xff]   ;;  %v3585_v49 = vsub.s32 %v305_v42, %v3582_v43  ;;  %v42_v42 = vld [vmem:[%s3923_s0 + $0x8] sm:$0xff] }
  0x14   :  { %1697 = vmatpush1.bf16.msra.mxu1 %v3026_v7  ;;  %1657 = vmatprep.subr.bf16.mxu0 %v3027_v8  ;;  %v3035_v13 = vld [vmem:[#allocation2 + $0x284] ss:$16 sps:$4 sm:$0xff]   ;;  %v3038_v15 = vld [vmem:[#allocation2 + $0x280] ss:$16 sps:$4 sm:$0xff]  }
  0x15   :  { %1698 = vmatprep.subr.bf16.mxu1 %v3029_v9  ;;  %v3039_v16 = vld [vmem:[#allocation2 + $0x64] ss:$16 sps:$4 sm:$0xff]   ;;  %v3043_v18 = vld [vmem:[#allocation2 + $0x60] ss:$16 sps:$4 sm:$0xff]  }
  0x16   :  { %v3041_v17 = vld [vmem:[#allocation2 + $0x264] ss:$16 sps:$4 sm:$0xff]   ;;  %v3044_v19 = vld [vmem:[#allocation2 + $0x260] ss:$16 sps:$4 sm:$0xff]  }
  0x17   :  { %1658 = vmatpush1.bf16.msra.mxu0 %v3031_v10  ;;  %v3045_v20 = vld [vmem:[#allocation2 + $0x44] ss:$16 sps:$4 sm:$0xff]   ;;  %v3049_v22 = vld [vmem:[#allocation2 + $0x40] ss:$16 sps:$4 sm:$0xff]  }
  0x18   :  { %1699 = vmatpush1.bf16.msra.mxu1 %v3032_v11  ;;  %1659 = vmatprep.subr.bf16.mxu0 %v3033_v12  ;;  %v3047_v21 = vld [vmem:[#allocation2 + $0x244] ss:$16 sps:$4 sm:$0xff]   ;;  %v3050_v23 = vld [vmem:[#allocation2 + $0x240] ss:$16 sps:$4 sm:$0xff]  }
  0x19   :  { %1700 = vmatprep.subr.bf16.mxu1 %v3035_v13  ;;  %v3051_v24 = vld [vmem:[#allocation2 + $0x24] ss:$16 sps:$4 sm:$0xff]   ;;  %v3055_v26 = vld [vmem:[#allocation2 + $0x20] ss:$16 sps:$4 sm:$0xff]  }
  0x1a   :  { %v3053_v25 = vld [vmem:[#allocation2 + $0x224] ss:$16 sps:$4 sm:$0xff]   ;;  %v3056_v27 = vld [vmem:[#allocation2 + $0x220] ss:$16 sps:$4 sm:$0xff]  }
  0x1b   :  { %1660 = vmatpush1.bf16.msra.mxu0 %v3037_v14  ;;  %v3057_v28 = vld [vmem:[#allocation2 + $0x4] ss:$16 sps:$4 sm:$0xff]   ;;  %v3061_v30 = vld [vmem:[#allocation2] ss:$16 sps:$4 sm:$0xff]  }
  0x1c   :  { %1701 = vmatpush1.bf16.msra.mxu1 %v3038_v15  ;;  %1661 = vmatprep.subr.bf16.mxu0 %v3039_v16  ;;  %v3059_v29 = vld [vmem:[#allocation2 + $0x204] ss:$16 sps:$4 sm:$0xff]   ;;  %v3062_v31 = vld [vmem:[#allocation2 + $0x200] ss:$16 sps:$4 sm:$0xff]  }
  0x1d   :  { %1702 = vmatprep.subr.bf16.mxu1 %v3041_v17  ;;  %v3063_v32 = vld [vmem:[#allocation2 + $0x1e4] ss:$16 sps:$4 sm:$0xff]   ;;  %v3067_v34 = vld [vmem:[#allocation2 + $0x1e0] ss:$16 sps:$4 sm:$0xff]  }
  0x1e   :  { %v3065_v33 = vld [vmem:[#allocation2 + $0x3e4] ss:$16 sps:$4 sm:$0xff]   ;;  %v3068_v35 = vld [vmem:[#allocation2 + $0x3e0] ss:$16 sps:$4 sm:$0xff]  }
  0x1f   :  { %1662 = vmatpush1.bf16.msra.mxu0 %v3043_v18  ;;  %v3069_v39 = vld [vmem:[#allocation2 + $0x1c4] ss:$16 sps:$4 sm:$0xff]   ;;  %v3073_v41 = vld [vmem:[#allocation2 + $0x1c0] ss:$16 sps:$4 sm:$0xff]  }
  0x20   :  { %1703 = vmatpush1.bf16.msra.mxu1 %v3044_v19  ;;  %1663 = vmatprep.subr.bf16.mxu0 %v3045_v20  ;;  %v3071_v40 = vld [vmem:[#allocation2 + $0x3c4] ss:$16 sps:$4 sm:$0xff]   ;;  %v3074_v44 = vld [vmem:[#allocation2 + $0x3c0] ss:$16 sps:$4 sm:$0xff]  }
  0x21   :  { %1704 = vmatprep.subr.bf16.mxu1 %v3047_v21  ;;  %v3075_v45 = vld [vmem:[#allocation2 + $0x1a4] ss:$16 sps:$4 sm:$0xff]   ;;  %v3079_v47 = vld [vmem:[#allocation2 + $0x1a0] ss:$16 sps:$4 sm:$0xff]  }
  0x22   :  { %v3077_v46 = vld [vmem:[#allocation2 + $0x3a4] ss:$16 sps:$4 sm:$0xff]   ;;  %v3080_v48 = vld [vmem:[#allocation2 + $0x3a0] ss:$16 sps:$4 sm:$0xff]  }
  0x23   :  { %1664 = vmatpush1.bf16.msra.mxu0 %v3049_v22  ;;  %v3081_v50 = vld [vmem:[#allocation2 + $0x184] ss:$16 sps:$4 sm:$0xff]   ;;  %v3085_v53 = vld [vmem:[#allocation2 + $0x180] ss:$16 sps:$4 sm:$0xff]  }
  0x24   :  { %1705 = vmatpush1.bf16.msra.mxu1 %v3050_v23  ;;  %1665 = vmatprep.subr.bf16.mxu0 %v3051_v24  ;;  %v3083_v51 = vld [vmem:[#allocation2 + $0x384] ss:$16 sps:$4 sm:$0xff]   ;;  %v3086_v56 = vld [vmem:[#allocation2 + $0x380] ss:$16 sps:$4 sm:$0xff]  }
  0x25   :  { %1706 = vmatprep.subr.bf16.mxu1 %v3053_v25  ;;  %v41_v52 = vld [vmem:[%s3923_s0] sm:$0xff] }
  0x26   :  { %v309_v54 = vrot.slane %v41_v52, %v3585_v49  ;;  %v302_v55 = vcombine.high %v41_v52, %v41_v52  ;;  %v3087_v57 = vld [vmem:[#allocation2 + $0x164] ss:$16 sps:$4 sm:$0xff]   ;;  %v3091_v61 = vld [vmem:[#allocation2 + $0x160] ss:$16 sps:$4 sm:$0xff]  }
  0x27   :  { %1666 = vmatpush1.bf16.msra.mxu0 %v3055_v26  ;;  %v3089_v58 = vld [vmem:[#allocation2 + $0x364] ss:$16 sps:$4 sm:$0xff]   ;;  %v3092_v0 = vld [vmem:[#allocation2 + $0x360] ss:$16 sps:$4 sm:$0xff]  }
  0x28   :  { %1707 = vmatpush1.bf16.msra.mxu1 %v3056_v27  ;;  %1667 = vmatprep.subr.bf16.mxu0 %v3057_v28  ;;  %v317_v59 = vcombine.high %v309_v54, %v309_v54  ;;  %v316_v60 = vrot.slane %v302_v55, %v3585_v49  ;;  %v3093_v1 = vld [vmem:[#allocation2 + $0x144] ss:$16 sps:$4 sm:$0xff]   ;;  %v3097_v4 = vld [vmem:[#allocation2 + $0x140] ss:$16 sps:$4 sm:$0xff]   ;;  %v3598_v16 = vpack.c.bf16 %v309_v54, %v309_v54 }
  0x29   :  { %1708 = vmatprep.subr.bf16.mxu1 %v3059_v29  ;;  %v3095_v2 = vld [vmem:[#allocation2 + $0x344] ss:$16 sps:$4 sm:$0xff]   ;;  %v3098_v5 = vld [vmem:[#allocation2 + $0x340] ss:$16 sps:$4 sm:$0xff]  }
  0x2a   :  { %v3592_v62 = vpack.c.bf16 %v317_v59, %v317_v59  ;;  %v318_v63 = vcombine.high %v316_v60, %v316_v60  ;;  %v3099_v6 = vld [vmem:[#allocation2 + $0x124] ss:$16 sps:$4 sm:$0xff]   ;;  %v3103_v8 = vld [vmem:[#allocation2 + $0x120] ss:$16 sps:$4 sm:$0xff]   ;;  %v3600_v17 = vpack.c.bf16 %v316_v60, %v316_v60 }
  0x2b   :  { %1668 = vmatpush1.bf16.msra.mxu0 %v3061_v30  ;;  %v3101_v7 = vld [vmem:[#allocation2 + $0x324] ss:$16 sps:$4 sm:$0xff]   ;;  %v3104_v9 = vld [vmem:[#allocation2 + $0x320] ss:$16 sps:$4 sm:$0xff]  }
  0x2c   :  { %1709 = vmatpush1.bf16.msra.mxu1 %v3062_v31  ;;  %1669 = vmatprep.subr.bf16.mxu0 %v3063_v32  ;;  %v3594_v3 = vpack.c.bf16 %v318_v63, %v318_v63  ;;  %v3105_v10 = vld [vmem:[#allocation2 + $0x104] ss:$16 sps:$4 sm:$0xff]   ;;  %v3109_v12 = vld [vmem:[#allocation2 + $0x100] ss:$16 sps:$4 sm:$0xff]  }
  0x2d   :  { %1710 = vmatprep.subr.bf16.mxu1 %v3065_v33  ;;  %1685 = vmatprep.mubr.bf16.mxu0 %v3592_v62  ;;  %v3107_v11 = vld [vmem:[#allocation2 + $0x304] ss:$16 sps:$4 sm:$0xff]   ;;  %v3110_v13 = vld [vmem:[#allocation2 + $0x300] ss:$16 sps:$4 sm:$0xff]  }
  0x2e   :  { %1726 = vmatprep.mubr.bf16.mxu1 %v3594_v3  ;;  %v3114_v14 = vld [vmem:[#allocation2 + $0x4e4] ss:$16 sps:$4 sm:$0xff]   ;;  %v3112_v18 = vld [vmem:[#allocation2 + $0x4e0] ss:$16 sps:$4 sm:$0xff]  }
  0x2f   :  { %1670 = vmatpush2.bf16.msra.mxu0 %v3067_v34  ;;  %v3117_v15 = vld [vmem:[#allocation2 + $0x6e4] ss:$16 sps:$4 sm:$0xff]   ;;  %v3115_v19 = vld [vmem:[#allocation2 + $0x6e0] ss:$16 sps:$4 sm:$0xff]  }
  0x30   :  { %1711 = vmatpush2.bf16.msra.mxu1 %v3068_v35  ;;  %1671 = vmatprep.subr.bf16.mxu0 %v3069_v39  ;;  %v3120_v20 = vld [vmem:[#allocation2 + $0x4c4] ss:$16 sps:$4 sm:$0xff]   ;;  %v3118_v22 = vld [vmem:[#allocation2 + $0x4c0] ss:$16 sps:$4 sm:$0xff]  }
  0x31   :  { %1712 = vmatprep.subr.bf16.mxu1 %v3071_v40  ;;  %v3123_v21 = vld [vmem:[#allocation2 + $0x6c4] ss:$16 sps:$4 sm:$0xff]   ;;  %v3121_v23 = vld [vmem:[#allocation2 + $0x6c0] ss:$16 sps:$4 sm:$0xff]  }
  0x32   :  { %v3126_v24 = vld [vmem:[#allocation2 + $0x4a4] ss:$16 sps:$4 sm:$0xff]   ;;  %v3124_v26 = vld [vmem:[#allocation2 + $0x4a0] ss:$16 sps:$4 sm:$0xff]  }
  0x33   :  { %1672 = vmatpush2.bf16.msra.mxu0 %v3073_v41  ;;  %v3129_v25 = vld [vmem:[#allocation2 + $0x6a4] ss:$16 sps:$4 sm:$0xff]   ;;  %v3127_v27 = vld [vmem:[#allocation2 + $0x6a0] ss:$16 sps:$4 sm:$0xff]  }
  0x34   :  { %1713 = vmatpush2.bf16.msra.mxu1 %v3074_v44  ;;  %1673 = vmatprep.subr.bf16.mxu0 %v3075_v45  ;;  %v3132_v28 = vld [vmem:[#allocation2 + $0x484] ss:$16 sps:$4 sm:$0xff]   ;;  %v3130_v30 = vld [vmem:[#allocation2 + $0x480] ss:$16 sps:$4 sm:$0xff]   ;;  %v3608_v44 = vrot.slane %v42_v42, %v3585_v49  ;;  %v319_v45 = vcombine.high %v42_v42, %v42_v42  ;;  %v3224_v42 = vld [vmem:[#allocation2 + $0x2a8] ss:$16 sps:$4 sm:$0xff]  }
  0x35   :  { %1714 = vmatprep.subr.bf16.mxu1 %v3077_v46  ;;  %v3135_v29 = vld [vmem:[#allocation2 + $0x684] ss:$16 sps:$4 sm:$0xff]   ;;  %v3133_v31 = vld [vmem:[#allocation2 + $0x680] ss:$16 sps:$4 sm:$0xff]  }
  0x36   :  { %v3138_v32 = vld [vmem:[#allocation2 + $0x464] ss:$16 sps:$4 sm:$0xff]   ;;  %v3136_v34 = vld [vmem:[#allocation2 + $0x460] ss:$16 sps:$4 sm:$0xff]  }
  0x37   :  { %1674 = vmatpush2.bf16.msra.mxu0 %v3079_v47  ;;  %v3141_v33 = vld [vmem:[#allocation2 + $0x664] ss:$16 sps:$4 sm:$0xff]   ;;  %v3139_v35 = vld [vmem:[#allocation2 + $0x660] ss:$16 sps:$4 sm:$0xff]  }
  0x38   :  { %1715 = vmatpush2.bf16.msra.mxu1 %v3080_v48  ;;  %1675 = vmatprep.subr.bf16.mxu0 %v3081_v50  ;;  %v3144_v36 = vld [vmem:[#allocation2 + $0x444] ss:$16 sps:$4 sm:$0xff]   ;;  %v3142_v38 = vld [vmem:[#allocation2 + $0x440] ss:$16 sps:$4 sm:$0xff]   ;;  %v334_v48 = vcombine.high %v3608_v44, %v3608_v44  ;;  %v3613_v50 = vrot.slane %v319_v45, %v3585_v49  ;;  %v3232_v45 = vld [vmem:[#allocation2 + $0x28c] ss:$16 sps:$4 sm:$0xff]  }
  0x39   :  { %1716 = vmatprep.subr.bf16.mxu1 %v3083_v51  ;;  %v3147_v37 = vld [vmem:[#allocation2 + $0x644] ss:$16 sps:$4 sm:$0xff]   ;;  %v3145_v39 = vld [vmem:[#allocation2 + $0x640] ss:$16 sps:$4 sm:$0xff]  }
  0x3a   :  { %v3150_v40 = vld [vmem:[#allocation2 + $0x424] ss:$16 sps:$4 sm:$0xff]   ;;  %v3148_v46 = vld [vmem:[#allocation2 + $0x420] ss:$16 sps:$4 sm:$0xff]   ;;  %v335_v54 = vcombine.high %v3613_v50, %v3613_v50 }
  0x3b   :  { %1676 = vmatpush2.bf16.msra.mxu0 %v3085_v53  ;;  %v3153_v41 = vld [vmem:[#allocation2 + $0x624] ss:$16 sps:$4 sm:$0xff]   ;;  %v3151_v47 = vld [vmem:[#allocation2 + $0x620] ss:$16 sps:$4 sm:$0xff]   ;;  %v3615_v53 = vpack.c.bf16 %v334_v48, %v334_v48  ;;  %v3235_v48 = vld [vmem:[#allocation2 + $0x6c] ss:$16 sps:$4 sm:$0xff]  }
  0x3c   :  { %1717 = vmatpush2.bf16.msra.mxu1 %v3086_v56  ;;  %1677 = vmatprep.subr.bf16.mxu0 %v3087_v57  ;;  %v3156_v51 = vld [vmem:[#allocation2 + $0x404] ss:$16 sps:$4 sm:$0xff]   ;;  %v3154_v55 = vld [vmem:[#allocation2 + $0x400] ss:$16 sps:$4 sm:$0xff]   ;;  %v3619_v57 = vpack.c.bf16 %v335_v54, %v335_v54  ;;  %v3239_v54 = vld [vmem:[#allocation2 + $0x48] ss:$16 sps:$4 sm:$0xff]  }
  0x3d   :  { %1718 = vmatprep.subr.bf16.mxu1 %v3089_v58  ;;  %v3159_v52 = vld [vmem:[#allocation2 + $0x604] ss:$16 sps:$4 sm:$0xff]   ;;  %v3157_v56 = vld [vmem:[#allocation2 + $0x600] ss:$16 sps:$4 sm:$0xff]  }
  0x3e   :  { %v3162_v58 = vld [vmem:[#allocation2 + $0x5e4] ss:$16 sps:$4 sm:$0xff]   ;;  %v3160_v59 = vld [vmem:[#allocation2 + $0x5e0] ss:$16 sps:$4 sm:$0xff]  }
  0x3f   :  { %1678 = vmatpush2.bf16.msra.mxu0 %v3091_v61  ;;  %v3165_v49 = vld [vmem:[#allocation2 + $0x7e4] ss:$16 sps:$4 sm:$0xff]   ;;  %v3163_v60 = vld [vmem:[#allocation2 + $0x7e0] ss:$16 sps:$4 sm:$0xff]  }
  0x40   :  { %1719 = vmatpush2.bf16.msra.mxu1 %v3092_v0  ;;  %1679 = vmatprep.subr.bf16.mxu0 %v3093_v1  ;;  %v3168_v61 = vld [vmem:[#allocation2 + $0x5c4] ss:$16 sps:$4 sm:$0xff]   ;;  %v3166_v0 = vld [vmem:[#allocation2 + $0x5c0] ss:$16 sps:$4 sm:$0xff]  }
  0x41   :  { %1720 = vmatprep.subr.bf16.mxu1 %v3095_v2  ;;  %v3171_v63 = vld [vmem:[#allocation2 + $0x7c4] ss:$16 sps:$4 sm:$0xff]   ;;  %v3169_v1 = vld [vmem:[#allocation2 + $0x7c0] ss:$16 sps:$4 sm:$0xff]  }
  0x42   :  { %v3174_v2 = vld [vmem:[#allocation2 + $0x5a4] ss:$16 sps:$4 sm:$0xff]  }
  0x43   :  { %1680 = vmatpush2.bf16.msra.mxu0 %v3097_v4  ;;  %v3177_v4 = vld [vmem:[#allocation2 + $0x7a4] ss:$16 sps:$4 sm:$0xff]  }
  0x44   :  { %1721 = vmatpush2.bf16.msra.mxu1 %v3098_v5  ;;  %1681 = vmatprep.subr.bf16.mxu0 %v3099_v6  ;;  %v3172_v5 = vld [vmem:[#allocation2 + $0x5a0] ss:$16 sps:$4 sm:$0xff]  }
  0x45   :  { %1722 = vmatprep.subr.bf16.mxu1 %v3101_v7  ;;  %v3175_v6 = vld [vmem:[#allocation2 + $0x7a0] ss:$16 sps:$4 sm:$0xff]   ;;  %v3180_v7 = vld [vmem:[#allocation2 + $0x584] ss:$16 sps:$4 sm:$0xff]  }
  0x47   :  { %1682 = vmatpush2.bf16.msra.mxu0 %v3103_v8  ;;  %v3183_v8 = vld [vmem:[#allocation2 + $0x784] ss:$16 sps:$4 sm:$0xff]  }
  0x48   :  { %1723 = vmatpush2.bf16.msra.mxu1 %v3104_v9  ;;  %1683 = vmatprep.subr.bf16.mxu0 %v3105_v10  ;;  %v3178_v9 = vld [vmem:[#allocation2 + $0x580] ss:$16 sps:$4 sm:$0xff]  }
  0x49   :  { %1724 = vmatprep.subr.bf16.mxu1 %v3107_v11  ;;  %v3181_v10 = vld [vmem:[#allocation2 + $0x780] ss:$16 sps:$4 sm:$0xff]   ;;  %v3186_v11 = vld [vmem:[#allocation2 + $0x564] ss:$16 sps:$4 sm:$0xff]  }
  0x4b   :  { %1684 = vmatpush2.bf16.msra.mxu0 %v3109_v12  ;;  %v3189_v12 = vld [vmem:[#allocation2 + $0x764] ss:$16 sps:$4 sm:$0xff]  }
  0x4c   :  { %1725 = vmatpush2.bf16.msra.mxu1 %v3110_v13  ;;  %1735 = vmatprep.subr.bf16.mxu0 %v3114_v14  ;;  %v3184_v13 = vld [vmem:[#allocation2 + $0x560] ss:$16 sps:$4 sm:$0xff]  }
  0x4d   :  { %1776 = vmatprep.subr.bf16.mxu1 %v3117_v15  ;;  %v3187_v14 = vld [vmem:[#allocation2 + $0x760] ss:$16 sps:$4 sm:$0xff]   ;;  %v3192_v15 = vld [vmem:[#allocation2 + $0x544] ss:$16 sps:$4 sm:$0xff]  }
  0x4e   :  { %1686 = vmatmul.mubr.bf16.vlgmr.msra.gmra.mxu0 %v3598_v16 }
  0x4f   :  { %1727 = vmatmul.mubr.bf16.vlgmr.msra.gmra.mxu1 %v3600_v17  ;;  %1736 = vmatpush1.bf16.msra.mxu0 %v3112_v18  ;;  %v3195_v18 = vld [vmem:[#allocation2 + $0x744] ss:$16 sps:$4 sm:$0xff]  }
  0x50   :  { %1777 = vmatpush1.bf16.msra.mxu1 %v3115_v19  ;;  %1737 = vmatprep.subr.bf16.mxu0 %v3120_v20  ;;  %v3190_v19 = vld [vmem:[#allocation2 + $0x540] ss:$16 sps:$4 sm:$0xff]  }
  0x51   :  { %1778 = vmatprep.subr.bf16.mxu1 %v3123_v21  ;;  %1767 = vmatprep.mubr.bf16.mxu0 %v3615_v53  ;;  %v3193_v20 = vld [vmem:[#allocation2 + $0x740] ss:$16 sps:$4 sm:$0xff]   ;;  %v3198_v21 = vld [vmem:[#allocation2 + $0x524] ss:$16 sps:$4 sm:$0xff]  }
  0x52   :  { %1808 = vmatprep.mubr.bf16.mxu1 %v3619_v57 }
  0x53   :  { %1738 = vmatpush1.bf16.msra.mxu0 %v3118_v22  ;;  %v3201_v22 = vld [vmem:[#allocation2 + $0x724] ss:$16 sps:$4 sm:$0xff]  }
  0x54   :  { %1779 = vmatpush1.bf16.msra.mxu1 %v3121_v23  ;;  %1739 = vmatprep.subr.bf16.mxu0 %v3126_v24  ;;  %v3196_v23 = vld [vmem:[#allocation2 + $0x520] ss:$16 sps:$4 sm:$0xff]  }
  0x55   :  { %1780 = vmatprep.subr.bf16.mxu1 %v3129_v25  ;;  %v3199_v24 = vld [vmem:[#allocation2 + $0x720] ss:$16 sps:$4 sm:$0xff]   ;;  %v3204_v25 = vld [vmem:[#allocation2 + $0x504] ss:$16 sps:$4 sm:$0xff]  }
  0x57   :  { %1740 = vmatpush1.bf16.msra.mxu0 %v3124_v26  ;;  %v3207_v26 = vld [vmem:[#allocation2 + $0x704] ss:$16 sps:$4 sm:$0xff]  }
  0x58   :  { %1781 = vmatpush1.bf16.msra.mxu1 %v3127_v27  ;;  %1741 = vmatprep.subr.bf16.mxu0 %v3132_v28  ;;  %v3202_v27 = vld [vmem:[#allocation2 + $0x500] ss:$16 sps:$4 sm:$0xff]  }
  0x59   :  { %1782 = vmatprep.subr.bf16.mxu1 %v3135_v29  ;;  %v3205_v28 = vld [vmem:[#allocation2 + $0x700] ss:$16 sps:$4 sm:$0xff]   ;;  %v3211_v29 = vld [vmem:[#allocation2 + $0xec] ss:$16 sps:$4 sm:$0xff]  }
  0x5b   :  { %1742 = vmatpush1.bf16.msra.mxu0 %v3130_v30  ;;  %v3214_v30 = vld [vmem:[#allocation2 + $0x2ec] ss:$16 sps:$4 sm:$0xff]  }
  0x5c   :  { %1783 = vmatpush1.bf16.msra.mxu1 %v3133_v31  ;;  %1743 = vmatprep.subr.bf16.mxu0 %v3138_v32  ;;  %v3625_v31 = vpack.c.bf16 %v3608_v44, %v3608_v44  ;;  %v3629_v32 = vpack.c.bf16 %v3613_v50, %v3613_v50  ;;  %v3229_v44 = vld [vmem:[#allocation2 + $0x8c] ss:$16 sps:$4 sm:$0xff]  }
  0x5d   :  { %1784 = vmatprep.subr.bf16.mxu1 %v3141_v33  ;;  %v3209_v33 = vld [vmem:[#allocation2 + $0xe8] ss:$16 sps:$4 sm:$0xff]   ;;  %v3238_v50 = vld [vmem:[#allocation2 + $0x26c] ss:$16 sps:$4 sm:$0xff]  }
  0x5f   :  { %1744 = vmatpush1.bf16.msra.mxu0 %v3136_v34  ;;  %v3212_v34 = vld [vmem:[#allocation2 + $0x2e8] ss:$16 sps:$4 sm:$0xff]  }
  0x60   :  { %1785 = vmatpush1.bf16.msra.mxu1 %v3139_v35  ;;  %1745 = vmatprep.subr.bf16.mxu0 %v3144_v36  ;;  %v3217_v35 = vld [vmem:[#allocation2 + $0xcc] ss:$16 sps:$4 sm:$0xff]  }
  0x61   :  { %1786 = vmatprep.subr.bf16.mxu1 %v3147_v37  ;;  %v3220_v36 = vld [vmem:[#allocation2 + $0x2cc] ss:$16 sps:$4 sm:$0xff]   ;;  %v3215_v37 = vld [vmem:[#allocation2 + $0xc8] ss:$16 sps:$4 sm:$0xff]  }
  0x63   :  { %1746 = vmatpush1.bf16.msra.mxu0 %v3142_v38  ;;  %v3218_v38 = vld [vmem:[#allocation2 + $0x2c8] ss:$16 sps:$4 sm:$0xff]  }
  0x64   :  { %1787 = vmatpush1.bf16.msra.mxu1 %v3145_v39  ;;  %1747 = vmatprep.subr.bf16.mxu0 %v3150_v40  ;;  %v3223_v39 = vld [vmem:[#allocation2 + $0xac] ss:$16 sps:$4 sm:$0xff]  }
  0x65   :  { %1788 = vmatprep.subr.bf16.mxu1 %v3153_v41  ;;  %v3226_v40 = vld [vmem:[#allocation2 + $0x2ac] ss:$16 sps:$4 sm:$0xff]   ;;  %v3221_v41 = vld [vmem:[#allocation2 + $0xa8] ss:$16 sps:$4 sm:$0xff]  }
  0x67   :  { %1748 = vmatpush1.bf16.msra.mxu0 %v3148_v46  ;;  %v3227_v46 = vld [vmem:[#allocation2 + $0x88] ss:$16 sps:$4 sm:$0xff]  }
  0x68   :  { %1789 = vmatpush1.bf16.msra.mxu1 %v3151_v47  ;;  %1749 = vmatprep.subr.bf16.mxu0 %v3156_v51  ;;  %v3230_v47 = vld [vmem:[#allocation2 + $0x288] ss:$16 sps:$4 sm:$0xff]   ;;  %v3241_v51 = vld [vmem:[#allocation2 + $0x4c] ss:$16 sps:$4 sm:$0xff]  }
  0x69   :  { %1790 = vmatprep.subr.bf16.mxu1 %v3159_v52  ;;  %v3244_v52 = vld [vmem:[#allocation2 + $0x24c] ss:$16 sps:$4 sm:$0xff]  }
  0x6b   :  { %1750 = vmatpush1.bf16.msra.mxu0 %v3154_v55  ;;  %v3242_v55 = vld [vmem:[#allocation2 + $0x248] ss:$16 sps:$4 sm:$0xff]  }
  0x6c   :  { %1791 = vmatpush1.bf16.msra.mxu1 %v3157_v56  ;;  %1751 = vmatprep.subr.bf16.mxu0 %v3162_v58  ;;  %v3247_v56 = vld [vmem:[#allocation2 + $0x2c] ss:$16 sps:$4 sm:$0xff]  }
  0x6d   :  { %1792 = vmatprep.subr.bf16.mxu1 %v3165_v49  ;;  %v3250_v58 = vld [vmem:[#allocation2 + $0x22c] ss:$16 sps:$4 sm:$0xff]   ;;  %v3245_v49 = vld [vmem:[#allocation2 + $0x28] ss:$16 sps:$4 sm:$0xff]  }
  0x6f   :  { %1752 = vmatpush2.bf16.msra.mxu0 %v3160_v59  ;;  %v3248_v59 = vld [vmem:[#allocation2 + $0x228] ss:$16 sps:$4 sm:$0xff]  }
  0x70   :  { %1793 = vmatpush2.bf16.msra.mxu1 %v3163_v60  ;;  %1753 = vmatprep.subr.bf16.mxu0 %v3168_v61  ;;  %v3253_v60 = vld [vmem:[#allocation2 + $0xc] ss:$16 sps:$4 sm:$0xff]  }
  0x71   :  { %1794 = vmatprep.subr.bf16.mxu1 %v3171_v63  ;;  %v3256_v61 = vld [vmem:[#allocation2 + $0x20c] ss:$16 sps:$4 sm:$0xff]   ;;  %v3251_v63 = vld [vmem:[#allocation2 + $0x8] ss:$16 sps:$4 sm:$0xff]  }
  0x73   :  { %1754 = vmatpush2.bf16.msra.mxu0 %v3166_v0  ;;  %v3254_v0 = vld [vmem:[#allocation2 + $0x208] ss:$16 sps:$4 sm:$0xff]  }
  0x74   :  { %1795 = vmatpush2.bf16.msra.mxu1 %v3169_v1  ;;  %1755 = vmatprep.subr.bf16.mxu0 %v3174_v2  ;;  %v3259_v1 = vld [vmem:[#allocation2 + $0x1ec] ss:$16 sps:$4 sm:$0xff]  }
  0x75   :  { %1796 = vmatprep.subr.bf16.mxu1 %v3177_v4  ;;  %v3262_v2 = vld [vmem:[#allocation2 + $0x3ec] ss:$16 sps:$4 sm:$0xff]   ;;  %v3257_v4 = vld [vmem:[#allocation2 + $0x1e8] ss:$16 sps:$4 sm:$0xff]  }
  0x77   :  { %1756 = vmatpush2.bf16.msra.mxu0 %v3172_v5  ;;  %v3260_v5 = vld [vmem:[#allocation2 + $0x3e8] ss:$16 sps:$4 sm:$0xff]  }
  0x78   :  { %1797 = vmatpush2.bf16.msra.mxu1 %v3175_v6  ;;  %1757 = vmatprep.subr.bf16.mxu0 %v3180_v7  ;;  %v3265_v6 = vld [vmem:[#allocation2 + $0x1cc] ss:$16 sps:$4 sm:$0xff]  }
  0x79   :  { %1798 = vmatprep.subr.bf16.mxu1 %v3183_v8  ;;  %v3268_v7 = vld [vmem:[#allocation2 + $0x3cc] ss:$16 sps:$4 sm:$0xff]   ;;  %v3263_v8 = vld [vmem:[#allocation2 + $0x1c8] ss:$16 sps:$4 sm:$0xff]  }
  0x7b   :  { %1758 = vmatpush2.bf16.msra.mxu0 %v3178_v9  ;;  %v3266_v9 = vld [vmem:[#allocation2 + $0x3c8] ss:$16 sps:$4 sm:$0xff]  }
  0x7c   :  { %1799 = vmatpush2.bf16.msra.mxu1 %v3181_v10  ;;  %1759 = vmatprep.subr.bf16.mxu0 %v3186_v11  ;;  %v3271_v10 = vld [vmem:[#allocation2 + $0x1ac] ss:$16 sps:$4 sm:$0xff]  }
  0x7d   :  { %1800 = vmatprep.subr.bf16.mxu1 %v3189_v12  ;;  %v3274_v11 = vld [vmem:[#allocation2 + $0x3ac] ss:$16 sps:$4 sm:$0xff]   ;;  %v3269_v12 = vld [vmem:[#allocation2 + $0x1a8] ss:$16 sps:$4 sm:$0xff]  }
  0x7f   :  { %1760 = vmatpush2.bf16.msra.mxu0 %v3184_v13  ;;  %v3272_v13 = vld [vmem:[#allocation2 + $0x3a8] ss:$16 sps:$4 sm:$0xff]  }
  0x80   :  { %1801 = vmatpush2.bf16.msra.mxu1 %v3187_v14  ;;  %1761 = vmatprep.subr.bf16.mxu0 %v3192_v15  ;;  %v3277_v14 = vld [vmem:[#allocation2 + $0x18c] ss:$16 sps:$4 sm:$0xff]  }
  0x81   :  { %1802 = vmatprep.subr.bf16.mxu1 %v3195_v18  ;;  %v3280_v15 = vld [vmem:[#allocation2 + $0x38c] ss:$16 sps:$4 sm:$0xff]   ;;  %v3275_v18 = vld [vmem:[#allocation2 + $0x188] ss:$16 sps:$4 sm:$0xff]  }
  0x83   :  { %1762 = vmatpush2.bf16.msra.mxu0 %v3190_v19  ;;  %v3278_v19 = vld [vmem:[#allocation2 + $0x388] ss:$16 sps:$4 sm:$0xff]  }
  0x84   :  { %1803 = vmatpush2.bf16.msra.mxu1 %v3193_v20  ;;  %1763 = vmatprep.subr.bf16.mxu0 %v3198_v21  ;;  %v3283_v20 = vld [vmem:[#allocation2 + $0x16c] ss:$16 sps:$4 sm:$0xff]  }
  0x85   :  { %1804 = vmatprep.subr.bf16.mxu1 %v3201_v22  ;;  %v3286_v21 = vld [vmem:[#allocation2 + $0x36c] ss:$16 sps:$4 sm:$0xff]   ;;  %v3281_v22 = vld [vmem:[#allocation2 + $0x168] ss:$16 sps:$4 sm:$0xff]  }
  0x87   :  { %1764 = vmatpush2.bf16.msra.mxu0 %v3196_v23  ;;  %v3284_v23 = vld [vmem:[#allocation2 + $0x368] ss:$16 sps:$4 sm:$0xff]  }
  0x88   :  { %1805 = vmatpush2.bf16.msra.mxu1 %v3199_v24  ;;  %1765 = vmatprep.subr.bf16.mxu0 %v3204_v25  ;;  %v3289_v24 = vld [vmem:[#allocation2 + $0x14c] ss:$16 sps:$4 sm:$0xff]  }
  0x89   :  { %1806 = vmatprep.subr.bf16.mxu1 %v3207_v26  ;;  %v3292_v25 = vld [vmem:[#allocation2 + $0x34c] ss:$16 sps:$4 sm:$0xff]   ;;  %v3287_v26 = vld [vmem:[#allocation2 + $0x148] ss:$16 sps:$4 sm:$0xff]  }
  0x8b   :  { %1766 = vmatpush2.bf16.msra.mxu0 %v3202_v27  ;;  %v3290_v27 = vld [vmem:[#allocation2 + $0x348] ss:$16 sps:$4 sm:$0xff]  }
  0x8c   :  { %1807 = vmatpush2.bf16.msra.mxu1 %v3205_v28  ;;  %1817 = vmatprep.subr.bf16.mxu0 %v3211_v29  ;;  %v3295_v28 = vld [vmem:[#allocation2 + $0x12c] ss:$16 sps:$4 sm:$0xff]  }
  0x8d   :  { %1858 = vmatprep.subr.bf16.mxu1 %v3214_v30  ;;  %v3298_v29 = vld [vmem:[#allocation2 + $0x32c] ss:$16 sps:$4 sm:$0xff]   ;;  %v3293_v30 = vld [vmem:[#allocation2 + $0x128] ss:$16 sps:$4 sm:$0xff]  }
  0x8e   :  { %1768 = vmatmul.mubr.bf16.vlgmr.msra.gmra.mxu0 %v3625_v31 }
  0x8f   :  { %1809 = vmatmul.mubr.bf16.vlgmr.msra.gmra.mxu1 %v3629_v32  ;;  %1818 = vmatpush1.bf16.msra.mxu0 %v3209_v33  ;;  %v3296_v33 = vld [vmem:[#allocation2 + $0x328] ss:$16 sps:$4 sm:$0xff]  }
  0x90   :  { %1859 = vmatpush1.bf16.msra.mxu1 %v3212_v34  ;;  %1819 = vmatprep.subr.bf16.mxu0 %v3217_v35  ;;  %v3301_v34 = vld [vmem:[#allocation2 + $0x10c] ss:$16 sps:$4 sm:$0xff]  }
  0x91   :  { %1860 = vmatprep.subr.bf16.mxu1 %v3220_v36  ;;  %1849 = vmatprep.mubr.bf16.mxu0 %v3592_v62  ;;  %v3233_v62 = vld [vmem:[#allocation2 + $0x68] ss:$16 sps:$4 sm:$0xff]   ;;  %v3304_v35 = vld [vmem:[#allocation2 + $0x30c] ss:$16 sps:$4 sm:$0xff]  }
  0x92   :  { %1890 = vmatprep.mubr.bf16.mxu1 %v3594_v3  ;;  %v3236_v3 = vld [vmem:[#allocation2 + $0x268] ss:$16 sps:$4 sm:$0xff]  }
  0x93   :  { %1820 = vmatpush1.bf16.msra.mxu0 %v3215_v37  ;;  %v3299_v36 = vld [vmem:[#allocation2 + $0x108] ss:$16 sps:$4 sm:$0xff]  }
  0x94   :  { %1861 = vmatpush1.bf16.msra.mxu1 %v3218_v38  ;;  %1821 = vmatprep.subr.bf16.mxu0 %v3223_v39  ;;  %v3302_v37 = vld [vmem:[#allocation2 + $0x308] ss:$16 sps:$4 sm:$0xff]   ;;  %v3307_v38 = vld [vmem:[#allocation2 + $0x4ec] ss:$16 sps:$4 sm:$0xff]  }
  0x95   :  { %1862 = vmatprep.subr.bf16.mxu1 %v3226_v40  ;;  %v3310_v39 = vld [vmem:[#allocation2 + $0x6ec] ss:$16 sps:$4 sm:$0xff]   ;;  %v3305_v40 = vld [vmem:[#allocation2 + $0x4e8] ss:$16 sps:$4 sm:$0xff]  }
  0x97   :  { %1822 = vmatpush1.bf16.msra.mxu0 %v3221_v41  ;;  %v3308_v41 = vld [vmem:[#allocation2 + $0x6e8] ss:$16 sps:$4 sm:$0xff]  }
  0x98   :  { %1863 = vmatpush1.bf16.msra.mxu1 %v3224_v42  ;;  %1823 = vmatprep.subr.bf16.mxu0 %v3229_v44  ;;  %v3313_v42 = vld [vmem:[#allocation2 + $0x4cc] ss:$16 sps:$4 sm:$0xff]  }
  0x99   :  { %1864 = vmatprep.subr.bf16.mxu1 %v3232_v45  ;;  %v3316_v44 = vld [vmem:[#allocation2 + $0x6cc] ss:$16 sps:$4 sm:$0xff]   ;;  %v3311_v45 = vld [vmem:[#allocation2 + $0x4c8] ss:$16 sps:$4 sm:$0xff]  }
  0x9b   :  { %1824 = vmatpush1.bf16.msra.mxu0 %v3227_v46  ;;  %v3314_v46 = vld [vmem:[#allocation2 + $0x6c8] ss:$16 sps:$4 sm:$0xff]  }
  0x9c   :  { %1865 = vmatpush1.bf16.msra.mxu1 %v3230_v47  ;;  %1825 = vmatprep.subr.bf16.mxu0 %v3235_v48  ;;  %v3319_v47 = vld [vmem:[#allocation2 + $0x4ac] ss:$16 sps:$4 sm:$0xff]  }
  0x9d   :  { %1866 = vmatprep.subr.bf16.mxu1 %v3238_v50  ;;  %v3322_v48 = vld [vmem:[#allocation2 + $0x6ac] ss:$16 sps:$4 sm:$0xff]   ;;  %v3317_v50 = vld [vmem:[#allocation2 + $0x4a8] ss:$16 sps:$4 sm:$0xff]  }
  0x9f   :  { %1826 = vmatpush1.bf16.msra.mxu0 %v3233_v62  ;;  %v3320_v62 = vld [vmem:[#allocation2 + $0x6a8] ss:$16 sps:$4 sm:$0xff]  }
  0xa0   :  { %1867 = vmatpush1.bf16.msra.mxu1 %v3236_v3  ;;  %1827 = vmatprep.subr.bf16.mxu0 %v3241_v51  ;;  %v3325_v3 = vld [vmem:[#allocation2 + $0x48c] ss:$16 sps:$4 sm:$0xff]   ;;  %v3323_v51 = vld [vmem:[#allocation2 + $0x488] ss:$16 sps:$4 sm:$0xff]  }
  0xa1   :  { %1868 = vmatprep.subr.bf16.mxu1 %v3244_v52  ;;  %v3331_v52 = vld [vmem:[#allocation2 + $0x46c] ss:$16 sps:$4 sm:$0xff]  }
  0xa3   :  { %1828 = vmatpush1.bf16.msra.mxu0 %v3239_v54  ;;  %v3334_v54 = vld [vmem:[#allocation2 + $0x66c] ss:$16 sps:$4 sm:$0xff]  }
  0xa4   :  { %1869 = vmatpush1.bf16.msra.mxu1 %v3242_v55  ;;  %1829 = vmatprep.subr.bf16.mxu0 %v3247_v56  ;;  %v3329_v55 = vld [vmem:[#allocation2 + $0x468] ss:$16 sps:$4 sm:$0xff]  }
  0xa5   :  { %1870 = vmatprep.subr.bf16.mxu1 %v3250_v58  ;;  %v3332_v56 = vld [vmem:[#allocation2 + $0x668] ss:$16 sps:$4 sm:$0xff]   ;;  %v3337_v58 = vld [vmem:[#allocation2 + $0x44c] ss:$16 sps:$4 sm:$0xff]  }
  0xa7   :  { %1830 = vmatpush1.bf16.msra.mxu0 %v3245_v49  ;;  %v3338_v49 = vld [vmem:[#allocation2 + $0x648] ss:$16 sps:$4 sm:$0xff]  }
  0xa8   :  { %1871 = vmatpush1.bf16.msra.mxu1 %v3248_v59  ;;  %1831 = vmatprep.subr.bf16.mxu0 %v3253_v60  ;;  %v3343_v59 = vld [vmem:[#allocation2 + $0x42c] ss:$16 sps:$4 sm:$0xff]  }
  0xa9   :  { %1872 = vmatprep.subr.bf16.mxu1 %v3256_v61  ;;  %v3346_v60 = vld [vmem:[#allocation2 + $0x62c] ss:$16 sps:$4 sm:$0xff]   ;;  %v3341_v61 = vld [vmem:[#allocation2 + $0x428] ss:$16 sps:$4 sm:$0xff]  }
  0xab   :  { %1832 = vmatpush1.bf16.msra.mxu0 %v3251_v63  ;;  %v3344_v63 = vld [vmem:[#allocation2 + $0x628] ss:$16 sps:$4 sm:$0xff]  }
  0xac   :  { %1873 = vmatpush1.bf16.msra.mxu1 %v3254_v0  ;;  %1833 = vmatprep.subr.bf16.mxu0 %v3259_v1  ;;  %v3349_v0 = vld [vmem:[#allocation2 + $0x40c] ss:$16 sps:$4 sm:$0xff]  }
  0xad   :  { %1874 = vmatprep.subr.bf16.mxu1 %v3262_v2  ;;  %v3352_v1 = vld [vmem:[#allocation2 + $0x60c] ss:$16 sps:$4 sm:$0xff]   ;;  %v3347_v2 = vld [vmem:[#allocation2 + $0x408] ss:$16 sps:$4 sm:$0xff]  }
  0xaf   :  { %1834 = vmatpush2.bf16.msra.mxu0 %v3257_v4  ;;  %v3350_v4 = vld [vmem:[#allocation2 + $0x608] ss:$16 sps:$4 sm:$0xff]  }
  0xb0   :  { %1875 = vmatpush2.bf16.msra.mxu1 %v3260_v5  ;;  %1835 = vmatprep.subr.bf16.mxu0 %v3265_v6  ;;  %v3355_v5 = vld [vmem:[#allocation2 + $0x5ec] ss:$16 sps:$4 sm:$0xff]  }
  0xb1   :  { %1876 = vmatprep.subr.bf16.mxu1 %v3268_v7  ;;  %v3358_v6 = vld [vmem:[#allocation2 + $0x7ec] ss:$16 sps:$4 sm:$0xff]   ;;  %v3353_v7 = vld [vmem:[#allocation2 + $0x5e8] ss:$16 sps:$4 sm:$0xff]  }
  0xb3   :  { %1836 = vmatpush2.bf16.msra.mxu0 %v3263_v8  ;;  %v3356_v8 = vld [vmem:[#allocation2 + $0x7e8] ss:$16 sps:$4 sm:$0xff]  }
  0xb4   :  { %1877 = vmatpush2.bf16.msra.mxu1 %v3266_v9  ;;  %1837 = vmatprep.subr.bf16.mxu0 %v3271_v10  ;;  %v3361_v9 = vld [vmem:[#allocation2 + $0x5cc] ss:$16 sps:$4 sm:$0xff]  }
  0xb5   :  { %1878 = vmatprep.subr.bf16.mxu1 %v3274_v11  ;;  %v3364_v10 = vld [vmem:[#allocation2 + $0x7cc] ss:$16 sps:$4 sm:$0xff]   ;;  %v3359_v11 = vld [vmem:[#allocation2 + $0x5c8] ss:$16 sps:$4 sm:$0xff]  }
  0xb7   :  { %1838 = vmatpush2.bf16.msra.mxu0 %v3269_v12  ;;  %v3362_v12 = vld [vmem:[#allocation2 + $0x7c8] ss:$16 sps:$4 sm:$0xff]  }
  0xb8   :  { %1879 = vmatpush2.bf16.msra.mxu1 %v3272_v13  ;;  %1839 = vmatprep.subr.bf16.mxu0 %v3277_v14  ;;  %v3367_v13 = vld [vmem:[#allocation2 + $0x5ac] ss:$16 sps:$4 sm:$0xff]  }
  0xb9   :  { %1880 = vmatprep.subr.bf16.mxu1 %v3280_v15  ;;  %v3370_v14 = vld [vmem:[#allocation2 + $0x7ac] ss:$16 sps:$4 sm:$0xff]   ;;  %v3365_v15 = vld [vmem:[#allocation2 + $0x5a8] ss:$16 sps:$4 sm:$0xff]  }
  0xbb   :  { %1840 = vmatpush2.bf16.msra.mxu0 %v3275_v18  ;;  %v3368_v18 = vld [vmem:[#allocation2 + $0x7a8] ss:$16 sps:$4 sm:$0xff]  }
  0xbc   :  { %1881 = vmatpush2.bf16.msra.mxu1 %v3278_v19  ;;  %1841 = vmatprep.subr.bf16.mxu0 %v3283_v20  ;;  %v3373_v19 = vld [vmem:[#allocation2 + $0x58c] ss:$16 sps:$4 sm:$0xff]  }
  0xbd   :  { %1882 = vmatprep.subr.bf16.mxu1 %v3286_v21  ;;  %v3376_v20 = vld [vmem:[#allocation2 + $0x78c] ss:$16 sps:$4 sm:$0xff]   ;;  %v3371_v21 = vld [vmem:[#allocation2 + $0x588] ss:$16 sps:$4 sm:$0xff]  }
  0xbf   :  { %1842 = vmatpush2.bf16.msra.mxu0 %v3281_v22  ;;  %v3374_v22 = vld [vmem:[#allocation2 + $0x788] ss:$16 sps:$4 sm:$0xff]  }
  0xc0   :  { %1883 = vmatpush2.bf16.msra.mxu1 %v3284_v23  ;;  %1843 = vmatprep.subr.bf16.mxu0 %v3289_v24  ;;  %v3379_v23 = vld [vmem:[#allocation2 + $0x56c] ss:$16 sps:$4 sm:$0xff]  }
  0xc1   :  { %1884 = vmatprep.subr.bf16.mxu1 %v3292_v25  ;;  %v3382_v24 = vld [vmem:[#allocation2 + $0x76c] ss:$16 sps:$4 sm:$0xff]   ;;  %v3377_v25 = vld [vmem:[#allocation2 + $0x568] ss:$16 sps:$4 sm:$0xff]  }
  0xc3   :  { %1844 = vmatpush2.bf16.msra.mxu0 %v3287_v26  ;;  %v3380_v26 = vld [vmem:[#allocation2 + $0x768] ss:$16 sps:$4 sm:$0xff]  }
  0xc4   :  { %1885 = vmatpush2.bf16.msra.mxu1 %v3290_v27  ;;  %1845 = vmatprep.subr.bf16.mxu0 %v3295_v28  ;;  %v3385_v27 = vld [vmem:[#allocation2 + $0x54c] ss:$16 sps:$4 sm:$0xff]  }
  0xc5   :  { %1886 = vmatprep.subr.bf16.mxu1 %v3298_v29  ;;  %v3388_v28 = vld [vmem:[#allocation2 + $0x74c] ss:$16 sps:$4 sm:$0xff]   ;;  %v3383_v29 = vld [vmem:[#allocation2 + $0x548] ss:$16 sps:$4 sm:$0xff]  }
  0xc7   :  { %1846 = vmatpush2.bf16.msra.mxu0 %v3293_v30  ;;  %v3386_v30 = vld [vmem:[#allocation2 + $0x748] ss:$16 sps:$4 sm:$0xff]  }
  0xc8   :  { %1887 = vmatpush2.bf16.msra.mxu1 %v3296_v33  ;;  %1847 = vmatprep.subr.bf16.mxu0 %v3301_v34  ;;  %v3391_v33 = vld [vmem:[#allocation2 + $0x52c] ss:$16 sps:$4 sm:$0xff]  }
  0xc9   :  { %1888 = vmatprep.subr.bf16.mxu1 %v3304_v35  ;;  %v3394_v34 = vld [vmem:[#allocation2 + $0x72c] ss:$16 sps:$4 sm:$0xff]   ;;  %v3389_v35 = vld [vmem:[#allocation2 + $0x528] ss:$16 sps:$4 sm:$0xff]  }
  0xcb   :  { %1848 = vmatpush2.bf16.msra.mxu0 %v3299_v36  ;;  %v3392_v36 = vld [vmem:[#allocation2 + $0x728] ss:$16 sps:$4 sm:$0xff]  }
  0xcc   :  { %1889 = vmatpush2.bf16.msra.mxu1 %v3302_v37  ;;  %1899 = vmatprep.subr.bf16.mxu0 %v3307_v38  ;;  %v3397_v37 = vld [vmem:[#allocation2 + $0x50c] ss:$16 sps:$4 sm:$0xff]  }
  0xcd   :  { %1940 = vmatprep.subr.bf16.mxu1 %v3310_v39  ;;  %v3400_v38 = vld [vmem:[#allocation2 + $0x70c] ss:$16 sps:$4 sm:$0xff]   ;;  %v3395_v39 = vld [vmem:[#allocation2 + $0x508] ss:$16 sps:$4 sm:$0xff]  }
  0xce   :  { %1850 = vmatmul.mubr.bf16.vlgmr.msra.gmra.mxu0 %v3598_v16  ;;  %v3328_v16 = vld [vmem:[#allocation2 + $0x68c] ss:$16 sps:$4 sm:$0xff]  }
  0xcf   :  { %1891 = vmatmul.mubr.bf16.vlgmr.msra.gmra.mxu1 %v3600_v17  ;;  %1900 = vmatpush1.bf16.msra.mxu0 %v3305_v40  ;;  %v3326_v17 = vld [vmem:[#allocation2 + $0x688] ss:$16 sps:$4 sm:$0xff]  }
  0xd0   :  { %1941 = vmatpush1.bf16.msra.mxu1 %v3308_v41  ;;  %1901 = vmatprep.subr.bf16.mxu0 %v3313_v42  ;;  %v3398_v40 = vld [vmem:[#allocation2 + $0x708] ss:$16 sps:$4 sm:$0xff]   ;;  %v3403_v41 = vld [vmem:[%s3926_s3 + $0x74] ss:$8 sps:$4 sm:$0xff]  }
  0xd1   :  { %1942 = vmatprep.subr.bf16.mxu1 %v3316_v44  ;;  %1931 = vmatprep.mubr.bf16.mxu0 %v3615_v53  ;;  %v3340_v53 = vld [vmem:[#allocation2 + $0x64c] ss:$16 sps:$4 sm:$0xff]   ;;  %v3401_v42 = vld [vmem:[%s3926_s3 + $0x70] ss:$8 sps:$4 sm:$0xff]  }
  0xd2   :  { %1972 = vmatprep.mubr.bf16.mxu1 %v3619_v57  ;;  %v3335_v57 = vld [vmem:[#allocation2 + $0x448] ss:$16 sps:$4 sm:$0xff]   ;;  %v3406_v44 = vld [vmem:[%s3926_s3 + $0x64] ss:$8 sps:$4 sm:$0xff]  }
  0xd3   :  { %1902 = vmatpush1.bf16.msra.mxu0 %v3311_v45 }
  0xd4   :  { %1943 = vmatpush1.bf16.msra.mxu1 %v3314_v46  ;;  %1903 = vmatprep.subr.bf16.mxu0 %v3319_v47  ;;  %v3404_v47 = vld [vmem:[%s3926_s3 + $0x60] ss:$8 sps:$4 sm:$0xff]  }
  0xd5   :  { %1944 = vmatprep.subr.bf16.mxu1 %v3322_v48 }
  0xd7   :  { %1904 = vmatpush1.bf16.msra.mxu0 %v3317_v50 }
  0xd8   :  { %1945 = vmatpush1.bf16.msra.mxu1 %v3320_v62  ;;  %1905 = vmatprep.subr.bf16.mxu0 %v3325_v3  ;;  %v3409_v62 = vld [vmem:[%s3926_s3 + $0x54] ss:$8 sps:$4 sm:$0xff]  }
  0xd9   :  { %1946 = vmatprep.subr.bf16.mxu1 %v3328_v16 }
  0xdb   :  { %1906 = vmatpush1.bf16.msra.mxu0 %v3323_v51 }
  0xdc   :  { %1947 = vmatpush1.bf16.msra.mxu1 %v3326_v17  ;;  %1907 = vmatprep.subr.bf16.mxu0 %v3331_v52  ;;  %v3412_v17 = vld [vmem:[%s3926_s3 + $0x44] ss:$8 sps:$4 sm:$0xff]   ;;  %v3449_v52 = vld [vmem:[%s3926_s3 + $0x170] ss:$8 sps:$4 sm:$0xff]  }
  0xdd   :  { %1948 = vmatprep.subr.bf16.mxu1 %v3334_v54  ;;  %v3451_v54 = vld [vmem:[%s3926_s3 + $0x174] ss:$8 sps:$4 sm:$0xff]  }
  0xdf   :  { %1908 = vmatpush1.bf16.msra.mxu0 %v3329_v55  ;;  %v3454_v55 = vld [vmem:[%s3926_s3 + $0x164] ss:$8 sps:$4 sm:$0xff]  }
  0xe0   :  { %1949 = vmatpush1.bf16.msra.mxu1 %v3332_v56  ;;  %1909 = vmatprep.subr.bf16.mxu0 %v3337_v58  ;;  %v3410_v56 = vld [vmem:[%s3926_s3 + $0x40] ss:$8 sps:$4 sm:$0xff]  }
  0xe1   :  { %1950 = vmatprep.subr.bf16.mxu1 %v3340_v53  ;;  %v3452_v58 = vld [vmem:[%s3926_s3 + $0x160] ss:$8 sps:$4 sm:$0xff]   ;;  %v3415_v53 = vld [vmem:[%s3926_s3 + $0x34] ss:$8 sps:$4 sm:$0xff]  }
  0xe3   :  { %1910 = vmatpush1.bf16.msra.mxu0 %v3335_v57  ;;  %v3457_v57 = vld [vmem:[%s3926_s3 + $0x154] ss:$8 sps:$4 sm:$0xff]  }
  0xe4   :  { %1951 = vmatpush1.bf16.msra.mxu1 %v3338_v49  ;;  %1911 = vmatprep.subr.bf16.mxu0 %v3343_v59  ;;  %v3413_v49 = vld [vmem:[%s3926_s3 + $0x30] ss:$8 sps:$4 sm:$0xff]  }
  0xe5   :  { %1952 = vmatprep.subr.bf16.mxu1 %v3346_v60  ;;  %v3455_v59 = vld [vmem:[%s3926_s3 + $0x150] ss:$8 sps:$4 sm:$0xff]   ;;  %v3418_v60 = vld [vmem:[%s3926_s3 + $0x24] ss:$8 sps:$4 sm:$0xff]  }
  0xe7   :  { %1912 = vmatpush1.bf16.msra.mxu0 %v3341_v61  ;;  %v3460_v61 = vld [vmem:[%s3926_s3 + $0x144] ss:$8 sps:$4 sm:$0xff]  }
  0xe8   :  { %1953 = vmatpush1.bf16.msra.mxu1 %v3344_v63  ;;  %1913 = vmatprep.subr.bf16.mxu0 %v3349_v0  ;;  %v3416_v63 = vld [vmem:[%s3926_s3 + $0x20] ss:$8 sps:$4 sm:$0xff]  }
  0xe9   :  { %1954 = vmatprep.subr.bf16.mxu1 %v3352_v1  ;;  %v3458_v0 = vld [vmem:[%s3926_s3 + $0x140] ss:$8 sps:$4 sm:$0xff]   ;;  %v3421_v1 = vld [vmem:[%s3926_s3 + $0x14] ss:$8 sps:$4 sm:$0xff]  }
  0xeb   :  { %1914 = vmatpush1.bf16.msra.mxu0 %v3347_v2  ;;  %v3463_v2 = vld [vmem:[%s3926_s3 + $0x134] ss:$8 sps:$4 sm:$0xff]  }
  0xec   :  { %1955 = vmatpush1.bf16.msra.mxu1 %v3350_v4  ;;  %1915 = vmatprep.subr.bf16.mxu0 %v3355_v5  ;;  %v3419_v4 = vld [vmem:[%s3926_s3 + $0x10] ss:$8 sps:$4 sm:$0xff]  }
  0xed   :  { %1956 = vmatprep.subr.bf16.mxu1 %v3358_v6  ;;  %v3461_v5 = vld [vmem:[%s3926_s3 + $0x130] ss:$8 sps:$4 sm:$0xff]   ;;  %v3424_v6 = vld [vmem:[%s3926_s3 + $0x4] ss:$8 sps:$4 sm:$0xff]  }
  0xef   :  { %1916 = vmatpush2.bf16.msra.mxu0 %v3353_v7  ;;  %v3466_v7 = vld [vmem:[%s3926_s3 + $0x124] ss:$8 sps:$4 sm:$0xff]  }
  0xf0   :  { %1957 = vmatpush2.bf16.msra.mxu1 %v3356_v8  ;;  %1917 = vmatprep.subr.bf16.mxu0 %v3361_v9  ;;  %v3422_v8 = vld [vmem:[%s3926_s3] ss:$8 sps:$4 sm:$0xff]  }
  0xf1   :  { %1958 = vmatprep.subr.bf16.mxu1 %v3364_v10  ;;  %v3464_v9 = vld [vmem:[%s3926_s3 + $0x120] ss:$8 sps:$4 sm:$0xff]   ;;  %v3427_v10 = vld [vmem:[%s3926_s3 + $0xf4] ss:$8 sps:$4 sm:$0xff]  }
  0xf3   :  { %1918 = vmatpush2.bf16.msra.mxu0 %v3359_v11  ;;  %v3469_v11 = vld [vmem:[%s3926_s3 + $0x114] ss:$8 sps:$4 sm:$0xff]  }
  0xf4   :  { %1959 = vmatpush2.bf16.msra.mxu1 %v3362_v12  ;;  %1919 = vmatprep.subr.bf16.mxu0 %v3367_v13  ;;  %v3425_v12 = vld [vmem:[%s3926_s3 + $0xf0] ss:$8 sps:$4 sm:$0xff]  }
  0xf5   :  { %1960 = vmatprep.subr.bf16.mxu1 %v3370_v14  ;;  %v3467_v13 = vld [vmem:[%s3926_s3 + $0x110] ss:$8 sps:$4 sm:$0xff]   ;;  %v3430_v14 = vld [vmem:[%s3926_s3 + $0xe4] ss:$8 sps:$4 sm:$0xff]  }
  0xf7   :  { %1920 = vmatpush2.bf16.msra.mxu0 %v3365_v15  ;;  %v3472_v15 = vld [vmem:[%s3926_s3 + $0x104] ss:$8 sps:$4 sm:$0xff]  }
  0xf8   :  { %1961 = vmatpush2.bf16.msra.mxu1 %v3368_v18  ;;  %1921 = vmatprep.subr.bf16.mxu0 %v3373_v19  ;;  %v3428_v18 = vld [vmem:[%s3926_s3 + $0xe0] ss:$8 sps:$4 sm:$0xff]  }
  0xf9   :  { %1962 = vmatprep.subr.bf16.mxu1 %v3376_v20  ;;  %v3470_v19 = vld [vmem:[%s3926_s3 + $0x100] ss:$8 sps:$4 sm:$0xff]   ;;  %v3433_v20 = vld [vmem:[%s3926_s3 + $0xd4] ss:$8 sps:$4 sm:$0xff]  }
  0xfb   :  { %1922 = vmatpush2.bf16.msra.mxu0 %v3371_v21  ;;  %v3475_v21 = vld [vmem:[%s3926_s3 + $0x1f4] ss:$8 sps:$4 sm:$0xff]  }
  0xfc   :  { %1963 = vmatpush2.bf16.msra.mxu1 %v3374_v22  ;;  %1923 = vmatprep.subr.bf16.mxu0 %v3379_v23  ;;  %v3431_v22 = vld [vmem:[%s3926_s3 + $0xd0] ss:$8 sps:$4 sm:$0xff]  }
  0xfd   :  { %1964 = vmatprep.subr.bf16.mxu1 %v3382_v24  ;;  %v3473_v23 = vld [vmem:[%s3926_s3 + $0x1f0] ss:$8 sps:$4 sm:$0xff]   ;;  %v3436_v24 = vld [vmem:[%s3926_s3 + $0xc4] ss:$8 sps:$4 sm:$0xff]  }
  0xff   :  { %1924 = vmatpush2.bf16.msra.mxu0 %v3377_v25  ;;  %v3478_v25 = vld [vmem:[%s3926_s3 + $0x1e4] ss:$8 sps:$4 sm:$0xff]  }
 0x100   :  { %1965 = vmatpush2.bf16.msra.mxu1 %v3380_v26  ;;  %1925 = vmatprep.subr.bf16.mxu0 %v3385_v27  ;;  %v3434_v26 = vld [vmem:[%s3926_s3 + $0xc0] ss:$8 sps:$4 sm:$0xff]  }
 0x101   :  { %1966 = vmatprep.subr.bf16.mxu1 %v3388_v28  ;;  %v3476_v27 = vld [vmem:[%s3926_s3 + $0x1e0] ss:$8 sps:$4 sm:$0xff]   ;;  %v3439_v28 = vld [vmem:[%s3926_s3 + $0xb4] ss:$8 sps:$4 sm:$0xff]  }
 0x103   :  { %1926 = vmatpush2.bf16.msra.mxu0 %v3383_v29  ;;  %v3481_v29 = vld [vmem:[%s3926_s3 + $0x1d4] ss:$8 sps:$4 sm:$0xff]  }
 0x104   :  { %1967 = vmatpush2.bf16.msra.mxu1 %v3386_v30  ;;  %1927 = vmatprep.subr.bf16.mxu0 %v3391_v33  ;;  %v3437_v30 = vld [vmem:[%s3926_s3 + $0xb0] ss:$8 sps:$4 sm:$0xff]  }
 0x105   :  { %1968 = vmatprep.subr.bf16.mxu1 %v3394_v34  ;;  %v3479_v33 = vld [vmem:[%s3926_s3 + $0x1d0] ss:$8 sps:$4 sm:$0xff]   ;;  %v3442_v34 = vld [vmem:[%s3926_s3 + $0xa4] ss:$8 sps:$4 sm:$0xff]  }
 0x107   :  { %1928 = vmatpush2.bf16.msra.mxu0 %v3389_v35  ;;  %v3484_v35 = vld [vmem:[%s3926_s3 + $0x1c4] ss:$8 sps:$4 sm:$0xff]  }
 0x108   :  { %1969 = vmatpush2.bf16.msra.mxu1 %v3392_v36  ;;  %1929 = vmatprep.subr.bf16.mxu0 %v3397_v37  ;;  %v3440_v36 = vld [vmem:[%s3926_s3 + $0xa0] ss:$8 sps:$4 sm:$0xff]  }
 0x109   :  { %1970 = vmatprep.subr.bf16.mxu1 %v3400_v38  ;;  %v3482_v37 = vld [vmem:[%s3926_s3 + $0x1c0] ss:$8 sps:$4 sm:$0xff]   ;;  %v3445_v38 = vld [vmem:[%s3926_s3 + $0x94] ss:$8 sps:$4 sm:$0xff]  }
 0x10b   :  { %1930 = vmatpush2.bf16.msra.mxu0 %v3395_v39  ;;  %v3487_v39 = vld [vmem:[%s3926_s3 + $0x1b4] ss:$8 sps:$4 sm:$0xff]  }
 0x10c   :  { %1971 = vmatpush2.bf16.msra.mxu1 %v3398_v40  ;;  %2385 = vmatprep.subr.bf16.mxu0 %v3403_v41  ;;  %v355_v40 = vsub.s32 0, %v3582_v43  ;;  %v3815_v41 = vld [vmem:[%s3925_s2] sm:$0xf] }
 0x10d   :  { %2426 = vmatprep.subr.bf16.mxu1 %v3451_v54  ;;  %v3488_v54 = vld [vmem:[%s3926_s3 + $0x1a0] ss:$8 sps:$4 sm:$0xff]  }
 0x10e   :  { %v3648_v45 = vpop.f32.mrf.mxu0  ;;  %1932 = vmatmul.mubr.bf16.vlgmr.msra.gmra.mxu0 %v3625_v31  ;;  %v3407_v31 = vld [vmem:[%s3926_s3 + $0x50] ss:$8 sps:$4 sm:$0xff]  }
 0x10f   :  { %v3650_v46 = vpop.f32.mrf.mxu1  ;;  %1973 = vmatmul.mubr.bf16.vlgmr.msra.gmra.mxu1 %v3629_v32  ;;  %2386 = vmatpush1.bf16.msra.mxu0 %v3401_v42  ;;  %v359_v42 = vsub.s32 1, %v3582_v43 }
 0x110   :  { %v3657_v48 = vpop.f32.mrf.mxu0  ;;  %2387 = vmatprep.subr.bf16.mxu0 %v3406_v44  ;;  %2427 = vmatpush1.bf16.msra.mxu1 %v3449_v52  ;;  %v3443_v44 = vld [vmem:[%s3926_s3 + $0x90] ss:$8 sps:$4 sm:$0xff]  }
 0x111   :  { %v3659_v50 = vpop.f32.mrf.mxu1  ;;  %2428 = vmatprep.subr.bf16.mxu1 %v3454_v55 }
 0x112   :  { %v1691_v3 = vpop.f32.mrf.mxu0 }
 0x113   :  { %v1732_v16 = vpop.f32.mrf.mxu1  ;;  %2388 = vmatpush1.bf16.msra.mxu0 %v3404_v47  ;;  %v3485_v47 = vld [vmem:[%s3926_s3 + $0x1b0] ss:$8 sps:$4 sm:$0xff]   ;;  %v356_v3 = vrot.slane %v3815_v41, %v355_v40 }
 0x114   :  { %v1692_v32 = vpop.f32.mrf.mxu0  ;;  %2389 = vmatprep.subr.bf16.mxu0 %v3409_v62  ;;  %2429 = vmatpush1.bf16.msra.mxu1 %v3452_v58  ;;  %v3448_v62 = vld [vmem:[%s3926_s3 + $0x84] ss:$8 sps:$4 sm:$0xff]   ;;  %v360_v16 = vrot.slane %v3815_v41, %v359_v42 }
 0x115   :  { %v1733_v51 = vpop.f32.mrf.mxu1  ;;  %2430 = vmatprep.subr.bf16.mxu1 %v3457_v57  ;;  %v1688_v32 = vadd.f32 %v3648_v45, %v356_v3  ;;  %v3493_v57 = vld [vmem:[%s3926_s3 + $0x194] ss:$8 sps:$4 sm:$0xff]  }
 0x116   :  { %v1690_v51 = vadd.f32 %v3657_v48, %v360_v16 }
 0x117   :  { %2390 = vmatpush1.bf16.msra.mxu0 %v3407_v31  ;;  %v3446_v31 = vld [vmem:[%s3926_s3 + $0x80] ss:$8 sps:$4 sm:$0xff]   ;;  %v1729_v52 = vadd.f32 %v3650_v46, %v1688_v32  ;;  %v3491_v46 = vld [vmem:[%s3926_s3 + $0x190] ss:$8 sps:$4 sm:$0xff]  }
 0x118   :  { %2391 = vmatprep.subr.bf16.mxu0 %v3412_v17  ;;  %2431 = vmatpush1.bf16.msra.mxu1 %v3455_v59  ;;  %v3490_v17 = vld [vmem:[%s3926_s3 + $0x1a4] ss:$8 sps:$4 sm:$0xff]   ;;  %v1731_v58 = vadd.f32 %v3659_v50, %v1690_v51 }
 0x119   :  { %2432 = vmatprep.subr.bf16.mxu1 %v3460_v61 }
 0x11b   :  { %2392 = vmatpush1.bf16.msra.mxu0 %v3410_v56 }
 0x11c   :  { %2393 = vmatprep.subr.bf16.mxu0 %v3415_v53  ;;  %2433 = vmatpush1.bf16.msra.mxu1 %v3458_v0 }
 0x11d   :  { %2434 = vmatprep.subr.bf16.mxu1 %v3463_v2  ;;  %v3496_v2 = vld [vmem:[%s3926_s3 + $0x184] ss:$8 sps:$4 sm:$0xff]  }
 0x11f   :  { %2394 = vmatpush1.bf16.msra.mxu0 %v3413_v49 }
 0x120   :  { %2395 = vmatprep.subr.bf16.mxu0 %v3418_v60  ;;  %2435 = vmatpush1.bf16.msra.mxu1 %v3461_v5  ;;  %v3494_v5 = vld [vmem:[%s3926_s3 + $0x180] ss:$8 sps:$4 sm:$0xff]  }
 0x121   :  { %2436 = vmatprep.subr.bf16.mxu1 %v3466_v7 }
 0x123   :  { %2396 = vmatpush1.bf16.msra.mxu0 %v3416_v63 }
 0x124   :  { %2397 = vmatprep.subr.bf16.mxu0 %v3421_v1  ;;  %2437 = vmatpush1.bf16.msra.mxu1 %v3464_v9 }
 0x125   :  { %2438 = vmatprep.subr.bf16.mxu1 %v3469_v11 }
 0x127   :  { %2398 = vmatpush1.bf16.msra.mxu0 %v3419_v4 }
 0x128   :  { %2399 = vmatprep.subr.bf16.mxu0 %v3424_v6  ;;  %2439 = vmatpush1.bf16.msra.mxu1 %v3467_v13 }
 0x129   :  { %2440 = vmatprep.subr.bf16.mxu1 %v3472_v15 }
 0x12b   :  { %2400 = vmatpush1.bf16.msra.mxu0 %v3422_v8 }
 0x12c   :  { %2401 = vmatprep.subr.bf16.mxu0 %v3427_v10  ;;  %2441 = vmatpush1.bf16.msra.mxu1 %v3470_v19  ;;  %v3498_v19 = vld [vmem:[%s3928_s5 + $0x38] sm:$0xff]  }
 0x12d   :  { %2442 = vmatprep.subr.bf16.mxu1 %v3475_v21  ;;  %v3500_v21 = vld [vmem:[%s3928_s5 + $0x30] sm:$0xff]  }
 0x12f   :  { %2402 = vmatpush2.bf16.msra.mxu0 %v3425_v12 }
 0x130   :  { %2403 = vmatprep.subr.bf16.mxu0 %v3430_v14  ;;  %2443 = vmatpush2.bf16.msra.mxu1 %v3473_v23  ;;  %v3502_v23 = vld [vmem:[%s3928_s5 + $0x28] sm:$0xff]  }
 0x131   :  { %2444 = vmatprep.subr.bf16.mxu1 %v3478_v25  ;;  %v3504_v25 = vld [vmem:[%s3928_s5 + $0x20] sm:$0xff]  }
 0x133   :  { %2404 = vmatpush2.bf16.msra.mxu0 %v3428_v18  ;;  %v3497_v18 = vld [vmem:[%s3928_s5 + $0x78] sm:$0xff]  }
 0x134   :  { %2405 = vmatprep.subr.bf16.mxu0 %v3433_v20  ;;  %2445 = vmatpush2.bf16.msra.mxu1 %v3476_v27  ;;  %v3499_v20 = vld [vmem:[%s3928_s5 + $0x70] sm:$0xff]   ;;  %v3506_v27 = vld [vmem:[%s3928_s5 + $0x18] sm:$0xff]  }
 0x135   :  { %2446 = vmatprep.subr.bf16.mxu1 %v3481_v29  ;;  %v3508_v29 = vld [vmem:[%s3928_s5 + $0x10] sm:$0xff]  }
 0x137   :  { %2406 = vmatpush2.bf16.msra.mxu0 %v3431_v22  ;;  %v3501_v22 = vld [vmem:[%s3928_s5 + $0x68] sm:$0xff]  }
 0x138   :  { %2407 = vmatprep.subr.bf16.mxu0 %v3436_v24  ;;  %2447 = vmatpush2.bf16.msra.mxu1 %v3479_v33  ;;  %v3503_v24 = vld [vmem:[%s3928_s5 + $0x60] sm:$0xff]   ;;  %v367_v33 = vsub.s32 3, %v3582_v43 }
 0x139   :  { %2448 = vmatprep.subr.bf16.mxu1 %v3484_v35 }
 0x13a   :  { %v368_v35 = vrot.slane %v3815_v41, %v367_v33 }
 0x13b   :  { %2408 = vmatpush2.bf16.msra.mxu0 %v3434_v26  ;;  %v3505_v26 = vld [vmem:[%s3928_s5 + $0x58] sm:$0xff]  }
 0x13c   :  { %2409 = vmatprep.subr.bf16.mxu0 %v3439_v28  ;;  %2449 = vmatpush2.bf16.msra.mxu1 %v3482_v37  ;;  %v3507_v28 = vld [vmem:[%s3928_s5 + $0x50] sm:$0xff]  }
 0x13d   :  { %2450 = vmatprep.subr.bf16.mxu1 %v3487_v39 }
 0x13f   :  { %2410 = vmatpush2.bf16.msra.mxu0 %v3437_v30  ;;  %v363_v30 = vsub.s32 2, %v3582_v43  ;;  %v2972_v43 = vld [vmem:[%s3929_s6] ss:$0 sm:$0xff] }
 0x140   :  { %2411 = vmatprep.subr.bf16.mxu0 %v3442_v34  ;;  %2451 = vmatpush2.bf16.msra.mxu1 %v3485_v47 }
 0x141   :  { %2452 = vmatprep.subr.bf16.mxu1 %v3490_v17  ;;  %v364_v34 = vrot.slane %v3815_v41, %v363_v30 }
 0x143   :  { %2412 = vmatpush2.bf16.msra.mxu0 %v3440_v36 }
 0x144   :  { %2413 = vmatprep.subr.bf16.mxu0 %v3445_v38  ;;  %2453 = vmatpush2.bf16.msra.mxu1 %v3488_v54 }
 0x145   :  { %2454 = vmatprep.subr.bf16.mxu1 %v3493_v57  ;;  %v3510_v57 = vld [vmem:[%s3928_s5 + $0x8] sm:$0xff]  }
 0x147   :  { %2414 = vmatpush2.bf16.msra.mxu0 %v3443_v44 }
 0x148   :  { %2415 = vmatprep.subr.bf16.mxu0 %v3448_v62  ;;  %2455 = vmatpush2.bf16.msra.mxu1 %v3491_v46  ;;  %v3511_v46 = vld [vmem:[%s3928_s5 + $0x40] sm:$0xff]  }
 0x149   :  { %2456 = vmatprep.subr.bf16.mxu1 %v3496_v2 }
 0x14b   :  { %2416 = vmatpush2.bf16.msra.mxu0 %v3446_v31 }
 0x14c   :  { %2457 = vmatpush2.bf16.msra.mxu1 %v3494_v5  ;;  %2989 = vmatprep.subr.bf16.mxu0 %v3497_v18 }
 0x14e   :  { %v1769_v55 = vpop.f32.mrf.mxu0 }
 0x14f   :  { %v1810_v56 = vpop.f32.mrf.mxu1  ;;  %v1770_v53 = vadd.f32 %v1769_v55, %v1729_v52 }
 0x150   :  { %v1771_v45 = vpop.f32.mrf.mxu0 }
 0x151   :  { %v1812_v48 = vpop.f32.mrf.mxu1  ;;  %v1811_v49 = vadd.f32 %v1810_v56, %v1770_v53  ;;  %v1772_v59 = vadd.f32 %v1771_v45, %v1731_v58 }
 0x152   :  { %v1773_v60 = vpop.f32.mrf.mxu0 }
 0x153   :  { %v1814_v61 = vpop.f32.mrf.mxu1  ;;  %v1813_v63 = vadd.f32 %v1812_v48, %v1772_v59  ;;  %v1981_v50 = vmax.f32 %v1811_v49, 0.0  ;;  %v3509_v48 = vld [vmem:[%s3928_s5 + $0x48] sm:$0xff]   ;;  %v3512_v60 = vld [vmem:[%s3928_s5] sm:$0xff]  }
 0x154   :  { %v1774_v0 = vpop.f32.mrf.mxu0 }
 0x155   :  { %v1815_v1 = vpop.f32.mrf.mxu1  ;;  %v1982_v4 = vmax.f32 %v1813_v63, 0.0  ;;  %v2050_v7 = vpack.c.bf16 %v1981_v50, %v1981_v50  ;;  %v2049_v63 = vld [vmem:[%s3927_s4] sm:$0x3] }
 0x156   :  { %v2058_v50 = vrot.slane %v2049_v63, %v355_v40  ;;  %v2062_v0 = vrot.slane %v2049_v63, %v359_v42 }
 0x157   :  { %v2051_v6 = vpack.c.bf16 %v1982_v4, %v1982_v4 }
 0x159   :  { %2417 = vmatprep.mubr.bf16.mxu0 %v2051_v6 }
 0x15a   :  { %2418 = vmatmul.mubr.bf16.vlgmr.msra.gmra.mxu0 %v2050_v7 }
 0x15b   :  { %2990 = vmatpush3.bf16.msra.mxu0 %v3498_v19 }
 0x15c   :  { %2991 = vmatprep.subr.bf16.mxu0 %v3499_v20 }
 0x15f   :  { %2992 = vmatpush3.bf16.msra.mxu0 %v3500_v21 }
 0x160   :  { %2993 = vmatprep.subr.bf16.mxu0 %v3501_v22 }
 0x163   :  { %2994 = vmatpush3.bf16.msra.mxu0 %v3502_v23 }
 0x164   :  { %2995 = vmatprep.subr.bf16.mxu0 %v3503_v24 }
 0x167   :  { %2996 = vmatpush3.bf16.msra.mxu0 %v3504_v25 }
 0x168   :  { %2997 = vmatprep.subr.bf16.mxu0 %v3505_v26 }
 0x16b   :  { %2998 = vmatpush3.bf16.msra.mxu0 %v3506_v27 }
 0x16c   :  { %2999 = vmatprep.subr.bf16.mxu0 %v3507_v28 }
 0x16f   :  { %3000 = vmatpush3.bf16.msra.mxu0 %v3508_v29 }
 0x170   :  { %3001 = vmatprep.subr.bf16.mxu0 %v3509_v48 }
 0x173   :  { %3002 = vmatpush3.bf16.msra.mxu0 %v3510_v57 }
 0x174   :  { %3003 = vmatprep.subr.bf16.mxu0 %v3511_v46 }
 0x177   :  { %3004 = vmatpush3.bf16.msra.mxu0 %v3512_v60 }
 0x18e   :  { %v1851_v8 = vpop.f32.mrf.mxu0 }
 0x18f   :  { %v1892_v9 = vpop.f32.mrf.mxu1  ;;  %v1852_v36 = vadd.f32 %v1851_v8, %v364_v34 }
 0x190   :  { %v1853_v10 = vpop.f32.mrf.mxu0 }
 0x191   :  { %v1894_v11 = vpop.f32.mrf.mxu1  ;;  %v1854_v37 = vadd.f32 %v1853_v10, %v368_v35  ;;  %v1893_v38 = vadd.f32 %v1892_v9, %v1852_v36 }
 0x192   :  { %v1855_v12 = vpop.f32.mrf.mxu0 }
 0x193   :  { %v1896_v13 = vpop.f32.mrf.mxu1  ;;  %v1895_v47 = vadd.f32 %v1894_v11, %v1854_v37 }
 0x194   :  { %v1856_v14 = vpop.f32.mrf.mxu0 }
 0x195   :  { %v1897_v15 = vpop.f32.mrf.mxu1 }
 0x1ce   :  { %v1933_v39 = vpop.f32.mrf.mxu0 }
 0x1cf   :  { %v1974_v44 = vpop.f32.mrf.mxu1  ;;  %v1934_v62 = vadd.f32 %v1933_v39, %v1893_v38 }
 0x1d0   :  { %v1935_v3 = vpop.f32.mrf.mxu0 }
 0x1d1   :  { %v1976_v16 = vpop.f32.mrf.mxu1  ;;  %v1975_v31 = vadd.f32 %v1974_v44, %v1934_v62  ;;  %v1936_v32 = vadd.f32 %v1935_v3, %v1895_v47 }
 0x1d2   :  { %v1937_v51 = vpop.f32.mrf.mxu0 }
 0x1d3   :  { %v1978_v17 = vpop.f32.mrf.mxu1  ;;  %v1977_v52 = vadd.f32 %v1976_v16, %v1936_v32  ;;  %v1983_v54 = vmax.f32 %v1975_v31, 0.0 }
 0x1d4   :  { %v1938_v55 = vpop.f32.mrf.mxu0 }
 0x1d5   :  { %v1979_v56 = vpop.f32.mrf.mxu1  ;;  %v1984_v58 = vmax.f32 %v1977_v52, 0.0  ;;  %v2052_v41 = vpack.c.bf16 %v1983_v54, %v1983_v54 }
 0x1d7   :  { %v2053_v53 = vpack.c.bf16 %v1984_v58, %v1984_v58 }
 0x1d9   :  { %2458 = vmatprep.mubr.bf16.mxu1 %v2053_v53 }
 0x1da   :  { %2459 = vmatmul.mubr.bf16.vlgmr.msra.gmra.mxu1 %v2052_v41 }
 0x21a   :  { %v2419_v45 = vpop.f32.mrf.mxu0 }
 0x21b   :  { %v2420_v1 = vadd.f32 %v2419_v45, %v2058_v50 }
 0x21c   :  { %v2421_v49 = vpop.f32.mrf.mxu0 }
 0x21d   :  { %v2422_v4 = vadd.f32 %v2421_v49, %v2062_v0 }
 0x21e   :  { %v2423_v59 = vpop.f32.mrf.mxu0 }
 0x220   :  { %v2424_v61 = vpop.f32.mrf.mxu0 }
 0x29a   :  { %v2460_v2 = vpop.f32.mrf.mxu1 }
 0x29b   :  { %v2461_v5 = vadd.f32 %v2460_v2, %v2420_v1 }
 0x29c   :  { %v2462_v6 = vpop.f32.mrf.mxu1 }
 0x29d   :  { %v2463_v7 = vadd.f32 %v2462_v6, %v2422_v4  ;;  %v2467_v8 = vmax.f32 %v2461_v5, 0.0 }
 0x29e   :  { %v2464_v9 = vpop.f32.mrf.mxu1 }
 0x29f   :  { %v2468_v10 = vmax.f32 %v2463_v7, 0.0  ;;  %v2502_v13 = vpack.c.bf16 %v2467_v8, %v2467_v8 }
 0x2a0   :  { %v2465_v11 = vpop.f32.mrf.mxu1 }
 0x2a1   :  { %v2503_v12 = vpack.c.bf16 %v2468_v10, %v2468_v10 }
 0x2a3   :  { %2638 = vmatprep.mubr.bf16.mxu0 %v2503_v12 }
 0x2a4   :  { %2639 = vmatmul.mubr.bf16.vlgmr.msra.gmra.mxu0 %v2502_v13 }
 0x364   :  { %v3005_v14 = vpop.f32.mrf.mxu0 }
 0x366   :  { %v3006_v40 = vpop.f32.mrf.mxu0 }
 0x367   :  { %v3007_v42 = vadd.f32 %v3006_v40, %v3005_v14 }
 0x368   :  { %v3008_v15 = vpop.f32.mrf.mxu0 }
 0x369   :  { %v2641_v18 = vadd.f32 %v3007_v42, %v2972_v43 }
 0x36a   :  { %v3009_v19 = vpop.f32.mrf.mxu0 }
 0x36b   :  { %2646 = vst [vmem:[%s3930_s7] sm:$0x3] %v2641_v18 }
 0x36c   :  { %2651 = vsyncpa [#allocation3], 1 }

</bundles_post_ra>
